<compile_context>
chip_gen: v5e
topology: v5e:2x2
jax: 0.10.0
libtpu: 0.0.40
codegen_flags: <defaults>
</compile_context>

<pallas_src>
import functools

import jax
import jax.numpy as jnp
from jax.experimental import pallas as pl
from jax.experimental.pallas import tpu as pltpu

EPS = 1e-5  # nn.BatchNorm2d default eps


# ---------------------------------------------------------------------------
# Tiling helpers
# ---------------------------------------------------------------------------
def _round_up(x, m):
    return ((x + m - 1) // m) * m


def _pick_row_tile(m):
    """Row (sublane) tile for the M = N*H*W axis; caller pads M up to a multiple."""
    for t in (512, 256, 128):
        if m % t == 0:
            return t
    if m > 128:
        return 128
    return _round_up(m, 8)


def _pick_tile(dim, candidates):
    """Lane/contraction tile: largest candidate dividing dim, else the full dim."""
    for t in candidates:
        if dim % t == 0:
            return t
    return dim


# ---------------------------------------------------------------------------
# Tiled matmul + bias (used for all 1x1 convs)
# ---------------------------------------------------------------------------
def _matmul_bias_kernel(x_ref, w_ref, b_ref, o_ref, acc_ref):
    k = pl.program_id(2)

    @pl.when(k == 0)
    def _():
        acc_ref[...] = jnp.zeros_like(acc_ref)

    acc_ref[...] += jnp.dot(x_ref[...], w_ref[...],
                            preferred_element_type=jnp.float32)

    @pl.when(k == pl.num_programs(2) - 1)
    def _():
        o_ref[...] = acc_ref[...] + b_ref[...]


def matmul_bias(x, w, b):
    """x: (M, K), w: (K, N), b: (N,) -> (M, N) f32.  bf16 MXU inputs, f32 accumulation."""
    M, K = x.shape
    _, N = w.shape
    x = x.astype(jnp.bfloat16)
    w = w.astype(jnp.bfloat16)
    b = b.astype(jnp.float32).reshape(1, N)

    tm = _pick_row_tile(M)
    mp = _round_up(M, tm)
    if mp != M:
        x = jnp.pad(x, ((0, mp - M), (0, 0)))         # zero rows -> zero matmul rows
    tn = _pick_tile(N, (256, 128))
    tk = _pick_tile(K, (512, 256, 128))

    out = pl.pallas_call(
        _matmul_bias_kernel,
        out_shape=jax.ShapeDtypeStruct((mp, N), jnp.float32),
        grid=(mp // tm, N // tn, K // tk),
        in_specs=[
            pl.BlockSpec((tm, tk), lambda i, j, k: (i, k)),
            pl.BlockSpec((tk, tn), lambda i, j, k: (k, j)),
            pl.BlockSpec((1, tn), lambda i, j, k: (0, j)),
        ],
        out_specs=pl.BlockSpec((tm, tn), lambda i, j, k: (i, j)),
        scratch_shapes=[pltpu.VMEM((tm, tn), jnp.float32)],
        compiler_params=pltpu.CompilerParams(
            dimension_semantics=("parallel", "parallel", "arbitrary")),
    )(x, w, b)
    return out[:M] if mp != M else out


# ---------------------------------------------------------------------------
# 3x3 conv, pad=1, stride=1 — per-image halo tile, 9 accumulated MXU matmuls
# (no materialized 9x im2col tensor through HBM)
# ---------------------------------------------------------------------------
def _conv3x3_kernel(x_ref, w_ref, b_ref, o_ref):
    # x_ref: (1, H+2, W+2, Cin) bf16 (spatially pre-padded image)
    # w_ref: (9, Cin, Cout) bf16 ; b_ref: (1, Cout) f32 ; o_ref: (1, H, W, Cout) f32
    _, H, W, cout = o_ref.shape
    cin = x_ref.shape[3]
    acc = jnp.zeros((H * W, cout), jnp.float32)
    for t in range(9):                                  # static unroll over taps
        dy, dx = divmod(t, 3)
        xs = x_ref[0, dy:dy + H, dx:dx + W, :].reshape(H * W, cin)
        acc = acc + jnp.dot(xs, w_ref[t], preferred_element_type=jnp.float32)
    o_ref[...] = (acc + b_ref[...]).reshape(1, H, W, cout)


def conv3x3_pad1(x_nhwc, w_oihw, b):
    N, H, W, C = x_nhwc.shape
    cout = w_oihw.shape[0]
    xp = jnp.pad(x_nhwc.astype(jnp.bfloat16), ((0, 0), (1, 1), (1, 1), (0, 0)))
    w9 = jnp.transpose(w_oihw, (2, 3, 1, 0)).reshape(9, C, cout).astype(jnp.bfloat16)
    b = b.astype(jnp.float32).reshape(1, cout)
    return pl.pallas_call(
        _conv3x3_kernel,
        out_shape=jax.ShapeDtypeStruct((N, H, W, cout), jnp.float32),
        grid=(N,),
        in_specs=[
            pl.BlockSpec((1, H + 2, W + 2, C), lambda n: (n, 0, 0, 0)),
            pl.BlockSpec((9, C, cout), lambda n: (0, 0, 0)),
            pl.BlockSpec((1, cout), lambda n: (0, 0)),
        ],
        out_specs=pl.BlockSpec((1, H, W, cout), lambda n: (n, 0, 0, 0)),
        compiler_params=pltpu.CompilerParams(dimension_semantics=("parallel",)),
    )(xp, w9, b)


# ---------------------------------------------------------------------------
# Two-pass tiled BatchNorm(+optional residual add) + ReLU
# ---------------------------------------------------------------------------
def _bn_stats_kernel(x_ref, stat_ref):
    @pl.when(pl.program_id(0) == 0)
    def _():
        stat_ref[...] = jnp.zeros_like(stat_ref)
    x = x_ref[...].astype(jnp.float32)
    s = jnp.sum(x, axis=0, keepdims=True)
    ss = jnp.sum(x * x, axis=0, keepdims=True)
    stat_ref[...] += jnp.concatenate([s, ss], axis=0)


def _add_bn_stats_kernel(x1_ref, x2_ref, stat_ref):
    @pl.when(pl.program_id(0) == 0)
    def _():
        stat_ref[...] = jnp.zeros_like(stat_ref)
    x = x1_ref[...].astype(jnp.float32) + x2_ref[...].astype(jnp.float32)
    s = jnp.sum(x, axis=0, keepdims=True)
    ss = jnp.sum(x * x, axis=0, keepdims=True)
    stat_ref[...] += jnp.concatenate([s, ss], axis=0)


def _apply_from_stats(x, stat_ref, g_ref, b_ref, inv_count, out_dtype):
    mean = stat_ref[0:1, :] * inv_count
    var = stat_ref[1:2, :] * inv_count - mean * mean     # biased variance
    inv = jax.lax.rsqrt(jnp.maximum(var, 0.0) + EPS)
    scale = g_ref[...] * inv
    shift = b_ref[...] - mean * scale
    return jnp.maximum(x * scale + shift, 0.0).astype(out_dtype)


def _bn_apply_relu_kernel(x_ref, stat_ref, g_ref, b_ref, o_ref, *, inv_count):
    x = x_ref[...].astype(jnp.float32)
    o_ref[...] = _apply_from_stats(x, stat_ref, g_ref, b_ref, inv_count, o_ref.dtype)


def _add_bn_apply_relu_kernel(x1_ref, x2_ref, stat_ref, g_ref, b_ref, o_ref, *, inv_count):
    x = x1_ref[...].astype(jnp.float32) + x2_ref[...].astype(jnp.float32)
    o_ref[...] = _apply_from_stats(x, stat_ref, g_ref, b_ref, inv_count, o_ref.dtype)


def bn_relu(x, gamma, beta, *, x2=None, out_dtype=jnp.float32):
    """Training-mode BatchNorm over rows (N*H*W) + ReLU, optionally fused with a residual
    add (x + x2).  Two tiled passes: stats accumulation, then apply."""
    M, C = x.shape
    tm = _pick_row_tile(M)
    mp = _round_up(M, tm)
    if mp != M:                                           # zero rows: no effect on sums
        x = jnp.pad(x, ((0, mp - M), (0, 0)))
        if x2 is not None:
            x2 = jnp.pad(x2, ((0, mp - M), (0, 0)))
    grid = (mp // tm,)
    g = gamma.astype(jnp.float32).reshape(1, C)
    b = beta.astype(jnp.float32).reshape(1, C)

    row_spec = pl.BlockSpec((tm, C), lambda i: (i, 0))
    stat_spec = pl.BlockSpec((2, C), lambda i: (0, 0))
    chan_spec = pl.BlockSpec((1, C), lambda i: (0, 0))

    data = (x,) if x2 is None else (x, x2)
    stats_kernel = _bn_stats_kernel if x2 is None else _add_bn_stats_kernel
    apply_kernel = _bn_apply_relu_kernel if x2 is None else _add_bn_apply_relu_kernel

    # Pass 1: per-channel sum / sum-of-squares, accumulated in a resident (2, C) output.
    stats = pl.pallas_call(
        stats_kernel,
        out_shape=jax.ShapeDtypeStruct((2, C), jnp.float32),
        grid=grid,
        in_specs=[row_spec] * len(data),
        out_specs=stat_spec,
        compiler_params=pltpu.CompilerParams(dimension_semantics=("arbitrary",)),
    )(*data)

    # Pass 2: normalize + affine + ReLU, tiled over rows.
    inv_count = 1.0 / float(M)                            # true row count (ignores zero pad)
    y = pl.pallas_call(
        functools.partial(apply_kernel, inv_count=inv_count),
        out_shape=jax.ShapeDtypeStruct((mp, C), out_dtype),
        grid=grid,
        in_specs=[row_spec] * len(data) + [stat_spec, chan_spec, chan_spec],
        out_specs=row_spec,
        compiler_params=pltpu.CompilerParams(dimension_semantics=("parallel",)),
    )(*data, stats, g, b)
    return y[:M] if mp != M else y


# ---------------------------------------------------------------------------
# Conv wrappers (stride slicing / reshapes are glue; matmuls are Pallas)
# ---------------------------------------------------------------------------
def conv1x1(x_nhwc, w_oihw, b, stride=1):
    if stride > 1:
        x_nhwc = x_nhwc[:, ::stride, ::stride, :]
    N, H, W, C = x_nhwc.shape
    cout = w_oihw.shape[0]
    w_mat = w_oihw[:, :, 0, 0].T                          # (Cin, Cout)
    y = matmul_bias(x_nhwc.reshape(N * H * W, C), w_mat, b)
    return y.reshape(N, H, W, cout)


# ---------------------------------------------------------------------------
# resblock: parameters + forward
# ---------------------------------------------------------------------------
def init_resblock_params(key, ich, mch, och, down=True):
    def conv_init(k, cout, cin, kh, kw):
        fan_in = cin * kh * kw
        bound = 1.0 / (fan_in ** 0.5)
        w = jax.random.uniform(k, (cout, cin, kh, kw), jnp.float32, -bound, bound)
        b = jax.random.uniform(jax.random.fold_in(k, 1), (cout,), jnp.float32,
                               -bound, bound)
        return w, b

    keys = jax.random.split(key, 4)
    p = {}
    p["w1"], p["b1"] = conv_init(keys[0], mch, ich, 1, 1)
    p["w2"], p["b2"] = conv_init(keys[1], mch, mch, 3, 3)
    p["w3"], p["b3"] = conv_init(keys[2], och, mch, 1, 1)
    p["g1"], p["be1"] = jnp.ones((mch,), jnp.float32), jnp.zeros((mch,), jnp.float32)
    p["g2"], p["be2"] = jnp.ones((mch,), jnp.float32), jnp.zeros((mch,), jnp.float32)
    p["g3"], p["be3"] = jnp.ones((och,), jnp.float32), jnp.zeros((och,), jnp.float32)
    if down or ich != och:
        p["ws"], p["bs"] = conv_init(keys[3], och, ich, 1, 1)
    else:
        p["ws"], p["bs"] = None, None
    return p


def resblock_forward(p, x_nchw, down=True):
    x = jnp.transpose(x_nchw, (0, 2, 3, 1)).astype(jnp.float32)   # NCHW -> NHWC
    s = 2 if down else 1

    # conv1 (1x1, stride s) -> BN1 -> ReLU   (BN output emitted in bf16 for the next matmul)
    h = conv1x1(x, p["w1"], p["b1"], stride=s)
    N, H, W, mch = h.shape
    M = N * H * W
    h = bn_relu(h.reshape(M, mch), p["g1"], p["be1"], out_dtype=jnp.bfloat16)
    h = h.reshape(N, H, W, mch)

    # conv2 (3x3, pad 1) -> BN2 -> ReLU
    h = conv3x3_pad1(h, p["w2"], p["b2"])
    h = bn_relu(h.reshape(M, mch), p["g2"], p["be2"], out_dtype=jnp.bfloat16)

    # conv3 (1x1)
    w3_mat = p["w3"][:, :, 0, 0].T
    x1 = matmul_bias(h, w3_mat, p["b3"])                          # (M, och) f32

    # skip path
    if p["ws"] is not None:
        x2 = conv1x1(x, p["ws"], p["bs"], stride=s).reshape(M, -1)
    else:
        x2 = x.reshape(M, -1)

    # fused residual add + BN3 + ReLU
    och = x1.shape[-1]
    out = bn_relu(x1, p["g3"], p["be3"], x2=x2, out_dtype=jnp.float32)
    out = out.reshape(N, H, W, och)
    return jnp.transpose(out, (0, 3, 1, 2))                        # NHWC -> NCHW


# ---------------------------------------------------------------------------
# Pure-JAX reference (lax.conv) for validation.  cast_bf16=True mirrors the kernel's
# mixed-precision policy (bf16 conv inputs, f32 accumulation, f32 BN math).
# ---------------------------------------------------------------------------
def _conv_ref(x, w, b, stride, pad, cast_bf16):
    if cast_bf16:
        x = x.astype(jnp.bfloat16)
        w = w.astype(jnp.bfloat16)
    y = jax.lax.conv_general_dilated(
        x, w, (stride, stride), [(pad, pad), (pad, pad)],
        dimension_numbers=("NCHW", "OIHW", "NCHW"),
        preferred_element_type=jnp.float32)
    return y + b[None, :, None, None]


def _bn_ref(x, g, be):
    mean = jnp.mean(x, axis=(0, 2, 3), keepdims=True)
    var = jnp.var(x, axis=(0, 2, 3), keepdims=True)
    return (x - mean) / jnp.sqrt(var + EPS) * g[None, :, None, None] \
        + be[None, :, None, None]


def resblock_ref(p, x, down=True, cast_bf16=False):
    s = 2 if down else 1
    h = jax.nn.relu(_bn_ref(_conv_ref(x, p["w1"], p["b1"], s, 0, cast_bf16),
                            p["g1"], p["be1"]))
    h = jax.nn.relu(_bn_ref(_conv_ref(h, p["w2"], p["b2"], 1, 1, cast_bf16),
                            p["g2"], p["be2"]))
    x1 = _conv_ref(h, p["w3"], p["b3"], 1, 0, cast_bf16)
    x2 = (_conv_ref(x, p["ws"], p["bs"], s, 0, cast_bf16)
          if p["ws"] is not None else x)
    return jax.nn.relu(_bn_ref(x1 + x2, p["g3"], p["be3"]))


# ---------------------------------------------------------------------------
if __name__ == "__main__":
    key = jax.random.PRNGKey(0)
    k_x, k_p = jax.random.split(key)

    # small resblock: ich=4, mch=8, och=16, down=True (stride-2 path + conv skip)
    ich, mch, och = 4, 8, 16
    x = jax.random.normal(k_x, (2, ich, 16, 16), jnp.float32)      # NCHW, like PyTorch
    params = init_resblock_params(k_p, ich, mch, och, down=True)

    fwd = jax.jit(lambda p, xx: resblock_forward(p, xx, down=True))
    out = jax.block_until_ready(fwd(params, x))

    # Validate against a precision-matched lax.conv reference (bf16 conv inputs, f32 accum/BN),
    # which preserves the PyTorch module's forward semantics.
    ref = jax.block_until_ready(resblock_ref(params, x, down=True, cast_bf16=True))

    assert out.shape == (2, och, 8, 8), out.shape
    err = float(jnp.max(jnp.abs(out - ref)))
    assert jnp.allclose(out, ref, atol=5e-3, rtol=5e-3), err
    print("KERNEL_OK")
</pallas_src>

<mosaic_0001>
module attributes {stable_mosaic.version = 11 : i64} {
  func.func @_bn_stats_kernel(%arg0: i32, %arg1: memref<128x8xf32, #tpu.memory_space<vmem>>, %arg2: memref<2x8xf32, #tpu.memory_space<vmem>>) attributes {dimension_semantics = [#tpu.dimension_semantics<arbitrary>], iteration_bounds = array<i64: 1>, scalar_prefetch = 0 : i64, scratch_operands = 0 : i64, tpu.core_type = #tpu.core_type<tc>, window_params = [{transform_indices = @transform_0, window_bounds = array<i64: 128, 8>}, {pipeline_mode = #tpu.pipeline_mode<synchronous>, transform_indices = @transform_1, window_bounds = array<i64: 2, 8>}]} {
    %c0_i32 = arith.constant 0 : i32
    %0 = arith.cmpi eq, %arg0, %c0_i32 : i32
    %1 = arith.extui %0 : i1 to i32
    %c0_i32_0 = arith.constant 0 : i32
    %2 = arith.cmpi ne, %1, %c0_i32_0 : i32
    scf.if %2 {
      %cst_7 = arith.constant 0.000000e+00 : f32
      %13 = vector.broadcast %cst_7 : f32 to vector<2x8xf32>
      %c0_8 = arith.constant 0 : index
      %c0_9 = arith.constant 0 : index
      %14 = vector.load %arg2[%c0_8, %c0_9] : memref<2x8xf32, #tpu.memory_space<vmem>>, vector<2x8xf32>
      tpu.vector_store %arg2[%c0_8, %c0_9], %13 {strides = array<i32>} : memref<2x8xf32, #tpu.memory_space<vmem>>, vector<2x8xf32>,
    } else {
    }
    %c0 = arith.constant 0 : index
    %c0_1 = arith.constant 0 : index
    %3 = vector.load %arg1[%c0, %c0_1] : memref<128x8xf32, #tpu.memory_space<vmem>>, vector<128x8xf32>
    %cst = arith.constant dense<0.000000e+00> : vector<8xf32>
    %4 = vector.multi_reduction <add>, %3, %cst [0] : vector<128x8xf32> to vector<8xf32>
    %5 = vector.shape_cast %4 : vector<8xf32> to vector<1x8xf32>
    %6 = arith.mulf %3, %3 : vector<128x8xf32>
    %cst_2 = arith.constant dense<0.000000e+00> : vector<8xf32>
    %7 = vector.multi_reduction <add>, %6, %cst_2 [0] : vector<128x8xf32> to vector<8xf32>
    %8 = vector.shape_cast %7 : vector<8xf32> to vector<1x8xf32>
    %c0_3 = arith.constant 0 : index
    %c0_4 = arith.constant 0 : index
    %9 = vector.load %arg2[%c0_3, %c0_4] : memref<2x8xf32, #tpu.memory_space<vmem>>, vector<2x8xf32>
    %10 = tpu.concatenate %5, %8 in 0 : vector<1x8xf32>, vector<1x8xf32> -> vector<2x8xf32>
    %11 = arith.addf %9, %10 : vector<2x8xf32>
    %c0_5 = arith.constant 0 : index
    %c0_6 = arith.constant 0 : index
    %12 = vector.load %arg2[%c0_5, %c0_6] : memref<2x8xf32, #tpu.memory_space<vmem>>, vector<2x8xf32>
    tpu.vector_store %arg2[%c0_5, %c0_6], %11 {strides = array<i32>} : memref<2x8xf32, #tpu.memory_space<vmem>>, vector<2x8xf32>,
    return
  }
  func.func @transform_0(%arg0: i32) -> (i32, i32) {
    %c0_i32 = arith.constant 0 : i32
    %c0_i32_0 = arith.constant 0 : i32
    return %arg0, %c0_i32 : i32, i32
  }
  func.func @transform_1(%arg0: i32) -> (i32, i32) {
    %c0_i32 = arith.constant 0 : i32
    %c0_i32_0 = arith.constant 0 : i32
    %c0_i32_1 = arith.constant 0 : i32
    return %c0_i32, %c0_i32_0 : i32, i32
  }
}

module attributes {stable_mosaic.version = 11 : i64} {
  func.func @_matmul_bias_kernel(%arg0: i32, %arg1: i32, %arg2: i32, %arg3: memref<128x4xbf16, #tpu.memory_space<vmem>>, %arg4: memref<4x8xbf16, #tpu.memory_space<vmem>>, %arg5: memref<1x8xf32, #tpu.memory_space<vmem>>, %arg6: memref<128x8xf32, #tpu.memory_space<vmem>>, %arg7: memref<128x8xf32, #tpu.memory_space<vmem>>) attributes {dimension_semantics = [#tpu.dimension_semantics<parallel>, #tpu.dimension_semantics<parallel>, #tpu.dimension_semantics<arbitrary>], iteration_bounds = array<i64: 1, 1, 1>, scalar_prefetch = 0 : i64, scratch_operands = 1 : i64, tpu.core_type = #tpu.core_type<tc>, window_params = [{transform_indices = @transform_0, window_bounds = array<i64: 128, 4>}, {transform_indices = @transform_1, window_bounds = array<i64: 4, 8>}, {transform_indices = @transform_2, window_bounds = array<i64: 1, 8>}, {transform_indices = @transform_3, window_bounds = array<i64: 128, 8>}]} {
    %c0_i32 = arith.constant 0 : i32
    %0 = arith.cmpi eq, %arg2, %c0_i32 : i32
    %1 = arith.extui %0 : i1 to i32
    %c0_i32_0 = arith.constant 0 : i32
    %2 = arith.cmpi ne, %1, %c0_i32_0 : i32
    scf.if %2 {
      %cst_10 = arith.constant 0.000000e+00 : f32
      %12 = vector.broadcast %cst_10 : f32 to vector<128x8xf32>
      %c0_11 = arith.constant 0 : index
      %c0_12 = arith.constant 0 : index
      %13 = vector.load %arg7[%c0_11, %c0_12] : memref<128x8xf32, #tpu.memory_space<vmem>>, vector<128x8xf32>
      tpu.vector_store %arg7[%c0_11, %c0_12], %12 {strides = array<i32>} : memref<128x8xf32, #tpu.memory_space<vmem>>, vector<128x8xf32>,
    } else {
    }
    %c0 = arith.constant 0 : index
    %c0_1 = arith.constant 0 : index
    %3 = vector.load %arg7[%c0, %c0_1] : memref<128x8xf32, #tpu.memory_space<vmem>>, vector<128x8xf32>
    %c0_2 = arith.constant 0 : index
    %c0_3 = arith.constant 0 : index
    %4 = vector.load %arg3[%c0_2, %c0_3] : memref<128x4xbf16, #tpu.memory_space<vmem>>, vector<128x4xbf16>
    %c0_4 = arith.constant 0 : index
    %c0_5 = arith.constant 0 : index
    %5 = vector.load %arg4[%c0_4, %c0_5] : memref<4x8xbf16, #tpu.memory_space<vmem>>, vector<4x8xbf16>
    %cst = arith.constant dense<0.000000e+00> : vector<128x8xf32>
    %6 = tpu.matmul %4, %5, %cst {dimension_numbers = #tpu.dot_dimension_numbers<[1], [0], [0], [1], [0, 0, 1, 1], [], []>} : vector<128x4xbf16>, vector<4x8xbf16>, vector<128x8xf32> -> vector<128x8xf32>
    %7 = arith.addf %3, %6 : vector<128x8xf32>
    %c0_6 = arith.constant 0 : index
    %c0_7 = arith.constant 0 : index
    %8 = vector.load %arg7[%c0_6, %c0_7] : memref<128x8xf32, #tpu.memory_space<vmem>>, vector<128x8xf32>
    tpu.vector_store %arg7[%c0_6, %c0_7], %7 {strides = array<i32>} : memref<128x8xf32, #tpu.memory_space<vmem>>, vector<128x8xf32>,
    %c0_i32_8 = arith.constant 0 : i32
    %9 = arith.cmpi eq, %arg2, %c0_i32_8 : i32
    %10 = arith.extui %9 : i1 to i32
    %c0_i32_9 = arith.constant 0 : i32
    %11 = arith.cmpi ne, %10, %c0_i32_9 : i32
    scf.if %11 {
      %c0_10 = arith.constant 0 : index
      %c0_11 = arith.constant 0 : index
      %12 = vector.load %arg7[%c0_10, %c0_11] : memref<128x8xf32, #tpu.memory_space<vmem>>, vector<128x8xf32>
      %c0_12 = arith.constant 0 : index
      %c0_13 = arith.constant 0 : index
      %13 = vector.load %arg5[%c0_12, %c0_13] : memref<1x8xf32, #tpu.memory_space<vmem>>, vector<1x8xf32>
      %14 = vector.broadcast %13 : vector<1x8xf32> to vector<128x8xf32>
      %15 = arith.addf %12, %14 : vector<128x8xf32>
      %c0_14 = arith.constant 0 : index
      %c0_15 = arith.constant 0 : index
      %16 = vector.load %arg6[%c0_14, %c0_15] : memref<128x8xf32, #tpu.memory_space<vmem>>, vector<128x8xf32>
      tpu.vector_store %arg6[%c0_14, %c0_15], %15 {strides = array<i32>} : memref<128x8xf32, #tpu.memory_space<vmem>>, vector<128x8xf32>,
    } else {
    }
    return
  }
  func.func @transform_0(%arg0: i32, %arg1: i32, %arg2: i32) -> (i32, i32) {
    %c0_i32 = arith.constant 0 : i32
    return %arg0, %arg2 : i32, i32
  }
  func.func @transform_1(%arg0: i32, %arg1: i32, %arg2: i32) -> (i32, i32) {
    %c0_i32 = arith.constant 0 : i32
    return %arg2, %arg1 : i32, i32
  }
  func.func @transform_2(%arg0: i32, %arg1: i32, %arg2: i32) -> (i32, i32) {
    %c0_i32 = arith.constant 0 : i32
    %c0_i32_0 = arith.constant 0 : i32
    return %c0_i32, %arg1 : i32, i32
  }
  func.func @transform_3(%arg0: i32, %arg1: i32, %arg2: i32) -> (i32, i32) {
    %c0_i32 = arith.constant 0 : i32
    return %arg0, %arg1 : i32, i32
  }
}

module attributes {stable_mosaic.version = 11 : i64} {
  func.func @_bn_apply_relu_kernel(%arg0: i32, %arg1: memref<128x8xf32, #tpu.memory_space<vmem>>, %arg2: memref<2x8xf32, #tpu.memory_space<vmem>>, %arg3: memref<1x8xf32, #tpu.memory_space<vmem>>, %arg4: memref<1x8xf32, #tpu.memory_space<vmem>>, %arg5: memref<128x8xbf16, #tpu.memory_space<vmem>>) attributes {dimension_semantics = [#tpu.dimension_semantics<parallel>], iteration_bounds = array<i64: 1>, scalar_prefetch = 0 : i64, scratch_operands = 0 : i64, tpu.core_type = #tpu.core_type<tc>, window_params = [{transform_indices = @transform_0, window_bounds = array<i64: 128, 8>}, {pipeline_mode = #tpu.pipeline_mode<synchronous>, transform_indices = @transform_1, window_bounds = array<i64: 2, 8>}, {pipeline_mode = #tpu.pipeline_mode<synchronous>, transform_indices = @transform_2, window_bounds = array<i64: 1, 8>}, {pipeline_mode = #tpu.pipeline_mode<synchronous>, transform_indices = @transform_3, window_bounds = array<i64: 1, 8>}, {transform_indices = @transform_4, window_bounds = array<i64: 128, 8>}]} {
    %c0 = arith.constant 0 : index
    %c0_0 = arith.constant 0 : index
    %0 = vector.load %arg1[%c0, %c0_0] : memref<128x8xf32, #tpu.memory_space<vmem>>, vector<128x8xf32>
    %c0_1 = arith.constant 0 : index
    %c0_2 = arith.constant 0 : index
    %1 = vector.load %arg2[%c0_1, %c0_2] : memref<2x8xf32, #tpu.memory_space<vmem>>, vector<1x8xf32>
    %cst = arith.constant 7.812500e-03 : f32
    %2 = vector.broadcast %cst : f32 to vector<1x8xf32>
    %3 = arith.mulf %1, %2 : vector<1x8xf32>
    %c1 = arith.constant 1 : index
    %c0_3 = arith.constant 0 : index
    %4 = vector.load %arg2[%c1, %c0_3] : memref<2x8xf32, #tpu.memory_space<vmem>>, vector<1x8xf32>
    %cst_4 = arith.constant 7.812500e-03 : f32
    %5 = vector.broadcast %cst_4 : f32 to vector<1x8xf32>
    %6 = arith.mulf %4, %5 : vector<1x8xf32>
    %7 = arith.mulf %3, %3 : vector<1x8xf32>
    %8 = arith.subf %6, %7 : vector<1x8xf32>
    %cst_5 = arith.constant 0.000000e+00 : f32
    %9 = vector.broadcast %cst_5 : f32 to vector<1x8xf32>
    %10 = arith.maximumf %8, %9 : vector<1x8xf32>
    %cst_6 = arith.constant 9.99999974E-6 : f32
    %11 = vector.broadcast %cst_6 : f32 to vector<1x8xf32>
    %12 = arith.addf %10, %11 : vector<1x8xf32>
    %13 = math.rsqrt %12 : vector<1x8xf32>
    %c0_7 = arith.constant 0 : index
    %c0_8 = arith.constant 0 : index
    %14 = vector.load %arg3[%c0_7, %c0_8] : memref<1x8xf32, #tpu.memory_space<vmem>>, vector<1x8xf32>
    %15 = arith.mulf %14, %13 : vector<1x8xf32>
    %c0_9 = arith.constant 0 : index
    %c0_10 = arith.constant 0 : index
    %16 = vector.load %arg4[%c0_9, %c0_10] : memref<1x8xf32, #tpu.memory_space<vmem>>, vector<1x8xf32>
    %17 = arith.mulf %3, %15 : vector<1x8xf32>
    %18 = arith.subf %16, %17 : vector<1x8xf32>
    %19 = vector.broadcast %15 : vector<1x8xf32> to vector<128x8xf32>
    %20 = arith.mulf %0, %19 : vector<128x8xf32>
    %21 = vector.broadcast %18 : vector<1x8xf32> to vector<128x8xf32>
    %22 = arith.addf %20, %21 : vector<128x8xf32>
    %cst_11 = arith.constant 0.000000e+00 : f32
    %23 = vector.broadcast %cst_11 : f32 to vector<128x8xf32>
    %24 = arith.maximumf %22, %23 : vector<128x8xf32>
    %25 = arith.truncf %24 : vector<128x8xf32> to vector<128x8xbf16>
    %c0_12 = arith.constant 0 : index
    %c0_13 = arith.constant 0 : index
    %26 = vector.load %arg5[%c0_12, %c0_13] : memref<128x8xbf16, #tpu.memory_space<vmem>>, vector<128x8xbf16>
    tpu.vector_store %arg5[%c0_12, %c0_13], %25 {strides = array<i32>} : memref<128x8xbf16, #tpu.memory_space<vmem>>, vector<128x8xbf16>,
    return
  }
  func.func @transform_0(%arg0: i32) -> (i32, i32) {
    %c0_i32 = arith.constant 0 : i32
    %c0_i32_0 = arith.constant 0 : i32
    return %arg0, %c0_i32 : i32, i32
  }
  func.func @transform_1(%arg0: i32) -> (i32, i32) {
    %c0_i32 = arith.constant 0 : i32
    %c0_i32_0 = arith.constant 0 : i32
    %c0_i32_1 = arith.constant 0 : i32
    return %c0_i32, %c0_i32_0 : i32, i32
  }
  func.func @transform_2(%arg0: i32) -> (i32, i32) {
    %c0_i32 = arith.constant 0 : i32
    %c0_i32_0 = arith.constant 0 : i32
    %c0_i32_1 = arith.constant 0 : i32
    return %c0_i32, %c0_i32_0 : i32, i32
  }
  func.func @transform_3(%arg0: i32) -> (i32, i32) {
    %c0_i32 = arith.constant 0 : i32
    %c0_i32_0 = arith.constant 0 : i32
    %c0_i32_1 = arith.constant 0 : i32
    return %c0_i32, %c0_i32_0 : i32, i32
  }
  func.func @transform_4(%arg0: i32) -> (i32, i32) {
    %c0_i32 = arith.constant 0 : i32
    %c0_i32_0 = arith.constant 0 : i32
    return %arg0, %c0_i32 : i32, i32
  }
}

module attributes {stable_mosaic.version = 11 : i64} {
  func.func @_conv3x3_kernel(%arg0: i32, %arg1: memref<1x10x10x8xbf16, #tpu.memory_space<vmem>>, %arg2: memref<9x8x8xbf16, #tpu.memory_space<vmem>>, %arg3: memref<1x8xf32, #tpu.memory_space<vmem>>, %arg4: memref<1x8x8x8xf32, #tpu.memory_space<vmem>>) attributes {dimension_semantics = [#tpu.dimension_semantics<parallel>], iteration_bounds = array<i64: 2>, scalar_prefetch = 0 : i64, scratch_operands = 0 : i64, tpu.core_type = #tpu.core_type<tc>, window_params = [{transform_indices = @transform_0, window_bounds = array<i64: 1, 10, 10, 8>}, {pipeline_mode = #tpu.pipeline_mode<synchronous>, transform_indices = @transform_1, window_bounds = array<i64: 9, 8, 8>}, {pipeline_mode = #tpu.pipeline_mode<synchronous>, transform_indices = @transform_2, window_bounds = array<i64: 1, 8>}, {transform_indices = @transform_3, window_bounds = array<i64: 1, 8, 8, 8>}]} {
    %cst = arith.constant 0.000000e+00 : f32
    %0 = vector.broadcast %cst : f32 to vector<64x8xf32>
    %c0 = arith.constant 0 : index
    %c0_0 = arith.constant 0 : index
    %c0_1 = arith.constant 0 : index
    %c0_2 = arith.constant 0 : index
    %1 = vector.load %arg1[%c0, %c0_0, %c0_1, %c0_2] : memref<1x10x10x8xbf16, #tpu.memory_space<vmem>>, vector<1x8x8x8xbf16>
    %2 = vector.shape_cast %1 : vector<1x8x8x8xbf16> to vector<8x8x8xbf16>
    %3 = vector.shape_cast %2 : vector<8x8x8xbf16> to vector<64x8xbf16>
    %c0_3 = arith.constant 0 : index
    %c0_4 = arith.constant 0 : index
    %c0_5 = arith.constant 0 : index
    %4 = vector.load %arg2[%c0_3, %c0_4, %c0_5] : memref<9x8x8xbf16, #tpu.memory_space<vmem>>, vector<1x8x8xbf16>
    %5 = vector.shape_cast %4 : vector<1x8x8xbf16> to vector<8x8xbf16>
    %cst_6 = arith.constant dense<0.000000e+00> : vector<64x8xf32>
    %6 = tpu.matmul %3, %5, %cst_6 {dimension_numbers = #tpu.dot_dimension_numbers<[1], [0], [0], [1], [0, 0, 1, 1], [], []>} : vector<64x8xbf16>, vector<8x8xbf16>, vector<64x8xf32> -> vector<64x8xf32>
    %7 = arith.addf %0, %6 : vector<64x8xf32>
    %c0_7 = arith.constant 0 : index
    %c0_8 = arith.constant 0 : index
    %c1 = arith.constant 1 : index
    %c0_9 = arith.constant 0 : index
    %8 = vector.load %arg1[%c0_7, %c0_8, %c1, %c0_9] : memref<1x10x10x8xbf16, #tpu.memory_space<vmem>>, vector<1x8x8x8xbf16>
    %9 = vector.shape_cast %8 : vector<1x8x8x8xbf16> to vector<8x8x8xbf16>
    %10 = vector.shape_cast %9 : vector<8x8x8xbf16> to vector<64x8xbf16>
    %c1_10 = arith.constant 1 : index
    %c0_11 = arith.constant 0 : index
    %c0_12 = arith.constant 0 : index
    %11 = vector.load %arg2[%c1_10, %c0_11, %c0_12] : memref<9x8x8xbf16, #tpu.memory_space<vmem>>, vector<1x8x8xbf16>
    %12 = vector.shape_cast %11 : vector<1x8x8xbf16> to vector<8x8xbf16>
    %cst_13 = arith.constant dense<0.000000e+00> : vector<64x8xf32>
    %13 = tpu.matmul %10, %12, %cst_13 {dimension_numbers = #tpu.dot_dimension_numbers<[1], [0], [0], [1], [0, 0, 1, 1], [], []>} : vector<64x8xbf16>, vector<8x8xbf16>, vector<64x8xf32> -> vector<64x8xf32>
    %14 = arith.addf %7, %13 : vector<64x8xf32>
    %c0_14 = arith.constant 0 : index
    %c0_15 = arith.constant 0 : index
    %c2 = arith.constant 2 : index
    %c0_16 = arith.constant 0 : index
    %15 = vector.load %arg1[%c0_14, %c0_15, %c2, %c0_16] : memref<1x10x10x8xbf16, #tpu.memory_space<vmem>>, vector<1x8x8x8xbf16>
    %16 = vector.shape_cast %15 : vector<1x8x8x8xbf16> to vector<8x8x8xbf16>
    %17 = vector.shape_cast %16 : vector<8x8x8xbf16> to vector<64x8xbf16>
    %c2_17 = arith.constant 2 : index
    %c0_18 = arith.constant 0 : index
    %c0_19 = arith.constant 0 : index
    %18 = vector.load %arg2[%c2_17, %c0_18, %c0_19] : memref<9x8x8xbf16, #tpu.memory_space<vmem>>, vector<1x8x8xbf16>
    %19 = vector.shape_cast %18 : vector<1x8x8xbf16> to vector<8x8xbf16>
    %cst_20 = arith.constant dense<0.000000e+00> : vector<64x8xf32>
    %20 = tpu.matmul %17, %19, %cst_20 {dimension_numbers = #tpu.dot_dimension_numbers<[1], [0], [0], [1], [0, 0, 1, 1], [], []>} : vector<64x8xbf16>, vector<8x8xbf16>, vector<64x8xf32> -> vector<64x8xf32>
    %21 = arith.addf %14, %20 : vector<64x8xf32>
    %c0_21 = arith.constant 0 : index
    %c1_22 = arith.constant 1 : index
    %c0_23 = arith.constant 0 : index
    %c0_24 = arith.constant 0 : index
    %22 = vector.load %arg1[%c0_21, %c1_22, %c0_23, %c0_24] : memref<1x10x10x8xbf16, #tpu.memory_space<vmem>>, vector<1x8x8x8xbf16>
    %23 = vector.shape_cast %22 : vector<1x8x8x8xbf16> to vector<8x8x8xbf16>
    %24 = vector.shape_cast %23 : vector<8x8x8xbf16> to vector<64x8xbf16>
    %c3 = arith.constant 3 : index
    %c0_25 = arith.constant 0 : index
    %c0_26 = arith.constant 0 : index
    %25 = vector.load %arg2[%c3, %c0_25, %c0_26] : memref<9x8x8xbf16, #tpu.memory_space<vmem>>, vector<1x8x8xbf16>
    %26 = vector.shape_cast %25 : vector<1x8x8xbf16> to vector<8x8xbf16>
    %cst_27 = arith.constant dense<0.000000e+00> : vector<64x8xf32>
    %27 = tpu.matmul %24, %26, %cst_27 {dimension_numbers = #tpu.dot_dimension_numbers<[1], [0], [0], [1], [0, 0, 1, 1], [], []>} : vector<64x8xbf16>, vector<8x8xbf16>, vector<64x8xf32> -> vector<64x8xf32>
    %28 = arith.addf %21, %27 : vector<64x8xf32>
    %c0_28 = arith.constant 0 : index
    %c1_29 = arith.constant 1 : index
    %c1_30 = arith.constant 1 : index
    %c0_31 = arith.constant 0 : index
    %29 = vector.load %arg1[%c0_28, %c1_29, %c1_30, %c0_31] : memref<1x10x10x8xbf16, #tpu.memory_space<vmem>>, vector<1x8x8x8xbf16>
    %30 = vector.shape_cast %29 : vector<1x8x8x8xbf16> to vector<8x8x8xbf16>
    %31 = vector.shape_cast %30 : vector<8x8x8xbf16> to vector<64x8xbf16>
    %c4 = arith.constant 4 : index
    %c0_32 = arith.constant 0 : index
    %c0_33 = arith.constant 0 : index
    %32 = vector.load %arg2[%c4, %c0_32, %c0_33] : memref<9x8x8xbf16, #tpu.memory_space<vmem>>, vector<1x8x8xbf16>
    %33 = vector.shape_cast %32 : vector<1x8x8xbf16> to vector<8x8xbf16>
    %cst_34 = arith.constant dense<0.000000e+00> : vector<64x8xf32>
    %34 = tpu.matmul %31, %33, %cst_34 {dimension_numbers = #tpu.dot_dimension_numbers<[1], [0], [0], [1], [0, 0, 1, 1], [], []>} : vector<64x8xbf16>, vector<8x8xbf16>, vector<64x8xf32> -> vector<64x8xf32>
    %35 = arith.addf %28, %34 : vector<64x8xf32>
    %c0_35 = arith.constant 0 : index
    %c1_36 = arith.constant 1 : index
    %c2_37 = arith.constant 2 : index
    %c0_38 = arith.constant 0 : index
    %36 = vector.load %arg1[%c0_35, %c1_36, %c2_37, %c0_38] : memref<1x10x10x8xbf16, #tpu.memory_space<vmem>>, vector<1x8x8x8xbf16>
    %37 = vector.shape_cast %36 : vector<1x8x8x8xbf16> to vector<8x8x8xbf16>
    %38 = vector.shape_cast %37 : vector<8x8x8xbf16> to vector<64x8xbf16>
    %c5 = arith.constant 5 : index
    %c0_39 = arith.constant 0 : index
    %c0_40 = arith.constant 0 : index
    %39 = vector.load %arg2[%c5, %c0_39, %c0_40] : memref<9x8x8xbf16, #tpu.memory_space<vmem>>, vector<1x8x8xbf16>
    %40 = vector.shape_cast %39 : vector<1x8x8xbf16> to vector<8x8xbf16>
    %cst_41 = arith.constant dense<0.000000e+00> : vector<64x8xf32>
    %41 = tpu.matmul %38, %40, %cst_41 {dimension_numbers = #tpu.dot_dimension_numbers<[1], [0], [0], [1], [0, 0, 1, 1], [], []>} : vector<64x8xbf16>, vector<8x8xbf16>, vector<64x8xf32> -> vector<64x8xf32>
    %42 = arith.addf %35, %41 : vector<64x8xf32>
    %c0_42 = arith.constant 0 : index
    %c2_43 = arith.constant 2 : index
    %c0_44 = arith.constant 0 : index
    %c0_45 = arith.constant 0 : index
    %43 = vector.load %arg1[%c0_42, %c2_43, %c0_44, %c0_45] : memref<1x10x10x8xbf16, #tpu.memory_space<vmem>>, vector<1x8x8x8xbf16>
    %44 = vector.shape_cast %43 : vector<1x8x8x8xbf16> to vector<8x8x8xbf16>
    %45 = vector.shape_cast %44 : vector<8x8x8xbf16> to vector<64x8xbf16>
    %c6 = arith.constant 6 : index
    %c0_46 = arith.constant 0 : index
    %c0_47 = arith.constant 0 : index
    %46 = vector.load %arg2[%c6, %c0_46, %c0_47] : memref<9x8x8xbf16, #tpu.memory_space<vmem>>, vector<1x8x8xbf16>
    %47 = vector.shape_cast %46 : vector<1x8x8xbf16> to vector<8x8xbf16>
    %cst_48 = arith.constant dense<0.000000e+00> : vector<64x8xf32>
    %48 = tpu.matmul %45, %47, %cst_48 {dimension_numbers = #tpu.dot_dimension_numbers<[1], [0], [0], [1], [0, 0, 1, 1], [], []>} : vector<64x8xbf16>, vector<8x8xbf16>, vector<64x8xf32> -> vector<64x8xf32>
    %49 = arith.addf %42, %48 : vector<64x8xf32>
    %c0_49 = arith.constant 0 : index
    %c2_50 = arith.constant 2 : index
    %c1_51 = arith.constant 1 : index
    %c0_52 = arith.constant 0 : index
    %50 = vector.load %arg1[%c0_49, %c2_50, %c1_51, %c0_52] : memref<1x10x10x8xbf16, #tpu.memory_space<vmem>>, vector<1x8x8x8xbf16>
    %51 = vector.shape_cast %50 : vector<1x8x8x8xbf16> to vector<8x8x8xbf16>
    %52 = vector.shape_cast %51 : vector<8x8x8xbf16> to vector<64x8xbf16>
    %c7 = arith.constant 7 : index
    %c0_53 = arith.constant 0 : index
    %c0_54 = arith.constant 0 : index
    %53 = vector.load %arg2[%c7, %c0_53, %c0_54] : memref<9x8x8xbf16, #tpu.memory_space<vmem>>, vector<1x8x8xbf16>
    %54 = vector.shape_cast %53 : vector<1x8x8xbf16> to vector<8x8xbf16>
    %cst_55 = arith.constant dense<0.000000e+00> : vector<64x8xf32>
    %55 = tpu.matmul %52, %54, %cst_55 {dimension_numbers = #tpu.dot_dimension_numbers<[1], [0], [0], [1], [0, 0, 1, 1], [], []>} : vector<64x8xbf16>, vector<8x8xbf16>, vector<64x8xf32> -> vector<64x8xf32>
    %56 = arith.addf %49, %55 : vector<64x8xf32>
    %c0_56 = arith.constant 0 : index
    %c2_57 = arith.constant 2 : index
    %c2_58 = arith.constant 2 : index
    %c0_59 = arith.constant 0 : index
    %57 = vector.load %arg1[%c0_56, %c2_57, %c2_58, %c0_59] : memref<1x10x10x8xbf16, #tpu.memory_space<vmem>>, vector<1x8x8x8xbf16>
    %58 = vector.shape_cast %57 : vector<1x8x8x8xbf16> to vector<8x8x8xbf16>
    %59 = vector.shape_cast %58 : vector<8x8x8xbf16> to vector<64x8xbf16>
    %c8 = arith.constant 8 : index
    %c0_60 = arith.constant 0 : index
    %c0_61 = arith.constant 0 : index
    %60 = vector.load %arg2[%c8, %c0_60, %c0_61] : memref<9x8x8xbf16, #tpu.memory_space<vmem>>, vector<1x8x8xbf16>
    %61 = vector.shape_cast %60 : vector<1x8x8xbf16> to vector<8x8xbf16>
    %cst_62 = arith.constant dense<0.000000e+00> : vector<64x8xf32>
    %62 = tpu.matmul %59, %61, %cst_62 {dimension_numbers = #tpu.dot_dimension_numbers<[1], [0], [0], [1], [0, 0, 1, 1], [], []>} : vector<64x8xbf16>, vector<8x8xbf16>, vector<64x8xf32> -> vector<64x8xf32>
    %63 = arith.addf %56, %62 : vector<64x8xf32>
    %c0_63 = arith.constant 0 : index
    %c0_64 = arith.constant 0 : index
    %64 = vector.load %arg3[%c0_63, %c0_64] : memref<1x8xf32, #tpu.memory_space<vmem>>, vector<1x8xf32>
    %65 = vector.broadcast %64 : vector<1x8xf32> to vector<64x8xf32>
    %66 = arith.addf %63, %65 : vector<64x8xf32>
    %67 = vector.shape_cast %66 : vector<64x8xf32> to vector<1x8x8x8xf32>
    %c0_65 = arith.constant 0 : index
    %c0_66 = arith.constant 0 : index
    %c0_67 = arith.constant 0 : index
    %c0_68 = arith.constant 0 : index
    %68 = vector.load %arg4[%c0_65, %c0_66, %c0_67, %c0_68] : memref<1x8x8x8xf32, #tpu.memory_space<vmem>>, vector<1x8x8x8xf32>
    tpu.vector_store %arg4[%c0_65, %c0_66, %c0_67, %c0_68], %67 {strides = array<i32>} : memref<1x8x8x8xf32, #tpu.memory_space<vmem>>, vector<1x8x8x8xf32>,
    return
  }
  func.func @transform_0(%arg0: i32) -> (i32, i32, i32, i32) {
    %c0_i32 = arith.constant 0 : i32
    %c0_i32_0 = arith.constant 0 : i32
    %c0_i32_1 = arith.constant 0 : i32
    %c0_i32_2 = arith.constant 0 : i32
    return %arg0, %c0_i32, %c0_i32_0, %c0_i32_1 : i32, i32, i32, i32
  }
  func.func @transform_1(%arg0: i32) -> (i32, i32, i32) {
    %c0_i32 = arith.constant 0 : i32
    %c0_i32_0 = arith.constant 0 : i32
    %c0_i32_1 = arith.constant 0 : i32
    %c0_i32_2 = arith.constant 0 : i32
    return %c0_i32, %c0_i32_0, %c0_i32_1 : i32, i32, i32
  }
  func.func @transform_2(%arg0: i32) -> (i32, i32) {
    %c0_i32 = arith.constant 0 : i32
    %c0_i32_0 = arith.constant 0 : i32
    %c0_i32_1 = arith.constant 0 : i32
    return %c0_i32, %c0_i32_0 : i32, i32
  }
  func.func @transform_3(%arg0: i32) -> (i32, i32, i32, i32) {
    %c0_i32 = arith.constant 0 : i32
    %c0_i32_0 = arith.constant 0 : i32
    %c0_i32_1 = arith.constant 0 : i32
    %c0_i32_2 = arith.constant 0 : i32
    return %arg0, %c0_i32, %c0_i32_0, %c0_i32_1 : i32, i32, i32, i32
  }
}

module attributes {stable_mosaic.version = 11 : i64} {
  func.func @_matmul_bias_kernel(%arg0: i32, %arg1: i32, %arg2: i32, %arg3: memref<128x8xbf16, #tpu.memory_space<vmem>>, %arg4: memref<8x16xbf16, #tpu.memory_space<vmem>>, %arg5: memref<1x16xf32, #tpu.memory_space<vmem>>, %arg6: memref<128x16xf32, #tpu.memory_space<vmem>>, %arg7: memref<128x16xf32, #tpu.memory_space<vmem>>) attributes {dimension_semantics = [#tpu.dimension_semantics<parallel>, #tpu.dimension_semantics<parallel>, #tpu.dimension_semantics<arbitrary>], iteration_bounds = array<i64: 1, 1, 1>, scalar_prefetch = 0 : i64, scratch_operands = 1 : i64, tpu.core_type = #tpu.core_type<tc>, window_params = [{transform_indices = @transform_0, window_bounds = array<i64: 128, 8>}, {transform_indices = @transform_1, window_bounds = array<i64: 8, 16>}, {transform_indices = @transform_2, window_bounds = array<i64: 1, 16>}, {transform_indices = @transform_3, window_bounds = array<i64: 128, 16>}]} {
    %c0_i32 = arith.constant 0 : i32
    %0 = arith.cmpi eq, %arg2, %c0_i32 : i32
    %1 = arith.extui %0 : i1 to i32
    %c0_i32_0 = arith.constant 0 : i32
    %2 = arith.cmpi ne, %1, %c0_i32_0 : i32
    scf.if %2 {
      %cst_10 = arith.constant 0.000000e+00 : f32
      %12 = vector.broadcast %cst_10 : f32 to vector<128x16xf32>
      %c0_11 = arith.constant 0 : index
      %c0_12 = arith.constant 0 : index
      %13 = vector.load %arg7[%c0_11, %c0_12] : memref<128x16xf32, #tpu.memory_space<vmem>>, vector<128x16xf32>
      tpu.vector_store %arg7[%c0_11, %c0_12], %12 {strides = array<i32>} : memref<128x16xf32, #tpu.memory_space<vmem>>, vector<128x16xf32>,
    } else {
    }
    %c0 = arith.constant 0 : index
    %c0_1 = arith.constant 0 : index
    %3 = vector.load %arg7[%c0, %c0_1] : memref<128x16xf32, #tpu.memory_space<vmem>>, vector<128x16xf32>
    %c0_2 = arith.constant 0 : index
    %c0_3 = arith.constant 0 : index
    %4 = vector.load %arg3[%c0_2, %c0_3] : memref<128x8xbf16, #tpu.memory_space<vmem>>, vector<128x8xbf16>
    %c0_4 = arith.constant 0 : index
    %c0_5 = arith.constant 0 : index
    %5 = vector.load %arg4[%c0_4, %c0_5] : memref<8x16xbf16, #tpu.memory_space<vmem>>, vector<8x16xbf16>
    %cst = arith.constant dense<0.000000e+00> : vector<128x16xf32>
    %6 = tpu.matmul %4, %5, %cst {dimension_numbers = #tpu.dot_dimension_numbers<[1], [0], [0], [1], [0, 0, 1, 1], [], []>} : vector<128x8xbf16>, vector<8x16xbf16>, vector<128x16xf32> -> vector<128x16xf32>
    %7 = arith.addf %3, %6 : vector<128x16xf32>
    %c0_6 = arith.constant 0 : index
    %c0_7 = arith.constant 0 : index
    %8 = vector.load %arg7[%c0_6, %c0_7] : memref<128x16xf32, #tpu.memory_space<vmem>>, vector<128x16xf32>
    tpu.vector_store %arg7[%c0_6, %c0_7], %7 {strides = array<i32>} : memref<128x16xf32, #tpu.memory_space<vmem>>, vector<128x16xf32>,
    %c0_i32_8 = arith.constant 0 : i32
    %9 = arith.cmpi eq, %arg2, %c0_i32_8 : i32
    %10 = arith.extui %9 : i1 to i32
    %c0_i32_9 = arith.constant 0 : i32
    %11 = arith.cmpi ne, %10, %c0_i32_9 : i32
    scf.if %11 {
      %c0_10 = arith.constant 0 : index
      %c0_11 = arith.constant 0 : index
      %12 = vector.load %arg7[%c0_10, %c0_11] : memref<128x16xf32, #tpu.memory_space<vmem>>, vector<128x16xf32>
      %c0_12 = arith.constant 0 : index
      %c0_13 = arith.constant 0 : index
      %13 = vector.load %arg5[%c0_12, %c0_13] : memref<1x16xf32, #tpu.memory_space<vmem>>, vector<1x16xf32>
      %14 = vector.broadcast %13 : vector<1x16xf32> to vector<128x16xf32>
      %15 = arith.addf %12, %14 : vector<128x16xf32>
      %c0_14 = arith.constant 0 : index
      %c0_15 = arith.constant 0 : index
      %16 = vector.load %arg6[%c0_14, %c0_15] : memref<128x16xf32, #tpu.memory_space<vmem>>, vector<128x16xf32>
      tpu.vector_store %arg6[%c0_14, %c0_15], %15 {strides = array<i32>} : memref<128x16xf32, #tpu.memory_space<vmem>>, vector<128x16xf32>,
    } else {
    }
    return
  }
  func.func @transform_0(%arg0: i32, %arg1: i32, %arg2: i32) -> (i32, i32) {
    %c0_i32 = arith.constant 0 : i32
    return %arg0, %arg2 : i32, i32
  }
  func.func @transform_1(%arg0: i32, %arg1: i32, %arg2: i32) -> (i32, i32) {
    %c0_i32 = arith.constant 0 : i32
    return %arg2, %arg1 : i32, i32
  }
  func.func @transform_2(%arg0: i32, %arg1: i32, %arg2: i32) -> (i32, i32) {
    %c0_i32 = arith.constant 0 : i32
    %c0_i32_0 = arith.constant 0 : i32
    return %c0_i32, %arg1 : i32, i32
  }
  func.func @transform_3(%arg0: i32, %arg1: i32, %arg2: i32) -> (i32, i32) {
    %c0_i32 = arith.constant 0 : i32
    return %arg0, %arg1 : i32, i32
  }
}

module attributes {stable_mosaic.version = 11 : i64} {
  func.func @_matmul_bias_kernel(%arg0: i32, %arg1: i32, %arg2: i32, %arg3: memref<128x4xbf16, #tpu.memory_space<vmem>>, %arg4: memref<4x16xbf16, #tpu.memory_space<vmem>>, %arg5: memref<1x16xf32, #tpu.memory_space<vmem>>, %arg6: memref<128x16xf32, #tpu.memory_space<vmem>>, %arg7: memref<128x16xf32, #tpu.memory_space<vmem>>) attributes {dimension_semantics = [#tpu.dimension_semantics<parallel>, #tpu.dimension_semantics<parallel>, #tpu.dimension_semantics<arbitrary>], iteration_bounds = array<i64: 1, 1, 1>, scalar_prefetch = 0 : i64, scratch_operands = 1 : i64, tpu.core_type = #tpu.core_type<tc>, window_params = [{transform_indices = @transform_0, window_bounds = array<i64: 128, 4>}, {transform_indices = @transform_1, window_bounds = array<i64: 4, 16>}, {transform_indices = @transform_2, window_bounds = array<i64: 1, 16>}, {transform_indices = @transform_3, window_bounds = array<i64: 128, 16>}]} {
    %c0_i32 = arith.constant 0 : i32
    %0 = arith.cmpi eq, %arg2, %c0_i32 : i32
    %1 = arith.extui %0 : i1 to i32
    %c0_i32_0 = arith.constant 0 : i32
    %2 = arith.cmpi ne, %1, %c0_i32_0 : i32
    scf.if %2 {
      %cst_10 = arith.constant 0.000000e+00 : f32
      %12 = vector.broadcast %cst_10 : f32 to vector<128x16xf32>
      %c0_11 = arith.constant 0 : index
      %c0_12 = arith.constant 0 : index
      %13 = vector.load %arg7[%c0_11, %c0_12] : memref<128x16xf32, #tpu.memory_space<vmem>>, vector<128x16xf32>
      tpu.vector_store %arg7[%c0_11, %c0_12], %12 {strides = array<i32>} : memref<128x16xf32, #tpu.memory_space<vmem>>, vector<128x16xf32>,
    } else {
    }
    %c0 = arith.constant 0 : index
    %c0_1 = arith.constant 0 : index
    %3 = vector.load %arg7[%c0, %c0_1] : memref<128x16xf32, #tpu.memory_space<vmem>>, vector<128x16xf32>
    %c0_2 = arith.constant 0 : index
    %c0_3 = arith.constant 0 : index
    %4 = vector.load %arg3[%c0_2, %c0_3] : memref<128x4xbf16, #tpu.memory_space<vmem>>, vector<128x4xbf16>
    %c0_4 = arith.constant 0 : index
    %c0_5 = arith.constant 0 : index
    %5 = vector.load %arg4[%c0_4, %c0_5] : memref<4x16xbf16, #tpu.memory_space<vmem>>, vector<4x16xbf16>
    %cst = arith.constant dense<0.000000e+00> : vector<128x16xf32>
    %6 = tpu.matmul %4, %5, %cst {dimension_numbers = #tpu.dot_dimension_numbers<[1], [0], [0], [1], [0, 0, 1, 1], [], []>} : vector<128x4xbf16>, vector<4x16xbf16>, vector<128x16xf32> -> vector<128x16xf32>
    %7 = arith.addf %3, %6 : vector<128x16xf32>
    %c0_6 = arith.constant 0 : index
    %c0_7 = arith.constant 0 : index
    %8 = vector.load %arg7[%c0_6, %c0_7] : memref<128x16xf32, #tpu.memory_space<vmem>>, vector<128x16xf32>
    tpu.vector_store %arg7[%c0_6, %c0_7], %7 {strides = array<i32>} : memref<128x16xf32, #tpu.memory_space<vmem>>, vector<128x16xf32>,
    %c0_i32_8 = arith.constant 0 : i32
    %9 = arith.cmpi eq, %arg2, %c0_i32_8 : i32
    %10 = arith.extui %9 : i1 to i32
    %c0_i32_9 = arith.constant 0 : i32
    %11 = arith.cmpi ne, %10, %c0_i32_9 : i32
    scf.if %11 {
      %c0_10 = arith.constant 0 : index
      %c0_11 = arith.constant 0 : index
      %12 = vector.load %arg7[%c0_10, %c0_11] : memref<128x16xf32, #tpu.memory_space<vmem>>, vector<128x16xf32>
      %c0_12 = arith.constant 0 : index
      %c0_13 = arith.constant 0 : index
      %13 = vector.load %arg5[%c0_12, %c0_13] : memref<1x16xf32, #tpu.memory_space<vmem>>, vector<1x16xf32>
      %14 = vector.broadcast %13 : vector<1x16xf32> to vector<128x16xf32>
      %15 = arith.addf %12, %14 : vector<128x16xf32>
      %c0_14 = arith.constant 0 : index
      %c0_15 = arith.constant 0 : index
      %16 = vector.load %arg6[%c0_14, %c0_15] : memref<128x16xf32, #tpu.memory_space<vmem>>, vector<128x16xf32>
      tpu.vector_store %arg6[%c0_14, %c0_15], %15 {strides = array<i32>} : memref<128x16xf32, #tpu.memory_space<vmem>>, vector<128x16xf32>,
    } else {
    }
    return
  }
  func.func @transform_0(%arg0: i32, %arg1: i32, %arg2: i32) -> (i32, i32) {
    %c0_i32 = arith.constant 0 : i32
    return %arg0, %arg2 : i32, i32
  }
  func.func @transform_1(%arg0: i32, %arg1: i32, %arg2: i32) -> (i32, i32) {
    %c0_i32 = arith.constant 0 : i32
    return %arg2, %arg1 : i32, i32
  }
  func.func @transform_2(%arg0: i32, %arg1: i32, %arg2: i32) -> (i32, i32) {
    %c0_i32 = arith.constant 0 : i32
    %c0_i32_0 = arith.constant 0 : i32
    return %c0_i32, %arg1 : i32, i32
  }
  func.func @transform_3(%arg0: i32, %arg1: i32, %arg2: i32) -> (i32, i32) {
    %c0_i32 = arith.constant 0 : i32
    return %arg0, %arg1 : i32, i32
  }
}

module attributes {stable_mosaic.version = 11 : i64} {
  func.func @_add_bn_stats_kernel(%arg0: i32, %arg1: memref<128x16xf32, #tpu.memory_space<vmem>>, %arg2: memref<128x16xf32, #tpu.memory_space<vmem>>, %arg3: memref<2x16xf32, #tpu.memory_space<vmem>>) attributes {dimension_semantics = [#tpu.dimension_semantics<arbitrary>], iteration_bounds = array<i64: 1>, scalar_prefetch = 0 : i64, scratch_operands = 0 : i64, tpu.core_type = #tpu.core_type<tc>, window_params = [{transform_indices = @transform_0, window_bounds = array<i64: 128, 16>}, {transform_indices = @transform_1, window_bounds = array<i64: 128, 16>}, {pipeline_mode = #tpu.pipeline_mode<synchronous>, transform_indices = @transform_2, window_bounds = array<i64: 2, 16>}]} {
    %c0_i32 = arith.constant 0 : i32
    %0 = arith.cmpi eq, %arg0, %c0_i32 : i32
    %1 = arith.extui %0 : i1 to i32
    %c0_i32_0 = arith.constant 0 : i32
    %2 = arith.cmpi ne, %1, %c0_i32_0 : i32
    scf.if %2 {
      %cst_9 = arith.constant 0.000000e+00 : f32
      %15 = vector.broadcast %cst_9 : f32 to vector<2x16xf32>
      %c0_10 = arith.constant 0 : index
      %c0_11 = arith.constant 0 : index
      %16 = vector.load %arg3[%c0_10, %c0_11] : memref<2x16xf32, #tpu.memory_space<vmem>>, vector<2x16xf32>
      tpu.vector_store %arg3[%c0_10, %c0_11], %15 {strides = array<i32>} : memref<2x16xf32, #tpu.memory_space<vmem>>, vector<2x16xf32>,
    } else {
    }
    %c0 = arith.constant 0 : index
    %c0_1 = arith.constant 0 : index
    %3 = vector.load %arg1[%c0, %c0_1] : memref<128x16xf32, #tpu.memory_space<vmem>>, vector<128x16xf32>
    %c0_2 = arith.constant 0 : index
    %c0_3 = arith.constant 0 : index
    %4 = vector.load %arg2[%c0_2, %c0_3] : memref<128x16xf32, #tpu.memory_space<vmem>>, vector<128x16xf32>
    %5 = arith.addf %3, %4 : vector<128x16xf32>
    %cst = arith.constant dense<0.000000e+00> : vector<16xf32>
    %6 = vector.multi_reduction <add>, %5, %cst [0] : vector<128x16xf32> to vector<16xf32>
    %7 = vector.shape_cast %6 : vector<16xf32> to vector<1x16xf32>
    %8 = arith.mulf %5, %5 : vector<128x16xf32>
    %cst_4 = arith.constant dense<0.000000e+00> : vector<16xf32>
    %9 = vector.multi_reduction <add>, %8, %cst_4 [0] : vector<128x16xf32> to vector<16xf32>
    %10 = vector.shape_cast %9 : vector<16xf32> to vector<1x16xf32>
    %c0_5 = arith.constant 0 : index
    %c0_6 = arith.constant 0 : index
    %11 = vector.load %arg3[%c0_5, %c0_6] : memref<2x16xf32, #tpu.memory_space<vmem>>, vector<2x16xf32>
    %12 = tpu.concatenate %7, %10 in 0 : vector<1x16xf32>, vector<1x16xf32> -> vector<2x16xf32>
    %13 = arith.addf %11, %12 : vector<2x16xf32>
    %c0_7 = arith.constant 0 : index
    %c0_8 = arith.constant 0 : index
    %14 = vector.load %arg3[%c0_7, %c0_8] : memref<2x16xf32, #tpu.memory_space<vmem>>, vector<2x16xf32>
    tpu.vector_store %arg3[%c0_7, %c0_8], %13 {strides = array<i32>} : memref<2x16xf32, #tpu.memory_space<vmem>>, vector<2x16xf32>,
    return
  }
  func.func @transform_0(%arg0: i32) -> (i32, i32) {
    %c0_i32 = arith.constant 0 : i32
    %c0_i32_0 = arith.constant 0 : i32
    return %arg0, %c0_i32 : i32, i32
  }
  func.func @transform_1(%arg0: i32) -> (i32, i32) {
    %c0_i32 = arith.constant 0 : i32
    %c0_i32_0 = arith.constant 0 : i32
    return %arg0, %c0_i32 : i32, i32
  }
  func.func @transform_2(%arg0: i32) -> (i32, i32) {
    %c0_i32 = arith.constant 0 : i32
    %c0_i32_0 = arith.constant 0 : i32
    %c0_i32_1 = arith.constant 0 : i32
    return %c0_i32, %c0_i32_0 : i32, i32
  }
}

module attributes {stable_mosaic.version = 11 : i64} {
  func.func @_add_bn_apply_relu_kernel(%arg0: i32, %arg1: memref<128x16xf32, #tpu.memory_space<vmem>>, %arg2: memref<128x16xf32, #tpu.memory_space<vmem>>, %arg3: memref<2x16xf32, #tpu.memory_space<vmem>>, %arg4: memref<1x16xf32, #tpu.memory_space<vmem>>, %arg5: memref<1x16xf32, #tpu.memory_space<vmem>>, %arg6: memref<128x16xf32, #tpu.memory_space<vmem>>) attributes {dimension_semantics = [#tpu.dimension_semantics<parallel>], iteration_bounds = array<i64: 1>, scalar_prefetch = 0 : i64, scratch_operands = 0 : i64, tpu.core_type = #tpu.core_type<tc>, window_params = [{transform_indices = @transform_0, window_bounds = array<i64: 128, 16>}, {transform_indices = @transform_1, window_bounds = array<i64: 128, 16>}, {pipeline_mode = #tpu.pipeline_mode<synchronous>, transform_indices = @transform_2, window_bounds = array<i64: 2, 16>}, {pipeline_mode = #tpu.pipeline_mode<synchronous>, transform_indices = @transform_3, window_bounds = array<i64: 1, 16>}, {pipeline_mode = #tpu.pipeline_mode<synchronous>, transform_indices = @transform_4, window_bounds = array<i64: 1, 16>}, {transform_indices = @transform_5, window_bounds = array<i64: 128, 16>}]} {
    %c0 = arith.constant 0 : index
    %c0_0 = arith.constant 0 : index
    %0 = vector.load %arg1[%c0, %c0_0] : memref<128x16xf32, #tpu.memory_space<vmem>>, vector<128x16xf32>
    %c0_1 = arith.constant 0 : index
    %c0_2 = arith.constant 0 : index
    %1 = vector.load %arg2[%c0_1, %c0_2] : memref<128x16xf32, #tpu.memory_space<vmem>>, vector<128x16xf32>
    %2 = arith.addf %0, %1 : vector<128x16xf32>
    %c0_3 = arith.constant 0 : index
    %c0_4 = arith.constant 0 : index
    %3 = vector.load %arg3[%c0_3, %c0_4] : memref<2x16xf32, #tpu.memory_space<vmem>>, vector<1x16xf32>
    %cst = arith.constant 7.812500e-03 : f32
    %4 = vector.broadcast %cst : f32 to vector<1x16xf32>
    %5 = arith.mulf %3, %4 : vector<1x16xf32>
    %c1 = arith.constant 1 : index
    %c0_5 = arith.constant 0 : index
    %6 = vector.load %arg3[%c1, %c0_5] : memref<2x16xf32, #tpu.memory_space<vmem>>, vector<1x16xf32>
    %cst_6 = arith.constant 7.812500e-03 : f32
    %7 = vector.broadcast %cst_6 : f32 to vector<1x16xf32>
    %8 = arith.mulf %6, %7 : vector<1x16xf32>
    %9 = arith.mulf %5, %5 : vector<1x16xf32>
    %10 = arith.subf %8, %9 : vector<1x16xf32>
    %cst_7 = arith.constant 0.000000e+00 : f32
    %11 = vector.broadcast %cst_7 : f32 to vector<1x16xf32>
    %12 = arith.maximumf %10, %11 : vector<1x16xf32>
    %cst_8 = arith.constant 9.99999974E-6 : f32
    %13 = vector.broadcast %cst_8 : f32 to vector<1x16xf32>
    %14 = arith.addf %12, %13 : vector<1x16xf32>
    %15 = math.rsqrt %14 : vector<1x16xf32>
    %c0_9 = arith.constant 0 : index
    %c0_10 = arith.constant 0 : index
    %16 = vector.load %arg4[%c0_9, %c0_10] : memref<1x16xf32, #tpu.memory_space<vmem>>, vector<1x16xf32>
    %17 = arith.mulf %16, %15 : vector<1x16xf32>
    %c0_11 = arith.constant 0 : index
    %c0_12 = arith.constant 0 : index
    %18 = vector.load %arg5[%c0_11, %c0_12] : memref<1x16xf32, #tpu.memory_space<vmem>>, vector<1x16xf32>
    %19 = arith.mulf %5, %17 : vector<1x16xf32>
    %20 = arith.subf %18, %19 : vector<1x16xf32>
    %21 = vector.broadcast %17 : vector<1x16xf32> to vector<128x16xf32>
    %22 = arith.mulf %2, %21 : vector<128x16xf32>
    %23 = vector.broadcast %20 : vector<1x16xf32> to vector<128x16xf32>
    %24 = arith.addf %22, %23 : vector<128x16xf32>
    %cst_13 = arith.constant 0.000000e+00 : f32
    %25 = vector.broadcast %cst_13 : f32 to vector<128x16xf32>
    %26 = arith.maximumf %24, %25 : vector<128x16xf32>
    %c0_14 = arith.constant 0 : index
    %c0_15 = arith.constant 0 : index
    %27 = vector.load %arg6[%c0_14, %c0_15] : memref<128x16xf32, #tpu.memory_space<vmem>>, vector<128x16xf32>
    tpu.vector_store %arg6[%c0_14, %c0_15], %26 {strides = array<i32>} : memref<128x16xf32, #tpu.memory_space<vmem>>, vector<128x16xf32>,
    return
  }
  func.func @transform_0(%arg0: i32) -> (i32, i32) {
    %c0_i32 = arith.constant 0 : i32
    %c0_i32_0 = arith.constant 0 : i32
    return %arg0, %c0_i32 : i32, i32
  }
  func.func @transform_1(%arg0: i32) -> (i32, i32) {
    %c0_i32 = arith.constant 0 : i32
    %c0_i32_0 = arith.constant 0 : i32
    return %arg0, %c0_i32 : i32, i32
  }
  func.func @transform_2(%arg0: i32) -> (i32, i32) {
    %c0_i32 = arith.constant 0 : i32
    %c0_i32_0 = arith.constant 0 : i32
    %c0_i32_1 = arith.constant 0 : i32
    return %c0_i32, %c0_i32_0 : i32, i32
  }
  func.func @transform_3(%arg0: i32) -> (i32, i32) {
    %c0_i32 = arith.constant 0 : i32
    %c0_i32_0 = arith.constant 0 : i32
    %c0_i32_1 = arith.constant 0 : i32
    return %c0_i32, %c0_i32_0 : i32, i32
  }
  func.func @transform_4(%arg0: i32) -> (i32, i32) {
    %c0_i32 = arith.constant 0 : i32
    %c0_i32_0 = arith.constant 0 : i32
    %c0_i32_1 = arith.constant 0 : i32
    return %c0_i32, %c0_i32_0 : i32, i32
  }
  func.func @transform_5(%arg0: i32) -> (i32, i32) {
    %c0_i32 = arith.constant 0 : i32
    %c0_i32_0 = arith.constant 0 : i32
    return %arg0, %c0_i32 : i32, i32
  }
}

</mosaic_0001>

<bundles_post_ra>
// kernel: _lambda_.11
= control target key start
LH: loop header
LB: loop body
LE: loop exit
PB: predicated region body
PF: predicated region fallthrough
CT: control target
= control target key end

     0   :  { %vm12_vm0 = vcmask 58368   ;;  %vm30_vm1 = vcmask 64512   ;;  %v132_v0 = vmov 0.0   ;;  %vm122_vm2 = vcmask 1040384   ;;  %s234_s0 = inlined_call_operand.vmem [shape: f32[128,8], index: 0, kind: input, shape index: {}]   ;;  %s235_s1 = inlined_call_operand.vmem [shape: f32[2,8], index: 1, kind: output, shape index: {}]  }
   0x1   :  { %13 = vst.msk [vmem:[%s235_s1] sm:$0x3] %vm12_vm0, %v132_v0  ;;  %v14_v1 = vld [vmem:[%s234_s0] sm:$0xff]  ;;  %v15_v2 = vld [vmem:[%s234_s0 + $0x8] sm:$0xff]  ;;  %v16_v3 = vld [vmem:[%s234_s0 + $0x10] sm:$0xff] }
   0x2   :  { %v31_v4 = vsel %vm30_vm1, %v14_v1, 0.0  ;;  %v32_v5 = vsel %vm30_vm1, %v15_v2, 0.0  ;;  %v34_v6 = vsel %vm30_vm1, %v16_v3, 0.0  ;;  %v17_v7 = vld [vmem:[%s234_s0 + $0x18] sm:$0xff]  ;;  %v18_v10 = vld [vmem:[%s234_s0 + $0x20] sm:$0xff]  ;;  %v19_v13 = vld [vmem:[%s234_s0 + $0x28] sm:$0xff]  ;;  %v68_v15 = vmul.f32 %v14_v1, %v14_v1 }
   0x3   :  { %v33_v8 = vadd.f32 %v32_v5, %v31_v4  ;;  %v36_v9 = vsel %vm30_vm1, %v17_v7, 0.0  ;;  %v38_v12 = vsel %vm30_vm1, %v18_v10, 0.0  ;;  %v69_v16 = vmul.f32 %v15_v2, %v15_v2  ;;  %v20_v19 = vld [vmem:[%s234_s0 + $0x30] sm:$0xff]  ;;  %v21_v24 = vld [vmem:[%s234_s0 + $0x38] sm:$0xff]  ;;  %v22_v31 = vld [vmem:[%s234_s0 + $0x40] sm:$0xff] }
   0x4   :  { %v70_v17 = vmul.f32 %v16_v3, %v16_v3  ;;  %v40_v18 = vsel %vm30_vm1, %v19_v13, 0.0  ;;  %v71_v21 = vmul.f32 %v17_v7, %v17_v7  ;;  %v42_v22 = vsel %vm30_vm1, %v20_v19, 0.0  ;;  %v23_v37 = vld [vmem:[%s234_s0 + $0x48] sm:$0xff]  ;;  %v24_v43 = vld [vmem:[%s234_s0 + $0x50] sm:$0xff]  ;;  %v25_v49 = vld [vmem:[%s234_s0 + $0x58] sm:$0xff] }
   0x5   :  { %v35_v11 = vadd.f32 %v34_v6, %v33_v8  ;;  %v72_v23 = vmul.f32 %v18_v10, %v18_v10  ;;  %v84_v26 = vsel %vm30_vm1, %v68_v15, 0.0  ;;  %v85_v27 = vsel %vm30_vm1, %v69_v16, 0.0  ;;  %v26_v55 = vld [vmem:[%s234_s0 + $0x60] sm:$0xff]  ;;  %v27_v61 = vld [vmem:[%s234_s0 + $0x68] sm:$0xff]  ;;  %v28_v3 = vld [vmem:[%s234_s0 + $0x70] sm:$0xff] }
   0x6   :  { %v87_v28 = vsel %vm30_vm1, %v70_v17, 0.0  ;;  %v44_v29 = vsel %vm30_vm1, %v21_v24, 0.0  ;;  %v86_v30 = vadd.f32 %v85_v27, %v84_v26  ;;  %v73_v33 = vmul.f32 %v19_v13, %v19_v13 }
   0x7   :  { %v37_v14 = vadd.f32 %v36_v9, %v35_v11  ;;  %v89_v34 = vsel %vm30_vm1, %v71_v21, 0.0  ;;  %v46_v35 = vsel %vm30_vm1, %v22_v31, 0.0  ;;  %v74_v39 = vmul.f32 %v20_v19, %v20_v19  ;;  %v29_v9 = vld [vmem:[%s234_s0 + $0x78] sm:$0xff] }
   0x8   :  { %v88_v36 = vadd.f32 %v87_v28, %v86_v30  ;;  %v91_v40 = vsel %vm30_vm1, %v72_v23, 0.0  ;;  %v48_v41 = vsel %vm30_vm1, %v23_v37, 0.0  ;;  %v75_v45 = vmul.f32 %v21_v24, %v21_v24 }
   0x9   :  { %v39_v20 = vadd.f32 %v38_v12, %v37_v14  ;;  %v93_v46 = vsel %vm30_vm1, %v73_v33, 0.0  ;;  %v50_v47 = vsel %vm30_vm1, %v24_v43, 0.0  ;;  %v76_v51 = vmul.f32 %v22_v31, %v22_v31 }
   0xa   :  { %v90_v42 = vadd.f32 %v89_v34, %v88_v36  ;;  %v95_v52 = vsel %vm30_vm1, %v74_v39, 0.0  ;;  %v52_v53 = vsel %vm30_vm1, %v25_v49, 0.0  ;;  %v77_v57 = vmul.f32 %v23_v37, %v23_v37 }
   0xb   :  { %v41_v25 = vadd.f32 %v40_v18, %v39_v20  ;;  %v97_v58 = vsel %vm30_vm1, %v75_v45, 0.0  ;;  %v54_v59 = vsel %vm30_vm1, %v26_v55, 0.0  ;;  %v78_v63 = vmul.f32 %v24_v43, %v24_v43  ;;  %v121_v43 = vld [vmem:[%s235_s1] sm:$0x3] }
   0xc   :  { %v92_v48 = vadd.f32 %v91_v40, %v90_v42  ;;  %v99_v0 = vsel %vm30_vm1, %v76_v51, 0.0  ;;  %v56_v1 = vsel %vm30_vm1, %v27_v61, 0.0  ;;  %v79_v5 = vmul.f32 %v25_v49, %v25_v49 }
   0xd   :  { %v43_v32 = vadd.f32 %v42_v22, %v41_v25  ;;  %v101_v6 = vsel %vm30_vm1, %v77_v57, 0.0  ;;  %v58_v7 = vsel %vm30_vm1, %v28_v3, 0.0  ;;  %v80_v11 = vmul.f32 %v26_v55, %v26_v55 }
   0xe   :  { %v94_v54 = vadd.f32 %v93_v46, %v92_v48  ;;  %v103_v12 = vsel %vm30_vm1, %v78_v63, 0.0  ;;  %v60_v13 = vsel %vm30_vm1, %v29_v9, 0.0  ;;  %v81_v16 = vmul.f32 %v27_v61, %v27_v61 }
   0xf   :  { %v45_v38 = vadd.f32 %v44_v29, %v43_v32  ;;  %v105_v17 = vsel %vm30_vm1, %v79_v5, 0.0  ;;  %v82_v20 = vmul.f32 %v28_v3, %v28_v3  ;;  %v107_v21 = vsel %vm30_vm1, %v80_v11, 0.0 }
  0x10   :  { %v96_v60 = vadd.f32 %v95_v52, %v94_v54  ;;  %v83_v24 = vmul.f32 %v29_v9, %v29_v9  ;;  %v109_v25 = vsel %vm30_vm1, %v81_v16, 0.0 }
  0x11   :  { %v47_v44 = vadd.f32 %v46_v35, %v45_v38  ;;  %v111_v28 = vsel %vm30_vm1, %v82_v20, 0.0 }
  0x12   :  { %v98_v2 = vadd.f32 %v97_v58, %v96_v60  ;;  %v113_v30 = vsel %vm30_vm1, %v83_v24, 0.0 }
  0x13   :  { %v49_v50 = vadd.f32 %v48_v41, %v47_v44 }
  0x14   :  { %v100_v8 = vadd.f32 %v99_v0, %v98_v2 }
  0x15   :  { %v51_v56 = vadd.f32 %v50_v47, %v49_v50 }
  0x16   :  { %v102_v14 = vadd.f32 %v101_v6, %v100_v8 }
  0x17   :  { %v53_v62 = vadd.f32 %v52_v53, %v51_v56 }
  0x18   :  { %v104_v18 = vadd.f32 %v103_v12, %v102_v14 }
  0x19   :  { %v55_v4 = vadd.f32 %v54_v59, %v53_v62 }
  0x1a   :  { %v106_v22 = vadd.f32 %v105_v17, %v104_v18 }
  0x1b   :  { %v57_v10 = vadd.f32 %v56_v1, %v55_v4 }
  0x1c   :  { %v108_v26 = vadd.f32 %v107_v21, %v106_v22 }
  0x1d   :  { %v59_v15 = vadd.f32 %v58_v7, %v57_v10 }
  0x1e   :  { %v110_v29 = vadd.f32 %v109_v25, %v108_v26 }
  0x1f   :  { %v61_v19 = vadd.f32 %v60_v13, %v59_v15 }
  0x20   :  { %v112_v32 = vadd.f32 %v111_v28, %v110_v29 }
  0x21   :  { %v62_v23 = vrot.slane %v61_v19, 4 }
  0x22   :  { %v114_v33 = vadd.f32 %v113_v30, %v112_v32 }
  0x23   :  { %v63_v27 = vadd.f32 %v62_v23, %v61_v19 }
  0x24   :  { %v115_v35 = vrot.slane %v114_v33, 4 }
  0x25   :  { %v64_v31 = vrot.slane %v63_v27, 2 }
  0x26   :  { %v116_v36 = vadd.f32 %v115_v35, %v114_v33 }
  0x27   :  { %v65_v34 = vadd.f32 %v64_v31, %v63_v27 }
  0x28   :  { %v117_v38 = vrot.slane %v116_v36, 2 }
  0x29   :  { %v66_v37 = vrot.slane %v65_v34, 1 }
  0x2a   :  { %v118_v39 = vadd.f32 %v117_v38, %v116_v36 }
  0x2b   :  { %v67_v40 = vadd.f32 %v66_v37, %v65_v34 }
  0x2c   :  { %v119_v41 = vrot.slane %v118_v39, 1 }
  0x2e   :  { %v120_v42 = vadd.f32 %v119_v41, %v118_v39 }
  0x30   :  { %v123_v44 = vsel %vm122_vm2, %v67_v40, %v120_v42 }
  0x31   :  { %v124_v45 = vadd.f32 %v123_v44, %v121_v43 }
  0x33   :  { %126 = vst.msk [vmem:[%s235_s1] sm:$0x3] %vm12_vm0, %v124_v45 }

// kernel: _lambda_.12
= control target key start
LH: loop header
LB: loop body
LE: loop exit
PB: predicated region body
PF: predicated region fallthrough
CT: control target
= control target key end

     0   :  { %vm126_vm3 = vcmask 60416   ;;  %s298_s1 = inlined_call_operand.vmem [shape: f32[2,8], index: 1, kind: input, shape index: {}]   ;;  %s299_s2 = inlined_call_operand.vmem [shape: f32[1,8], index: 2, kind: input, shape index: {}]   ;;  %s300_s0 = inlined_call_operand.vmem [shape: f32[128,8], index: 0, kind: input, shape index: {}]   ;;  %s301_s3 = inlined_call_operand.vmem [shape: f32[1,8], index: 3, kind: input, shape index: {}]   ;;  %s302_s4 = inlined_call_operand.vmem [shape: bf16[128,8], index: 4, kind: output, shape index: {}]  }
   0x1   :  { %v33_v0 = vld [vmem:[%s298_s1] sm:$0x1]  ;;  %v35_v1 = vld [vmem:[%s298_s1 + $0x1] sm:$0x1]  ;;  %v18_v19 = vld [vmem:[%s300_s0 + $0x8] sm:$0xff] }
   0x2   :  { %v34_v2 = vmul.f32 0.0078125, %v33_v0  ;;  %v36_v3 = vmul.f32 0.0078125, %v35_v1  ;;  %v51_v14 = vld [vmem:[%s299_s2] sm:$0x1]  ;;  %v19_v20 = vld [vmem:[%s300_s0 + $0x10] sm:$0xff]  ;;  %v20_v21 = vld [vmem:[%s300_s0 + $0x18] sm:$0xff] }
   0x3   :  { %v17_v16 = vld [vmem:[%s300_s0] sm:$0xff]  ;;  %v22_v25 = vld [vmem:[%s300_s0 + $0x28] sm:$0xff]  ;;  %v23_v26 = vld [vmem:[%s300_s0 + $0x30] sm:$0xff] }
   0x4   :  { %v37_v4 = vmul.f32 %v34_v2, %v34_v2  ;;  %v53_v18 = vld [vmem:[%s301_s3] sm:$0x1]  ;;  %v24_v27 = vld [vmem:[%s300_s0 + $0x38] sm:$0xff]  ;;  %v26_v33 = vld [vmem:[%s300_s0 + $0x48] sm:$0xff] }
   0x5   :  { %v21_v24 = vld [vmem:[%s300_s0 + $0x20] sm:$0xff]  ;;  %v27_v34 = vld [vmem:[%s300_s0 + $0x50] sm:$0xff]  ;;  %v28_v35 = vld [vmem:[%s300_s0 + $0x58] sm:$0xff] }
   0x6   :  { %v38_v5 = vsub.f32 %v36_v3, %v37_v4  ;;  %v25_v28 = vld [vmem:[%s300_s0 + $0x40] sm:$0xff]  ;;  %v30_v51 = vld [vmem:[%s300_s0 + $0x68] sm:$0xff]  ;;  %v31_v4 = vld [vmem:[%s300_s0 + $0x70] sm:$0xff] }
   0x7   :  { %v29_v50 = vld [vmem:[%s300_s0 + $0x60] sm:$0xff] }
   0x8   :  { %v39_v6 = vmax.f32 %v38_v5, 0.0  ;;  %v32_v5 = vld [vmem:[%s300_s0 + $0x78] sm:$0xff] }
   0xa   :  { %v40_v7 = vadd.f32 1e-05, %v39_v6 }
   0xc   :  { %147 = vrsqrt.f32 %v40_v7  ;;  %vm47_vm0 = vweird.f32 %v40_v7 }
  0x12   :  { %v148_v8 = vpop.eup %147 }
  0x13   :  { %v42_v9 = vmul.f32 %v148_v8, %v40_v7  ;;  %vm48_vm1 = vweird.f32 %v148_v8 }
  0x14   :  { %vm49_vm2 = vmor %vm47_vm0, %vm48_vm1 }
  0x15   :  { %v43_v10 = vmul.f32 %v148_v8, %v42_v9 }
  0x17   :  { %v44_v11 = vmul.f32 0.5, %v43_v10 }
  0x19   :  { %v45_v12 = vsub.f32 1.5, %v44_v11 }
  0x1b   :  { %v46_v13 = vmul.f32 %v148_v8, %v45_v12 }
  0x1d   :  { %v50_v15 = vsel %vm49_vm2, %v148_v8, %v46_v13 }
  0x1e   :  { %v52_v17 = vmul.f32 %v51_v14, %v50_v15 }
  0x20   :  { %v54_v22 = vmul.f32 %v52_v17, %v34_v2  ;;  %v57_v23 = vperm.slane %v52_v17, 0 }
  0x22   :  { %v55_v29 = vsub.f32 %v53_v18, %v54_v22  ;;  %v59_v30 = vmul.f32 %v57_v23, %v17_v16  ;;  %v60_v31 = vmul.f32 %v57_v23, %v18_v19  ;;  %v61_v32 = vmul.f32 %v57_v23, %v19_v20 }
  0x23   :  { %v62_v36 = vmul.f32 %v57_v23, %v20_v21  ;;  %v63_v37 = vmul.f32 %v57_v23, %v21_v24  ;;  %v64_v38 = vmul.f32 %v57_v23, %v22_v25  ;;  %v65_v39 = vmul.f32 %v57_v23, %v23_v26 }
  0x24   :  { %v76_v40 = vperm.slane %v55_v29, 0  ;;  %v66_v41 = vmul.f32 %v57_v23, %v24_v27  ;;  %v67_v42 = vmul.f32 %v57_v23, %v25_v28  ;;  %v68_v43 = vmul.f32 %v57_v23, %v26_v33 }
  0x25   :  { %v69_v44 = vmul.f32 %v57_v23, %v27_v34  ;;  %v70_v45 = vmul.f32 %v57_v23, %v28_v35  ;;  %v71_v62 = vmul.f32 %v57_v23, %v29_v50  ;;  %v72_v63 = vmul.f32 %v57_v23, %v30_v51 }
  0x26   :  { %v78_v46 = vadd.f32 %v76_v40, %v59_v30  ;;  %v79_v47 = vadd.f32 %v76_v40, %v60_v31  ;;  %v80_v48 = vadd.f32 %v76_v40, %v61_v32  ;;  %v81_v49 = vadd.f32 %v76_v40, %v62_v36 }
  0x27   :  { %v82_v52 = vadd.f32 %v76_v40, %v63_v37  ;;  %v83_v53 = vadd.f32 %v76_v40, %v64_v38  ;;  %v84_v54 = vadd.f32 %v76_v40, %v65_v39  ;;  %v85_v55 = vadd.f32 %v76_v40, %v66_v41 }
  0x28   :  { %v94_v56 = vmax.f32 %v78_v46, 0.0  ;;  %v95_v57 = vmax.f32 %v79_v47, 0.0  ;;  %v96_v58 = vmax.f32 %v80_v48, 0.0  ;;  %v97_v59 = vmax.f32 %v81_v49, 0.0 }
  0x29   :  { %v98_v60 = vmax.f32 %v82_v52, 0.0  ;;  %v99_v61 = vmax.f32 %v83_v53, 0.0  ;;  %v100_v3 = vmax.f32 %v84_v54, 0.0  ;;  %v101_v9 = vmax.f32 %v85_v55, 0.0 }
  0x2a   :  { %v110_v0 = vpack.c.bf16 %v94_v56, %v94_v56  ;;  %v111_v1 = vpack.c.bf16 %v95_v57, %v95_v57  ;;  %v112_v2 = vpack.c.bf16 %v96_v58, %v96_v58  ;;  %v113_v6 = vpack.c.bf16 %v97_v59, %v97_v59 }
  0x2b   :  { %v114_v7 = vpack.c.bf16 %v98_v60, %v98_v60  ;;  %v115_v8 = vpack.c.bf16 %v99_v61, %v99_v61  ;;  %v86_v10 = vadd.f32 %v76_v40, %v67_v42  ;;  %v87_v11 = vadd.f32 %v76_v40, %v68_v43 }
  0x2c   :  { %127 = vst.msk [vmem:[%s302_s4] sm:$0xf] %vm126_vm3, %v110_v0  ;;  %v88_v12 = vadd.f32 %v76_v40, %v69_v44  ;;  %v89_v13 = vadd.f32 %v76_v40, %v70_v45  ;;  %v90_v14 = vadd.f32 %v76_v40, %v71_v62  ;;  %v91_v15 = vadd.f32 %v76_v40, %v72_v63 }
  0x2d   :  { %128 = vst.msk [vmem:[%s302_s4 + $0x4] sm:$0xf] %vm126_vm3, %v111_v1  ;;  %v73_v16 = vmul.f32 %v57_v23, %v31_v4  ;;  %v74_v17 = vmul.f32 %v57_v23, %v32_v5  ;;  %v116_v18 = vpack.c.bf16 %v100_v3, %v100_v3  ;;  %v102_v19 = vmax.f32 %v86_v10, 0.0 }
  0x2e   :  { %129 = vst.msk [vmem:[%s302_s4 + $0x8] sm:$0xf] %vm126_vm3, %v112_v2  ;;  %v103_v20 = vmax.f32 %v87_v11, 0.0  ;;  %v104_v21 = vmax.f32 %v88_v12, 0.0  ;;  %v117_v22 = vpack.c.bf16 %v101_v9, %v101_v9  ;;  %v105_v24 = vmax.f32 %v89_v13, 0.0 }
  0x2f   :  { %130 = vst.msk [vmem:[%s302_s4 + $0xc] sm:$0xf] %vm126_vm3, %v113_v6  ;;  %v92_v25 = vadd.f32 %v76_v40, %v73_v16  ;;  %v93_v26 = vadd.f32 %v76_v40, %v74_v17  ;;  %v118_v23 = vpack.c.bf16 %v102_v19, %v102_v19  ;;  %v106_v27 = vmax.f32 %v90_v14, 0.0 }
  0x30   :  { %131 = vst.msk [vmem:[%s302_s4 + $0x10] sm:$0xf] %vm126_vm3, %v114_v7  ;;  %v119_v28 = vpack.c.bf16 %v103_v20, %v103_v20  ;;  %v107_v29 = vmax.f32 %v91_v15, 0.0  ;;  %v120_v30 = vpack.c.bf16 %v104_v21, %v104_v21  ;;  %v121_v32 = vpack.c.bf16 %v105_v24, %v105_v24 }
  0x31   :  { %132 = vst.msk [vmem:[%s302_s4 + $0x14] sm:$0xf] %vm126_vm3, %v115_v8  ;;  %v108_v31 = vmax.f32 %v92_v25, 0.0  ;;  %v109_v33 = vmax.f32 %v93_v26, 0.0  ;;  %v122_v34 = vpack.c.bf16 %v106_v27, %v106_v27 }
  0x32   :  { %133 = vst.msk [vmem:[%s302_s4 + $0x18] sm:$0xf] %vm126_vm3, %v116_v18  ;;  %v123_v35 = vpack.c.bf16 %v107_v29, %v107_v29 }
  0x33   :  { %134 = vst.msk [vmem:[%s302_s4 + $0x1c] sm:$0xf] %vm126_vm3, %v117_v22  ;;  %v124_v36 = vpack.c.bf16 %v108_v31, %v108_v31  ;;  %v125_v37 = vpack.c.bf16 %v109_v33, %v109_v33 }
  0x34   :  { %135 = vst.msk [vmem:[%s302_s4 + $0x20] sm:$0xf] %vm126_vm3, %v118_v23 }
  0x35   :  { %136 = vst.msk [vmem:[%s302_s4 + $0x24] sm:$0xf] %vm126_vm3, %v119_v28 }
  0x36   :  { %137 = vst.msk [vmem:[%s302_s4 + $0x28] sm:$0xf] %vm126_vm3, %v120_v30 }
  0x37   :  { %138 = vst.msk [vmem:[%s302_s4 + $0x2c] sm:$0xf] %vm126_vm3, %v121_v32 }
  0x38   :  { %139 = vst.msk [vmem:[%s302_s4 + $0x30] sm:$0xf] %vm126_vm3, %v122_v34 }
  0x39   :  { %140 = vst.msk [vmem:[%s302_s4 + $0x34] sm:$0xf] %vm126_vm3, %v123_v35 }
  0x3a   :  { %141 = vst.msk [vmem:[%s302_s4 + $0x38] sm:$0xf] %vm126_vm3, %v124_v36 }
  0x3b   :  { %142 = vst.msk [vmem:[%s302_s4 + $0x3c] sm:$0xf] %vm126_vm3, %v125_v37 }

// kernel: _lambda_.10
= control target key start
LH: loop header
LB: loop body
LE: loop exit
PB: predicated region body
PF: predicated region fallthrough
CT: control target
= control target key end

     0   :  { %vm134_vm0 = vcmask 1041408   ;;  %vm19_vm1 = vcmask 64512   ;;  %v332_v1 = vmov 0.0   ;;  %vm109_vm2 = vcmask 31744   ;;  %s505_s1 = inlined_call_operand.vmem [shape: bf16[4,8], index: 1, kind: input, shape index: {}]   ;;  %s506_s0 = inlined_call_operand.vmem [shape: bf16[128,4], index: 0, kind: input, shape index: {}]   ;;  %s507_s2 = inlined_call_operand.vmem [shape: f32[1,8], index: 2, kind: input, shape index: {}]   ;;  %s508_s3 = inlined_call_operand.vmem [shape: f32[128,8], index: 3, kind: output, shape index: {}]  }
   0x1   :  { %v68_v0 = vld [vmem:[%s505_s1] sm:$0x3]  ;;  %20 = vst.msk [vmem:[#allocation2] sm:$0xff] %vm19_vm1, %v332_v1  ;;  %v321_v4 = vld [vmem:[%s506_s0 + $0x10] sm:$0xff]  ;;  %v320_v7 = vld [vmem:[%s506_s0 + $0x8] sm:$0xff] }
   0x2   :  { %v136_v2 = vsel %vm134_vm0, %v68_v0, 0  ;;  %v319_v3 = vld [vmem:[%s506_s0] sm:$0xff]  ;;  %21 = vst.msk [vmem:[#allocation2 + $0x8] sm:$0xff] %vm19_vm1, %v332_v1  ;;  %v325_v6 = vld [vmem:[%s506_s0 + $0x30] sm:$0xff]  ;;  %v322_v8 = vld [vmem:[%s506_s0 + $0x18] sm:$0xff] }
   0x3   :  { %145 = vmatpush.bf16.msra.mxu0 %v136_v2  ;;  %327 = vmatpush.bf16.msra.mxu1 %v136_v2  ;;  %v323_v5 = vld [vmem:[%s506_s0 + $0x20] sm:$0xff]  ;;  %22 = vst.msk [vmem:[#allocation2 + $0x10] sm:$0xff] %vm19_vm1, %v332_v1  ;;  %v324_v9 = vld [vmem:[%s506_s0 + $0x28] sm:$0xff]  ;;  %v326_v10 = vld [vmem:[%s506_s0 + $0x38] sm:$0xff] }
   0x4   :  { %328 = vmatpush.bf16.msra.mxu2 %v136_v2  ;;  %329 = vmatpush.bf16.msra.mxu3 %v136_v2  ;;  %23 = vst.msk [vmem:[#allocation2 + $0x18] sm:$0xff] %vm19_vm1, %v332_v1  ;;  %v409_v20 = vld [vmem:[%s507_s2] ss:$0 sm:$0xff] }
   0x5   :  { %24 = vst.msk [vmem:[#allocation2 + $0x20] sm:$0xff] %vm19_vm1, %v332_v1 }
   0x6   :  { %311 = vmatmul.msk.bf16.vlgmr.msra.gmra.mxu0 %vm109_vm2, %v319_v3  ;;  %313 = vmatmul.msk.bf16.vlgmr.msra.gmra.mxu1 %vm109_vm2, %v321_v4  ;;  %25 = vst.msk [vmem:[#allocation2 + $0x28] sm:$0xff] %vm19_vm1, %v332_v1 }
   0x7   :  { %315 = vmatmul.msk.bf16.vlgmr.msra.gmra.mxu2 %vm109_vm2, %v323_v5  ;;  %317 = vmatmul.msk.bf16.vlgmr.msra.gmra.mxu3 %vm109_vm2, %v325_v6  ;;  %26 = vst.msk [vmem:[#allocation2 + $0x30] sm:$0xff] %vm19_vm1, %v332_v1 }
   0x8   :  { %27 = vst.msk [vmem:[#allocation2 + $0x38] sm:$0xff] %vm19_vm1, %v332_v1  ;;  %v36_v11 = vld [vmem:[#allocation2] sm:$0xff] }
   0x9   :  { %28 = vst.msk [vmem:[#allocation2 + $0x40] sm:$0xff] %vm19_vm1, %v332_v1  ;;  %v37_v19 = vld [vmem:[#allocation2 + $0x8] sm:$0xff] }
   0xa   :  { %29 = vst.msk [vmem:[#allocation2 + $0x48] sm:$0xff] %vm19_vm1, %v332_v1  ;;  %v38_v40 = vld [vmem:[#allocation2 + $0x10] sm:$0xff] }
   0xb   :  { %30 = vst.msk [vmem:[#allocation2 + $0x50] sm:$0xff] %vm19_vm1, %v332_v1  ;;  %v39_v58 = vld [vmem:[#allocation2 + $0x18] sm:$0xff] }
   0xc   :  { %31 = vst.msk [vmem:[#allocation2 + $0x58] sm:$0xff] %vm19_vm1, %v332_v1  ;;  %v40_v12 = vld [vmem:[#allocation2 + $0x20] sm:$0xff] }
   0xd   :  { %32 = vst.msk [vmem:[#allocation2 + $0x60] sm:$0xff] %vm19_vm1, %v332_v1  ;;  %v41_v26 = vld [vmem:[#allocation2 + $0x28] sm:$0xff] }
   0xe   :  { %33 = vst.msk [vmem:[#allocation2 + $0x68] sm:$0xff] %vm19_vm1, %v332_v1  ;;  %v42_v44 = vld [vmem:[#allocation2 + $0x30] sm:$0xff] }
   0xf   :  { %34 = vst.msk [vmem:[#allocation2 + $0x70] sm:$0xff] %vm19_vm1, %v332_v1  ;;  %v43_v62 = vld [vmem:[#allocation2 + $0x38] sm:$0xff] }
  0x10   :  { %35 = vst.msk [vmem:[#allocation2 + $0x78] sm:$0xff] %vm19_vm1, %v332_v1  ;;  %v44_v17 = vld [vmem:[#allocation2 + $0x40] sm:$0xff] }
  0x11   :  { %v45_v34 = vld [vmem:[#allocation2 + $0x48] sm:$0xff] }
  0x12   :  { %v46_v52 = vld [vmem:[#allocation2 + $0x50] sm:$0xff] }
  0x13   :  { %v47_v6 = vld [vmem:[#allocation2 + $0x58] sm:$0xff] }
  0x14   :  { %v48_v18 = vld [vmem:[#allocation2 + $0x60] sm:$0xff] }
  0x15   :  { %v49_v35 = vld [vmem:[#allocation2 + $0x68] sm:$0xff] }
  0x16   :  { %312 = vmatmul.msk.bf16.gmra.mxu0 %vm109_vm2, %v320_v7  ;;  %314 = vmatmul.msk.bf16.gmra.mxu1 %vm109_vm2, %v322_v8  ;;  %v50_v53 = vld [vmem:[#allocation2 + $0x70] sm:$0xff] }
  0x17   :  { %316 = vmatmul.msk.bf16.gmra.mxu2 %vm109_vm2, %v324_v9  ;;  %318 = vmatmul.msk.bf16.gmra.mxu3 %vm109_vm2, %v326_v10 }
  0x83   :  { %v147_v13 = vpop.f32.mrf.mxu0  ;;  %v157_v14 = vpop.f32.mrf.mxu1 }
  0x84   :  { %v187_v15 = vadd.f32 %v147_v13, %v36_v11  ;;  %v191_v16 = vadd.f32 %v157_v14, %v40_v12  ;;  %v51_v11 = vld [vmem:[#allocation2 + $0x78] sm:$0xff] }
  0x86   :  { %204 = vst.msk [vmem:[#allocation2] sm:$0xff] %vm19_vm1, %v187_v15 }
  0x87   :  { %208 = vst.msk [vmem:[#allocation2 + $0x20] sm:$0xff] %vm19_vm1, %v191_v16 }
  0x8a   :  { %v167_v21 = vpop.f32.mrf.mxu2  ;;  %v177_v22 = vpop.f32.mrf.mxu3 }
  0x8b   :  { %v195_v23 = vadd.f32 %v167_v21, %v44_v17  ;;  %v199_v24 = vadd.f32 %v177_v22, %v48_v18  ;;  %v149_v25 = vpop.f32.mrf.mxu0  ;;  %v159_v27 = vpop.f32.mrf.mxu1 }
  0x8c   :  { %v188_v28 = vadd.f32 %v149_v25, %v37_v19  ;;  %v192_v32 = vadd.f32 %v159_v27, %v41_v26 }
  0x8d   :  { %v223_v29 = vld [vmem:[#allocation2] sm:$0xff]  ;;  %212 = vst.msk [vmem:[#allocation2 + $0x40] sm:$0xff] %vm19_vm1, %v195_v23 }
  0x8e   :  { %v243_v30 = vadd.f32 %v409_v20, %v223_v29  ;;  %v227_v31 = vld [vmem:[#allocation2 + $0x20] sm:$0xff]  ;;  %216 = vst.msk [vmem:[#allocation2 + $0x60] sm:$0xff] %vm19_vm1, %v199_v24 }
  0x8f   :  { %v247_v33 = vadd.f32 %v409_v20, %v227_v31  ;;  %205 = vst.msk [vmem:[#allocation2 + $0x8] sm:$0xff] %vm19_vm1, %v188_v28 }
  0x90   :  { %259 = vst.msk [vmem:[%s508_s3] sm:$0xff] %vm19_vm1, %v243_v30 }
  0x91   :  { %263 = vst.msk [vmem:[%s508_s3 + $0x20] sm:$0xff] %vm19_vm1, %v247_v33 }
  0x92   :  { %209 = vst.msk [vmem:[#allocation2 + $0x28] sm:$0xff] %vm19_vm1, %v192_v32  ;;  %v169_v36 = vpop.f32.mrf.mxu2  ;;  %v179_v37 = vpop.f32.mrf.mxu3 }
  0x93   :  { %v196_v38 = vadd.f32 %v169_v36, %v45_v34  ;;  %v200_v39 = vadd.f32 %v179_v37, %v49_v35  ;;  %v152_v41 = vpop.f32.mrf.mxu0  ;;  %v162_v42 = vpop.f32.mrf.mxu1 }
  0x94   :  { %v231_v43 = vld [vmem:[#allocation2 + $0x40] sm:$0xff]  ;;  %v189_v49 = vadd.f32 %v152_v41, %v38_v40  ;;  %v193_v51 = vadd.f32 %v162_v42, %v42_v44 }
  0x95   :  { %v251_v45 = vadd.f32 %v409_v20, %v231_v43  ;;  %v235_v46 = vld [vmem:[#allocation2 + $0x60] sm:$0xff]  ;;  %213 = vst.msk [vmem:[#allocation2 + $0x48] sm:$0xff] %vm19_vm1, %v196_v38 }
  0x96   :  { %v255_v47 = vadd.f32 %v409_v20, %v235_v46  ;;  %v224_v48 = vld [vmem:[#allocation2 + $0x8] sm:$0xff]  ;;  %217 = vst.msk [vmem:[#allocation2 + $0x68] sm:$0xff] %vm19_vm1, %v200_v39 }
  0x97   :  { %267 = vst.msk [vmem:[%s508_s3 + $0x40] sm:$0xff] %vm19_vm1, %v251_v45  ;;  %v244_v50 = vadd.f32 %v409_v20, %v224_v48 }
  0x98   :  { %271 = vst.msk [vmem:[%s508_s3 + $0x60] sm:$0xff] %vm19_vm1, %v255_v47 }
  0x99   :  { %260 = vst.msk [vmem:[%s508_s3 + $0x8] sm:$0xff] %vm19_vm1, %v244_v50  ;;  %v228_v54 = vld [vmem:[#allocation2 + $0x28] sm:$0xff] }
  0x9a   :  { %v248_v55 = vadd.f32 %v409_v20, %v228_v54  ;;  %206 = vst.msk [vmem:[#allocation2 + $0x10] sm:$0xff] %vm19_vm1, %v189_v49  ;;  %v172_v56 = vpop.f32.mrf.mxu2  ;;  %v182_v57 = vpop.f32.mrf.mxu3 }
  0x9b   :  { %210 = vst.msk [vmem:[#allocation2 + $0x30] sm:$0xff] %vm19_vm1, %v193_v51  ;;  %v197_v59 = vadd.f32 %v172_v56, %v46_v52  ;;  %v201_v60 = vadd.f32 %v182_v57, %v50_v53  ;;  %v154_v61 = vpop.f32.mrf.mxu0  ;;  %v164_v63 = vpop.f32.mrf.mxu1 }
  0x9c   :  { %264 = vst.msk [vmem:[%s508_s3 + $0x28] sm:$0xff] %vm19_vm1, %v248_v55  ;;  %v232_v0 = vld [vmem:[#allocation2 + $0x48] sm:$0xff]  ;;  %v190_v3 = vadd.f32 %v154_v61, %v39_v58  ;;  %v194_v5 = vadd.f32 %v164_v63, %v43_v62 }
  0x9d   :  { %v252_v1 = vadd.f32 %v409_v20, %v232_v0  ;;  %v236_v2 = vld [vmem:[#allocation2 + $0x68] sm:$0xff]  ;;  %214 = vst.msk [vmem:[#allocation2 + $0x50] sm:$0xff] %vm19_vm1, %v197_v59 }
  0x9e   :  { %v256_v4 = vadd.f32 %v409_v20, %v236_v2  ;;  %218 = vst.msk [vmem:[#allocation2 + $0x70] sm:$0xff] %vm19_vm1, %v201_v60 }
  0x9f   :  { %268 = vst.msk [vmem:[%s508_s3 + $0x48] sm:$0xff] %vm19_vm1, %v252_v1 }
  0xa0   :  { %272 = vst.msk [vmem:[%s508_s3 + $0x68] sm:$0xff] %vm19_vm1, %v256_v4 }
  0xa1   :  { %v225_v7 = vld [vmem:[#allocation2 + $0x10] sm:$0xff]  ;;  %207 = vst.msk [vmem:[#allocation2 + $0x18] sm:$0xff] %vm19_vm1, %v190_v3 }
  0xa2   :  { %v245_v8 = vadd.f32 %v409_v20, %v225_v7  ;;  %v229_v9 = vld [vmem:[#allocation2 + $0x30] sm:$0xff]  ;;  %211 = vst.msk [vmem:[#allocation2 + $0x38] sm:$0xff] %vm19_vm1, %v194_v5  ;;  %v174_v10 = vpop.f32.mrf.mxu2  ;;  %v184_v12 = vpop.f32.mrf.mxu3 }
  0xa3   :  { %v249_v13 = vadd.f32 %v409_v20, %v229_v9  ;;  %v198_v14 = vadd.f32 %v174_v10, %v47_v6  ;;  %v202_v18 = vadd.f32 %v184_v12, %v51_v11 }
  0xa4   :  { %261 = vst.msk [vmem:[%s508_s3 + $0x10] sm:$0xff] %vm19_vm1, %v245_v8  ;;  %v233_v15 = vld [vmem:[#allocation2 + $0x50] sm:$0xff] }
  0xa5   :  { %265 = vst.msk [vmem:[%s508_s3 + $0x30] sm:$0xff] %vm19_vm1, %v249_v13  ;;  %v253_v16 = vadd.f32 %v409_v20, %v233_v15  ;;  %v237_v17 = vld [vmem:[#allocation2 + $0x70] sm:$0xff] }
  0xa6   :  { %v257_v19 = vadd.f32 %v409_v20, %v237_v17  ;;  %215 = vst.msk [vmem:[#allocation2 + $0x58] sm:$0xff] %vm19_vm1, %v198_v14 }
  0xa7   :  { %269 = vst.msk [vmem:[%s508_s3 + $0x50] sm:$0xff] %vm19_vm1, %v253_v16 }
  0xa8   :  { %273 = vst.msk [vmem:[%s508_s3 + $0x70] sm:$0xff] %vm19_vm1, %v257_v19  ;;  %v226_v21 = vld [vmem:[#allocation2 + $0x18] sm:$0xff] }
  0xa9   :  { %v246_v22 = vadd.f32 %v409_v20, %v226_v21  ;;  %v230_v23 = vld [vmem:[#allocation2 + $0x38] sm:$0xff]  ;;  %219 = vst.msk [vmem:[#allocation2 + $0x78] sm:$0xff] %vm19_vm1, %v202_v18 }
  0xaa   :  { %v250_v24 = vadd.f32 %v409_v20, %v230_v23 }
  0xab   :  { %262 = vst.msk [vmem:[%s508_s3 + $0x18] sm:$0xff] %vm19_vm1, %v246_v22 }
  0xac   :  { %266 = vst.msk [vmem:[%s508_s3 + $0x38] sm:$0xff] %vm19_vm1, %v250_v24 }
  0xad   :  { %v234_v25 = vld [vmem:[#allocation2 + $0x58] sm:$0xff] }
  0xae   :  { %v254_v26 = vadd.f32 %v409_v20, %v234_v25 }
  0xb0   :  { %270 = vst.msk [vmem:[%s508_s3 + $0x58] sm:$0xff] %vm19_vm1, %v254_v26  ;;  %v238_v27 = vld [vmem:[#allocation2 + $0x78] sm:$0xff] }
  0xb1   :  { %v258_v28 = vadd.f32 %v409_v20, %v238_v27 }
  0xb3   :  { %274 = vst.msk [vmem:[%s508_s3 + $0x78] sm:$0xff] %vm19_vm1, %v258_v28 }

// kernel: _lambda_.16
= control target key start
LH: loop header
LB: loop body
LE: loop exit
PB: predicated region body
PF: predicated region fallthrough
CT: control target
= control target key end

     0   :  { %vm134_vm0 = vcmask 1043456   ;;  %vm19_vm1 = vcmask 130048   ;;  %v332_v1 = vmov 0.0   ;;  %vm109_vm2 = vcmask 64512   ;;  %s505_s1 = inlined_call_operand.vmem [shape: bf16[8,16], index: 1, kind: input, shape index: {}]   ;;  %s506_s0 = inlined_call_operand.vmem [shape: bf16[128,8], index: 0, kind: input, shape index: {}]   ;;  %s507_s2 = inlined_call_operand.vmem [shape: f32[1,16], index: 2, kind: input, shape index: {}]   ;;  %s508_s3 = inlined_call_operand.vmem [shape: f32[128,16], index: 3, kind: output, shape index: {}]  }
   0x1   :  { %v68_v0 = vld [vmem:[%s505_s1] sm:$0xf]  ;;  %20 = vst.msk [vmem:[#allocation2] sm:$0xff] %vm19_vm1, %v332_v1  ;;  %v321_v4 = vld [vmem:[%s506_s0 + $0x10] sm:$0xff]  ;;  %v320_v7 = vld [vmem:[%s506_s0 + $0x8] sm:$0xff] }
   0x2   :  { %v136_v2 = vsel %vm134_vm0, %v68_v0, 0  ;;  %v319_v3 = vld [vmem:[%s506_s0] sm:$0xff]  ;;  %21 = vst.msk [vmem:[#allocation2 + $0x8] sm:$0xff] %vm19_vm1, %v332_v1  ;;  %v325_v6 = vld [vmem:[%s506_s0 + $0x30] sm:$0xff]  ;;  %v322_v8 = vld [vmem:[%s506_s0 + $0x18] sm:$0xff] }
   0x3   :  { %145 = vmatpush.bf16.msra.mxu0 %v136_v2  ;;  %327 = vmatpush.bf16.msra.mxu1 %v136_v2  ;;  %v323_v5 = vld [vmem:[%s506_s0 + $0x20] sm:$0xff]  ;;  %22 = vst.msk [vmem:[#allocation2 + $0x10] sm:$0xff] %vm19_vm1, %v332_v1  ;;  %v324_v9 = vld [vmem:[%s506_s0 + $0x28] sm:$0xff]  ;;  %v326_v10 = vld [vmem:[%s506_s0 + $0x38] sm:$0xff] }
   0x4   :  { %328 = vmatpush.bf16.msra.mxu2 %v136_v2  ;;  %329 = vmatpush.bf16.msra.mxu3 %v136_v2  ;;  %23 = vst.msk [vmem:[#allocation2 + $0x18] sm:$0xff] %vm19_vm1, %v332_v1  ;;  %v409_v20 = vld [vmem:[%s507_s2] ss:$0 sm:$0xff] }
   0x5   :  { %24 = vst.msk [vmem:[#allocation2 + $0x20] sm:$0xff] %vm19_vm1, %v332_v1 }
   0x6   :  { %311 = vmatmul.msk.bf16.vlgmr.msra.gmra.mxu0 %vm109_vm2, %v319_v3  ;;  %313 = vmatmul.msk.bf16.vlgmr.msra.gmra.mxu1 %vm109_vm2, %v321_v4  ;;  %25 = vst.msk [vmem:[#allocation2 + $0x28] sm:$0xff] %vm19_vm1, %v332_v1 }
   0x7   :  { %315 = vmatmul.msk.bf16.vlgmr.msra.gmra.mxu2 %vm109_vm2, %v323_v5  ;;  %317 = vmatmul.msk.bf16.vlgmr.msra.gmra.mxu3 %vm109_vm2, %v325_v6  ;;  %26 = vst.msk [vmem:[#allocation2 + $0x30] sm:$0xff] %vm19_vm1, %v332_v1 }
   0x8   :  { %27 = vst.msk [vmem:[#allocation2 + $0x38] sm:$0xff] %vm19_vm1, %v332_v1  ;;  %v36_v11 = vld [vmem:[#allocation2] sm:$0xff] }
   0x9   :  { %28 = vst.msk [vmem:[#allocation2 + $0x40] sm:$0xff] %vm19_vm1, %v332_v1  ;;  %v37_v19 = vld [vmem:[#allocation2 + $0x8] sm:$0xff] }
   0xa   :  { %29 = vst.msk [vmem:[#allocation2 + $0x48] sm:$0xff] %vm19_vm1, %v332_v1  ;;  %v38_v40 = vld [vmem:[#allocation2 + $0x10] sm:$0xff] }
   0xb   :  { %30 = vst.msk [vmem:[#allocation2 + $0x50] sm:$0xff] %vm19_vm1, %v332_v1  ;;  %v39_v58 = vld [vmem:[#allocation2 + $0x18] sm:$0xff] }
   0xc   :  { %31 = vst.msk [vmem:[#allocation2 + $0x58] sm:$0xff] %vm19_vm1, %v332_v1  ;;  %v40_v12 = vld [vmem:[#allocation2 + $0x20] sm:$0xff] }
   0xd   :  { %32 = vst.msk [vmem:[#allocation2 + $0x60] sm:$0xff] %vm19_vm1, %v332_v1  ;;  %v41_v26 = vld [vmem:[#allocation2 + $0x28] sm:$0xff] }
   0xe   :  { %33 = vst.msk [vmem:[#allocation2 + $0x68] sm:$0xff] %vm19_vm1, %v332_v1  ;;  %v42_v44 = vld [vmem:[#allocation2 + $0x30] sm:$0xff] }
   0xf   :  { %34 = vst.msk [vmem:[#allocation2 + $0x70] sm:$0xff] %vm19_vm1, %v332_v1  ;;  %v43_v62 = vld [vmem:[#allocation2 + $0x38] sm:$0xff] }
  0x10   :  { %35 = vst.msk [vmem:[#allocation2 + $0x78] sm:$0xff] %vm19_vm1, %v332_v1  ;;  %v44_v17 = vld [vmem:[#allocation2 + $0x40] sm:$0xff] }
  0x11   :  { %v45_v34 = vld [vmem:[#allocation2 + $0x48] sm:$0xff] }
  0x12   :  { %v46_v52 = vld [vmem:[#allocation2 + $0x50] sm:$0xff] }
  0x13   :  { %v47_v6 = vld [vmem:[#allocation2 + $0x58] sm:$0xff] }
  0x14   :  { %v48_v18 = vld [vmem:[#allocation2 + $0x60] sm:$0xff] }
  0x15   :  { %v49_v35 = vld [vmem:[#allocation2 + $0x68] sm:$0xff] }
  0x16   :  { %312 = vmatmul.msk.bf16.gmra.mxu0 %vm109_vm2, %v320_v7  ;;  %314 = vmatmul.msk.bf16.gmra.mxu1 %vm109_vm2, %v322_v8  ;;  %v50_v53 = vld [vmem:[#allocation2 + $0x70] sm:$0xff] }
  0x17   :  { %316 = vmatmul.msk.bf16.gmra.mxu2 %vm109_vm2, %v324_v9  ;;  %318 = vmatmul.msk.bf16.gmra.mxu3 %vm109_vm2, %v326_v10 }
  0x83   :  { %v147_v13 = vpop.f32.mrf.mxu0  ;;  %v157_v14 = vpop.f32.mrf.mxu1 }
  0x84   :  { %v187_v15 = vadd.f32 %v147_v13, %v36_v11  ;;  %v191_v16 = vadd.f32 %v157_v14, %v40_v12  ;;  %v51_v11 = vld [vmem:[#allocation2 + $0x78] sm:$0xff] }
  0x86   :  { %204 = vst.msk [vmem:[#allocation2] sm:$0xff] %vm19_vm1, %v187_v15 }
  0x87   :  { %208 = vst.msk [vmem:[#allocation2 + $0x20] sm:$0xff] %vm19_vm1, %v191_v16 }
  0x8a   :  { %v167_v21 = vpop.f32.mrf.mxu2  ;;  %v177_v22 = vpop.f32.mrf.mxu3 }
  0x8b   :  { %v195_v23 = vadd.f32 %v167_v21, %v44_v17  ;;  %v199_v24 = vadd.f32 %v177_v22, %v48_v18  ;;  %v149_v25 = vpop.f32.mrf.mxu0  ;;  %v159_v27 = vpop.f32.mrf.mxu1 }
  0x8c   :  { %v188_v28 = vadd.f32 %v149_v25, %v37_v19  ;;  %v192_v32 = vadd.f32 %v159_v27, %v41_v26 }
  0x8d   :  { %v223_v29 = vld [vmem:[#allocation2] sm:$0xff]  ;;  %212 = vst.msk [vmem:[#allocation2 + $0x40] sm:$0xff] %vm19_vm1, %v195_v23 }
  0x8e   :  { %v243_v30 = vadd.f32 %v409_v20, %v223_v29  ;;  %v227_v31 = vld [vmem:[#allocation2 + $0x20] sm:$0xff]  ;;  %216 = vst.msk [vmem:[#allocation2 + $0x60] sm:$0xff] %vm19_vm1, %v199_v24 }
  0x8f   :  { %v247_v33 = vadd.f32 %v409_v20, %v227_v31  ;;  %205 = vst.msk [vmem:[#allocation2 + $0x8] sm:$0xff] %vm19_vm1, %v188_v28 }
  0x90   :  { %259 = vst.msk [vmem:[%s508_s3] sm:$0xff] %vm19_vm1, %v243_v30 }
  0x91   :  { %263 = vst.msk [vmem:[%s508_s3 + $0x20] sm:$0xff] %vm19_vm1, %v247_v33 }
  0x92   :  { %209 = vst.msk [vmem:[#allocation2 + $0x28] sm:$0xff] %vm19_vm1, %v192_v32  ;;  %v169_v36 = vpop.f32.mrf.mxu2  ;;  %v179_v37 = vpop.f32.mrf.mxu3 }
  0x93   :  { %v196_v38 = vadd.f32 %v169_v36, %v45_v34  ;;  %v200_v39 = vadd.f32 %v179_v37, %v49_v35  ;;  %v152_v41 = vpop.f32.mrf.mxu0  ;;  %v162_v42 = vpop.f32.mrf.mxu1 }
  0x94   :  { %v231_v43 = vld [vmem:[#allocation2 + $0x40] sm:$0xff]  ;;  %v189_v49 = vadd.f32 %v152_v41, %v38_v40  ;;  %v193_v51 = vadd.f32 %v162_v42, %v42_v44 }
  0x95   :  { %v251_v45 = vadd.f32 %v409_v20, %v231_v43  ;;  %v235_v46 = vld [vmem:[#allocation2 + $0x60] sm:$0xff]  ;;  %213 = vst.msk [vmem:[#allocation2 + $0x48] sm:$0xff] %vm19_vm1, %v196_v38 }
  0x96   :  { %v255_v47 = vadd.f32 %v409_v20, %v235_v46  ;;  %v224_v48 = vld [vmem:[#allocation2 + $0x8] sm:$0xff]  ;;  %217 = vst.msk [vmem:[#allocation2 + $0x68] sm:$0xff] %vm19_vm1, %v200_v39 }
  0x97   :  { %267 = vst.msk [vmem:[%s508_s3 + $0x40] sm:$0xff] %vm19_vm1, %v251_v45  ;;  %v244_v50 = vadd.f32 %v409_v20, %v224_v48 }
  0x98   :  { %271 = vst.msk [vmem:[%s508_s3 + $0x60] sm:$0xff] %vm19_vm1, %v255_v47 }
  0x99   :  { %260 = vst.msk [vmem:[%s508_s3 + $0x8] sm:$0xff] %vm19_vm1, %v244_v50  ;;  %v228_v54 = vld [vmem:[#allocation2 + $0x28] sm:$0xff] }
  0x9a   :  { %v248_v55 = vadd.f32 %v409_v20, %v228_v54  ;;  %206 = vst.msk [vmem:[#allocation2 + $0x10] sm:$0xff] %vm19_vm1, %v189_v49  ;;  %v172_v56 = vpop.f32.mrf.mxu2  ;;  %v182_v57 = vpop.f32.mrf.mxu3 }
  0x9b   :  { %210 = vst.msk [vmem:[#allocation2 + $0x30] sm:$0xff] %vm19_vm1, %v193_v51  ;;  %v197_v59 = vadd.f32 %v172_v56, %v46_v52  ;;  %v201_v60 = vadd.f32 %v182_v57, %v50_v53  ;;  %v154_v61 = vpop.f32.mrf.mxu0  ;;  %v164_v63 = vpop.f32.mrf.mxu1 }
  0x9c   :  { %264 = vst.msk [vmem:[%s508_s3 + $0x28] sm:$0xff] %vm19_vm1, %v248_v55  ;;  %v232_v0 = vld [vmem:[#allocation2 + $0x48] sm:$0xff]  ;;  %v190_v3 = vadd.f32 %v154_v61, %v39_v58  ;;  %v194_v5 = vadd.f32 %v164_v63, %v43_v62 }
  0x9d   :  { %v252_v1 = vadd.f32 %v409_v20, %v232_v0  ;;  %v236_v2 = vld [vmem:[#allocation2 + $0x68] sm:$0xff]  ;;  %214 = vst.msk [vmem:[#allocation2 + $0x50] sm:$0xff] %vm19_vm1, %v197_v59 }
  0x9e   :  { %v256_v4 = vadd.f32 %v409_v20, %v236_v2  ;;  %218 = vst.msk [vmem:[#allocation2 + $0x70] sm:$0xff] %vm19_vm1, %v201_v60 }
  0x9f   :  { %268 = vst.msk [vmem:[%s508_s3 + $0x48] sm:$0xff] %vm19_vm1, %v252_v1 }
  0xa0   :  { %272 = vst.msk [vmem:[%s508_s3 + $0x68] sm:$0xff] %vm19_vm1, %v256_v4 }
  0xa1   :  { %v225_v7 = vld [vmem:[#allocation2 + $0x10] sm:$0xff]  ;;  %207 = vst.msk [vmem:[#allocation2 + $0x18] sm:$0xff] %vm19_vm1, %v190_v3 }
  0xa2   :  { %v245_v8 = vadd.f32 %v409_v20, %v225_v7  ;;  %v229_v9 = vld [vmem:[#allocation2 + $0x30] sm:$0xff]  ;;  %211 = vst.msk [vmem:[#allocation2 + $0x38] sm:$0xff] %vm19_vm1, %v194_v5  ;;  %v174_v10 = vpop.f32.mrf.mxu2  ;;  %v184_v12 = vpop.f32.mrf.mxu3 }
  0xa3   :  { %v249_v13 = vadd.f32 %v409_v20, %v229_v9  ;;  %v198_v14 = vadd.f32 %v174_v10, %v47_v6  ;;  %v202_v18 = vadd.f32 %v184_v12, %v51_v11 }
  0xa4   :  { %261 = vst.msk [vmem:[%s508_s3 + $0x10] sm:$0xff] %vm19_vm1, %v245_v8  ;;  %v233_v15 = vld [vmem:[#allocation2 + $0x50] sm:$0xff] }
  0xa5   :  { %265 = vst.msk [vmem:[%s508_s3 + $0x30] sm:$0xff] %vm19_vm1, %v249_v13  ;;  %v253_v16 = vadd.f32 %v409_v20, %v233_v15  ;;  %v237_v17 = vld [vmem:[#allocation2 + $0x70] sm:$0xff] }
  0xa6   :  { %v257_v19 = vadd.f32 %v409_v20, %v237_v17  ;;  %215 = vst.msk [vmem:[#allocation2 + $0x58] sm:$0xff] %vm19_vm1, %v198_v14 }
  0xa7   :  { %269 = vst.msk [vmem:[%s508_s3 + $0x50] sm:$0xff] %vm19_vm1, %v253_v16 }
  0xa8   :  { %273 = vst.msk [vmem:[%s508_s3 + $0x70] sm:$0xff] %vm19_vm1, %v257_v19  ;;  %v226_v21 = vld [vmem:[#allocation2 + $0x18] sm:$0xff] }
  0xa9   :  { %v246_v22 = vadd.f32 %v409_v20, %v226_v21  ;;  %v230_v23 = vld [vmem:[#allocation2 + $0x38] sm:$0xff]  ;;  %219 = vst.msk [vmem:[#allocation2 + $0x78] sm:$0xff] %vm19_vm1, %v202_v18 }
  0xaa   :  { %v250_v24 = vadd.f32 %v409_v20, %v230_v23 }
  0xab   :  { %262 = vst.msk [vmem:[%s508_s3 + $0x18] sm:$0xff] %vm19_vm1, %v246_v22 }
  0xac   :  { %266 = vst.msk [vmem:[%s508_s3 + $0x38] sm:$0xff] %vm19_vm1, %v250_v24 }
  0xad   :  { %v234_v25 = vld [vmem:[#allocation2 + $0x58] sm:$0xff] }
  0xae   :  { %v254_v26 = vadd.f32 %v409_v20, %v234_v25 }
  0xb0   :  { %270 = vst.msk [vmem:[%s508_s3 + $0x58] sm:$0xff] %vm19_vm1, %v254_v26  ;;  %v238_v27 = vld [vmem:[#allocation2 + $0x78] sm:$0xff] }
  0xb1   :  { %v258_v28 = vadd.f32 %v409_v20, %v238_v27 }
  0xb3   :  { %274 = vst.msk [vmem:[%s508_s3 + $0x78] sm:$0xff] %vm19_vm1, %v258_v28 }

// kernel: _lambda_.18
= control target key start
LH: loop header
LB: loop body
LE: loop exit
PB: predicated region body
PF: predicated region fallthrough
CT: control target
= control target key end

     0   :  { %vm15_vm0 = vcmask 123904   ;;  %v167_v0 = vmov 0.0   ;;  %vm65_vm1 = vcmask 130048   ;;  %vm157_vm2 = vcmask 1040384   ;;  %s322_s2 = inlined_call_operand.vmem [shape: f32[2,16], index: 2, kind: output, shape index: {}]   ;;  %s323_s0 = inlined_call_operand.vmem [shape: f32[128,16], index: 0, kind: input, shape index: {}]   ;;  %s324_s1 = inlined_call_operand.vmem [shape: f32[128,16], index: 1, kind: input, shape index: {}]  }
   0x1   :  { %16 = vst.msk [vmem:[%s322_s2] sm:$0x3] %vm15_vm0, %v167_v0  ;;  %v17_v1 = vld [vmem:[%s323_s0] sm:$0xff]  ;;  %v18_v2 = vld [vmem:[%s323_s0 + $0x8] sm:$0xff]  ;;  %v19_v3 = vld [vmem:[%s323_s0 + $0x10] sm:$0xff] }
   0x2   :  { %v33_v4 = vld [vmem:[%s324_s1] sm:$0xff]  ;;  %v34_v5 = vld [vmem:[%s324_s1 + $0x8] sm:$0xff]  ;;  %v20_v6 = vld [vmem:[%s323_s0 + $0x18] sm:$0xff] }
   0x3   :  { %v35_v7 = vld [vmem:[%s324_s1 + $0x10] sm:$0xff]  ;;  %v36_v8 = vld [vmem:[%s324_s1 + $0x18] sm:$0xff]  ;;  %v49_v9 = vadd.f32 %v33_v4, %v17_v1  ;;  %v50_v10 = vadd.f32 %v34_v5, %v18_v2  ;;  %v21_v11 = vld [vmem:[%s323_s0 + $0x20] sm:$0xff] }
   0x4   :  { %v37_v12 = vld [vmem:[%s324_s1 + $0x20] sm:$0xff]  ;;  %v51_v14 = vadd.f32 %v35_v7, %v19_v3  ;;  %v52_v15 = vadd.f32 %v36_v8, %v20_v6  ;;  %v22_v17 = vld [vmem:[%s323_s0 + $0x28] sm:$0xff]  ;;  %v23_v23 = vld [vmem:[%s323_s0 + $0x30] sm:$0xff] }
   0x5   :  { %v66_v13 = vsel %vm65_vm1, %v49_v9, 0.0  ;;  %v67_v16 = vsel %vm65_vm1, %v50_v10, 0.0  ;;  %v38_v18 = vld [vmem:[%s324_s1 + $0x28] sm:$0xff]  ;;  %v53_v20 = vadd.f32 %v37_v12, %v21_v11  ;;  %v39_v24 = vld [vmem:[%s324_s1 + $0x30] sm:$0xff]  ;;  %v24_v28 = vld [vmem:[%s323_s0 + $0x38] sm:$0xff]  ;;  %v103_v36 = vmul.f32 %v49_v9, %v49_v9 }
   0x6   :  { %v68_v19 = vadd.f32 %v67_v16, %v66_v13  ;;  %v69_v21 = vsel %vm65_vm1, %v51_v14, 0.0  ;;  %v71_v22 = vsel %vm65_vm1, %v52_v15, 0.0  ;;  %v54_v26 = vadd.f32 %v38_v18, %v22_v17  ;;  %v40_v29 = vld [vmem:[%s324_s1 + $0x38] sm:$0xff]  ;;  %v25_v33 = vld [vmem:[%s323_s0 + $0x40] sm:$0xff]  ;;  %v26_v41 = vld [vmem:[%s323_s0 + $0x48] sm:$0xff] }
   0x7   :  { %v73_v27 = vsel %vm65_vm1, %v53_v20, 0.0  ;;  %v55_v31 = vadd.f32 %v39_v24, %v23_v23  ;;  %v41_v34 = vld [vmem:[%s324_s1 + $0x40] sm:$0xff]  ;;  %v104_v37 = vmul.f32 %v50_v10, %v50_v10  ;;  %v105_v38 = vmul.f32 %v51_v14, %v51_v14  ;;  %v42_v42 = vld [vmem:[%s324_s1 + $0x48] sm:$0xff]  ;;  %v27_v48 = vld [vmem:[%s323_s0 + $0x50] sm:$0xff] }
   0x8   :  { %v70_v25 = vadd.f32 %v69_v21, %v68_v19  ;;  %v75_v32 = vsel %vm65_vm1, %v54_v26, 0.0  ;;  %v56_v39 = vadd.f32 %v40_v29, %v24_v28  ;;  %v106_v44 = vmul.f32 %v52_v15, %v52_v15  ;;  %v43_v49 = vld [vmem:[%s324_s1 + $0x50] sm:$0xff]  ;;  %v28_v57 = vld [vmem:[%s323_s0 + $0x58] sm:$0xff]  ;;  %v29_v1 = vld [vmem:[%s323_s0 + $0x60] sm:$0xff] }
   0x9   :  { %v77_v40 = vsel %vm65_vm1, %v55_v31, 0.0  ;;  %v57_v45 = vadd.f32 %v41_v34, %v25_v33  ;;  %v107_v47 = vmul.f32 %v53_v20, %v53_v20  ;;  %v119_v51 = vsel %vm65_vm1, %v103_v36, 0.0  ;;  %v44_v58 = vld [vmem:[%s324_s1 + $0x58] sm:$0xff]  ;;  %v45_v2 = vld [vmem:[%s324_s1 + $0x60] sm:$0xff]  ;;  %v30_v9 = vld [vmem:[%s323_s0 + $0x68] sm:$0xff] }
   0xa   :  { %v72_v30 = vadd.f32 %v71_v22, %v70_v25  ;;  %v79_v46 = vsel %vm65_vm1, %v56_v39, 0.0  ;;  %v120_v52 = vsel %vm65_vm1, %v104_v37, 0.0  ;;  %v122_v53 = vsel %vm65_vm1, %v105_v38, 0.0  ;;  %v46_v10 = vld [vmem:[%s324_s1 + $0x68] sm:$0xff]  ;;  %v31_v17 = vld [vmem:[%s323_s0 + $0x70] sm:$0xff]  ;;  %v32_v25 = vld [vmem:[%s323_s0 + $0x78] sm:$0xff] }
   0xb   :  { %v58_v54 = vadd.f32 %v42_v42, %v26_v41  ;;  %v81_v55 = vsel %vm65_vm1, %v57_v45, 0.0  ;;  %v121_v56 = vadd.f32 %v120_v52, %v119_v51  ;;  %v108_v60 = vmul.f32 %v54_v26, %v54_v26  ;;  %v47_v18 = vld [vmem:[%s324_s1 + $0x70] sm:$0xff]  ;;  %v48_v26 = vld [vmem:[%s324_s1 + $0x78] sm:$0xff] }
   0xc   :  { %v74_v35 = vadd.f32 %v73_v27, %v72_v30  ;;  %v124_v61 = vsel %vm65_vm1, %v106_v44, 0.0  ;;  %v59_v62 = vadd.f32 %v43_v49, %v27_v48  ;;  %v109_v4 = vmul.f32 %v55_v31, %v55_v31 }
   0xd   :  { %v83_v63 = vsel %vm65_vm1, %v58_v54, 0.0  ;;  %v123_v0 = vadd.f32 %v122_v53, %v121_v56  ;;  %v126_v5 = vsel %vm65_vm1, %v107_v47, 0.0  ;;  %v60_v6 = vadd.f32 %v44_v58, %v28_v57 }
   0xe   :  { %v76_v43 = vadd.f32 %v75_v32, %v74_v35  ;;  %v85_v7 = vsel %vm65_vm1, %v59_v62, 0.0  ;;  %v110_v12 = vmul.f32 %v56_v39, %v56_v39  ;;  %v128_v13 = vsel %vm65_vm1, %v108_v60, 0.0 }
   0xf   :  { %v125_v8 = vadd.f32 %v124_v61, %v123_v0  ;;  %v61_v14 = vadd.f32 %v45_v2, %v29_v1  ;;  %v87_v15 = vsel %vm65_vm1, %v60_v6, 0.0  ;;  %v111_v20 = vmul.f32 %v57_v45, %v57_v45 }
  0x10   :  { %v78_v50 = vadd.f32 %v77_v40, %v76_v43  ;;  %v130_v21 = vsel %vm65_vm1, %v109_v4, 0.0  ;;  %v62_v22 = vadd.f32 %v46_v10, %v30_v9  ;;  %v112_v28 = vmul.f32 %v58_v54, %v58_v54 }
  0x11   :  { %v127_v16 = vadd.f32 %v126_v5, %v125_v8  ;;  %v89_v23 = vsel %vm65_vm1, %v61_v14, 0.0  ;;  %v132_v29 = vsel %vm65_vm1, %v110_v12, 0.0  ;;  %v63_v30 = vadd.f32 %v47_v18, %v31_v17 }
  0x12   :  { %v80_v59 = vadd.f32 %v79_v46, %v78_v50  ;;  %v91_v31 = vsel %vm65_vm1, %v62_v22, 0.0  ;;  %v113_v34 = vmul.f32 %v59_v62, %v59_v62  ;;  %v134_v35 = vsel %vm65_vm1, %v111_v20, 0.0 }
  0x13   :  { %v129_v24 = vadd.f32 %v128_v13, %v127_v16  ;;  %v64_v36 = vadd.f32 %v48_v26, %v32_v25  ;;  %v93_v37 = vsel %vm65_vm1, %v63_v30, 0.0  ;;  %v114_v40 = vmul.f32 %v60_v6, %v60_v6 }
  0x14   :  { %v82_v3 = vadd.f32 %v81_v55, %v80_v59  ;;  %v136_v41 = vsel %vm65_vm1, %v112_v28, 0.0  ;;  %v115_v45 = vmul.f32 %v61_v14, %v61_v14  ;;  %v138_v46 = vsel %vm65_vm1, %v113_v34, 0.0 }
  0x15   :  { %v131_v32 = vadd.f32 %v130_v21, %v129_v24  ;;  %v95_v42 = vsel %vm65_vm1, %v64_v36, 0.0  ;;  %v116_v49 = vmul.f32 %v62_v22, %v62_v22  ;;  %v140_v50 = vsel %vm65_vm1, %v114_v40, 0.0 }
  0x16   :  { %v84_v11 = vadd.f32 %v83_v63, %v82_v3  ;;  %v117_v53 = vmul.f32 %v63_v30, %v63_v30  ;;  %v142_v54 = vsel %vm65_vm1, %v115_v45, 0.0  ;;  %v118_v56 = vmul.f32 %v64_v36, %v64_v36 }
  0x17   :  { %v133_v38 = vadd.f32 %v132_v29, %v131_v32  ;;  %v144_v57 = vsel %vm65_vm1, %v116_v49, 0.0 }
  0x18   :  { %v86_v19 = vadd.f32 %v85_v7, %v84_v11  ;;  %v146_v60 = vsel %vm65_vm1, %v117_v53, 0.0  ;;  %v148_v62 = vsel %vm65_vm1, %v118_v56, 0.0  ;;  %v156_v11 = vld [vmem:[%s322_s2] sm:$0x3] }
  0x19   :  { %v135_v43 = vadd.f32 %v134_v35, %v133_v38 }
  0x1a   :  { %v88_v27 = vadd.f32 %v87_v15, %v86_v19 }
  0x1b   :  { %v137_v47 = vadd.f32 %v136_v41, %v135_v43 }
  0x1c   :  { %v90_v33 = vadd.f32 %v89_v23, %v88_v27 }
  0x1d   :  { %v139_v51 = vadd.f32 %v138_v46, %v137_v47 }
  0x1e   :  { %v92_v39 = vadd.f32 %v91_v31, %v90_v33 }
  0x1f   :  { %v141_v55 = vadd.f32 %v140_v50, %v139_v51 }
  0x20   :  { %v94_v44 = vadd.f32 %v93_v37, %v92_v39 }
  0x21   :  { %v143_v59 = vadd.f32 %v142_v54, %v141_v55 }
  0x22   :  { %v96_v48 = vadd.f32 %v95_v42, %v94_v44 }
  0x23   :  { %v145_v61 = vadd.f32 %v144_v57, %v143_v59 }
  0x24   :  { %v97_v52 = vrot.slane %v96_v48, 4 }
  0x25   :  { %v147_v0 = vadd.f32 %v146_v60, %v145_v61 }
  0x26   :  { %v98_v58 = vadd.f32 %v97_v52, %v96_v48 }
  0x27   :  { %v149_v1 = vadd.f32 %v148_v62, %v147_v0 }
  0x28   :  { %v99_v63 = vrot.slane %v98_v58, 2 }
  0x29   :  { %v150_v3 = vrot.slane %v149_v1, 4 }
  0x2a   :  { %v100_v2 = vadd.f32 %v99_v63, %v98_v58 }
  0x2b   :  { %v151_v4 = vadd.f32 %v150_v3, %v149_v1 }
  0x2c   :  { %v101_v5 = vrot.slane %v100_v2, 1 }
  0x2d   :  { %v152_v6 = vrot.slane %v151_v4, 2 }
  0x2e   :  { %v102_v8 = vadd.f32 %v101_v5, %v100_v2 }
  0x2f   :  { %v153_v7 = vadd.f32 %v152_v6, %v151_v4 }
  0x31   :  { %v154_v9 = vrot.slane %v153_v7, 1 }
  0x33   :  { %v155_v10 = vadd.f32 %v154_v9, %v153_v7 }
  0x35   :  { %v158_v12 = vsel %vm157_vm2, %v102_v8, %v155_v10 }
  0x36   :  { %v159_v13 = vadd.f32 %v158_v12, %v156_v11 }
  0x38   :  { %161 = vst.msk [vmem:[%s322_s2] sm:$0x3] %vm15_vm0, %v159_v13 }

// kernel: _lambda_.17
= control target key start
LH: loop header
LB: loop body
LE: loop exit
PB: predicated region body
PF: predicated region fallthrough
CT: control target
= control target key end

     0   :  { %vm134_vm0 = vcmask 1041408   ;;  %vm19_vm1 = vcmask 130048   ;;  %v332_v1 = vmov 0.0   ;;  %vm109_vm2 = vcmask 31744   ;;  %s505_s1 = inlined_call_operand.vmem [shape: bf16[4,16], index: 1, kind: input, shape index: {}]   ;;  %s506_s0 = inlined_call_operand.vmem [shape: bf16[128,4], index: 0, kind: input, shape index: {}]   ;;  %s507_s2 = inlined_call_operand.vmem [shape: f32[1,16], index: 2, kind: input, shape index: {}]   ;;  %s508_s3 = inlined_call_operand.vmem [shape: f32[128,16], index: 3, kind: output, shape index: {}]  }
   0x1   :  { %v68_v0 = vld [vmem:[%s505_s1] sm:$0x3]  ;;  %20 = vst.msk [vmem:[#allocation2] sm:$0xff] %vm19_vm1, %v332_v1  ;;  %v321_v4 = vld [vmem:[%s506_s0 + $0x10] sm:$0xff]  ;;  %v320_v7 = vld [vmem:[%s506_s0 + $0x8] sm:$0xff] }
   0x2   :  { %v136_v2 = vsel %vm134_vm0, %v68_v0, 0  ;;  %v319_v3 = vld [vmem:[%s506_s0] sm:$0xff]  ;;  %21 = vst.msk [vmem:[#allocation2 + $0x8] sm:$0xff] %vm19_vm1, %v332_v1  ;;  %v325_v6 = vld [vmem:[%s506_s0 + $0x30] sm:$0xff]  ;;  %v322_v8 = vld [vmem:[%s506_s0 + $0x18] sm:$0xff] }
   0x3   :  { %145 = vmatpush.bf16.msra.mxu0 %v136_v2  ;;  %327 = vmatpush.bf16.msra.mxu1 %v136_v2  ;;  %v323_v5 = vld [vmem:[%s506_s0 + $0x20] sm:$0xff]  ;;  %22 = vst.msk [vmem:[#allocation2 + $0x10] sm:$0xff] %vm19_vm1, %v332_v1  ;;  %v324_v9 = vld [vmem:[%s506_s0 + $0x28] sm:$0xff]  ;;  %v326_v10 = vld [vmem:[%s506_s0 + $0x38] sm:$0xff] }
   0x4   :  { %328 = vmatpush.bf16.msra.mxu2 %v136_v2  ;;  %329 = vmatpush.bf16.msra.mxu3 %v136_v2  ;;  %23 = vst.msk [vmem:[#allocation2 + $0x18] sm:$0xff] %vm19_vm1, %v332_v1  ;;  %v409_v20 = vld [vmem:[%s507_s2] ss:$0 sm:$0xff] }
   0x5   :  { %24 = vst.msk [vmem:[#allocation2 + $0x20] sm:$0xff] %vm19_vm1, %v332_v1 }
   0x6   :  { %311 = vmatmul.msk.bf16.vlgmr.msra.gmra.mxu0 %vm109_vm2, %v319_v3  ;;  %313 = vmatmul.msk.bf16.vlgmr.msra.gmra.mxu1 %vm109_vm2, %v321_v4  ;;  %25 = vst.msk [vmem:[#allocation2 + $0x28] sm:$0xff] %vm19_vm1, %v332_v1 }
   0x7   :  { %315 = vmatmul.msk.bf16.vlgmr.msra.gmra.mxu2 %vm109_vm2, %v323_v5  ;;  %317 = vmatmul.msk.bf16.vlgmr.msra.gmra.mxu3 %vm109_vm2, %v325_v6  ;;  %26 = vst.msk [vmem:[#allocation2 + $0x30] sm:$0xff] %vm19_vm1, %v332_v1 }
   0x8   :  { %27 = vst.msk [vmem:[#allocation2 + $0x38] sm:$0xff] %vm19_vm1, %v332_v1  ;;  %v36_v11 = vld [vmem:[#allocation2] sm:$0xff] }
   0x9   :  { %28 = vst.msk [vmem:[#allocation2 + $0x40] sm:$0xff] %vm19_vm1, %v332_v1  ;;  %v37_v19 = vld [vmem:[#allocation2 + $0x8] sm:$0xff] }
   0xa   :  { %29 = vst.msk [vmem:[#allocation2 + $0x48] sm:$0xff] %vm19_vm1, %v332_v1  ;;  %v38_v40 = vld [vmem:[#allocation2 + $0x10] sm:$0xff] }
   0xb   :  { %30 = vst.msk [vmem:[#allocation2 + $0x50] sm:$0xff] %vm19_vm1, %v332_v1  ;;  %v39_v58 = vld [vmem:[#allocation2 + $0x18] sm:$0xff] }
   0xc   :  { %31 = vst.msk [vmem:[#allocation2 + $0x58] sm:$0xff] %vm19_vm1, %v332_v1  ;;  %v40_v12 = vld [vmem:[#allocation2 + $0x20] sm:$0xff] }
   0xd   :  { %32 = vst.msk [vmem:[#allocation2 + $0x60] sm:$0xff] %vm19_vm1, %v332_v1  ;;  %v41_v26 = vld [vmem:[#allocation2 + $0x28] sm:$0xff] }
   0xe   :  { %33 = vst.msk [vmem:[#allocation2 + $0x68] sm:$0xff] %vm19_vm1, %v332_v1  ;;  %v42_v44 = vld [vmem:[#allocation2 + $0x30] sm:$0xff] }
   0xf   :  { %34 = vst.msk [vmem:[#allocation2 + $0x70] sm:$0xff] %vm19_vm1, %v332_v1  ;;  %v43_v62 = vld [vmem:[#allocation2 + $0x38] sm:$0xff] }
  0x10   :  { %35 = vst.msk [vmem:[#allocation2 + $0x78] sm:$0xff] %vm19_vm1, %v332_v1  ;;  %v44_v17 = vld [vmem:[#allocation2 + $0x40] sm:$0xff] }
  0x11   :  { %v45_v34 = vld [vmem:[#allocation2 + $0x48] sm:$0xff] }
  0x12   :  { %v46_v52 = vld [vmem:[#allocation2 + $0x50] sm:$0xff] }
  0x13   :  { %v47_v6 = vld [vmem:[#allocation2 + $0x58] sm:$0xff] }
  0x14   :  { %v48_v18 = vld [vmem:[#allocation2 + $0x60] sm:$0xff] }
  0x15   :  { %v49_v35 = vld [vmem:[#allocation2 + $0x68] sm:$0xff] }
  0x16   :  { %312 = vmatmul.msk.bf16.gmra.mxu0 %vm109_vm2, %v320_v7  ;;  %314 = vmatmul.msk.bf16.gmra.mxu1 %vm109_vm2, %v322_v8  ;;  %v50_v53 = vld [vmem:[#allocation2 + $0x70] sm:$0xff] }
  0x17   :  { %316 = vmatmul.msk.bf16.gmra.mxu2 %vm109_vm2, %v324_v9  ;;  %318 = vmatmul.msk.bf16.gmra.mxu3 %vm109_vm2, %v326_v10 }
  0x83   :  { %v147_v13 = vpop.f32.mrf.mxu0  ;;  %v157_v14 = vpop.f32.mrf.mxu1 }
  0x84   :  { %v187_v15 = vadd.f32 %v147_v13, %v36_v11  ;;  %v191_v16 = vadd.f32 %v157_v14, %v40_v12  ;;  %v51_v11 = vld [vmem:[#allocation2 + $0x78] sm:$0xff] }
  0x86   :  { %204 = vst.msk [vmem:[#allocation2] sm:$0xff] %vm19_vm1, %v187_v15 }
  0x87   :  { %208 = vst.msk [vmem:[#allocation2 + $0x20] sm:$0xff] %vm19_vm1, %v191_v16 }
  0x8a   :  { %v167_v21 = vpop.f32.mrf.mxu2  ;;  %v177_v22 = vpop.f32.mrf.mxu3 }
  0x8b   :  { %v195_v23 = vadd.f32 %v167_v21, %v44_v17  ;;  %v199_v24 = vadd.f32 %v177_v22, %v48_v18  ;;  %v149_v25 = vpop.f32.mrf.mxu0  ;;  %v159_v27 = vpop.f32.mrf.mxu1 }
  0x8c   :  { %v188_v28 = vadd.f32 %v149_v25, %v37_v19  ;;  %v192_v32 = vadd.f32 %v159_v27, %v41_v26 }
  0x8d   :  { %v223_v29 = vld [vmem:[#allocation2] sm:$0xff]  ;;  %212 = vst.msk [vmem:[#allocation2 + $0x40] sm:$0xff] %vm19_vm1, %v195_v23 }
  0x8e   :  { %v243_v30 = vadd.f32 %v409_v20, %v223_v29  ;;  %v227_v31 = vld [vmem:[#allocation2 + $0x20] sm:$0xff]  ;;  %216 = vst.msk [vmem:[#allocation2 + $0x60] sm:$0xff] %vm19_vm1, %v199_v24 }
  0x8f   :  { %v247_v33 = vadd.f32 %v409_v20, %v227_v31  ;;  %205 = vst.msk [vmem:[#allocation2 + $0x8] sm:$0xff] %vm19_vm1, %v188_v28 }
  0x90   :  { %259 = vst.msk [vmem:[%s508_s3] sm:$0xff] %vm19_vm1, %v243_v30 }
  0x91   :  { %263 = vst.msk [vmem:[%s508_s3 + $0x20] sm:$0xff] %vm19_vm1, %v247_v33 }
  0x92   :  { %209 = vst.msk [vmem:[#allocation2 + $0x28] sm:$0xff] %vm19_vm1, %v192_v32  ;;  %v169_v36 = vpop.f32.mrf.mxu2  ;;  %v179_v37 = vpop.f32.mrf.mxu3 }
  0x93   :  { %v196_v38 = vadd.f32 %v169_v36, %v45_v34  ;;  %v200_v39 = vadd.f32 %v179_v37, %v49_v35  ;;  %v152_v41 = vpop.f32.mrf.mxu0  ;;  %v162_v42 = vpop.f32.mrf.mxu1 }
  0x94   :  { %v231_v43 = vld [vmem:[#allocation2 + $0x40] sm:$0xff]  ;;  %v189_v49 = vadd.f32 %v152_v41, %v38_v40  ;;  %v193_v51 = vadd.f32 %v162_v42, %v42_v44 }
  0x95   :  { %v251_v45 = vadd.f32 %v409_v20, %v231_v43  ;;  %v235_v46 = vld [vmem:[#allocation2 + $0x60] sm:$0xff]  ;;  %213 = vst.msk [vmem:[#allocation2 + $0x48] sm:$0xff] %vm19_vm1, %v196_v38 }
  0x96   :  { %v255_v47 = vadd.f32 %v409_v20, %v235_v46  ;;  %v224_v48 = vld [vmem:[#allocation2 + $0x8] sm:$0xff]  ;;  %217 = vst.msk [vmem:[#allocation2 + $0x68] sm:$0xff] %vm19_vm1, %v200_v39 }
  0x97   :  { %267 = vst.msk [vmem:[%s508_s3 + $0x40] sm:$0xff] %vm19_vm1, %v251_v45  ;;  %v244_v50 = vadd.f32 %v409_v20, %v224_v48 }
  0x98   :  { %271 = vst.msk [vmem:[%s508_s3 + $0x60] sm:$0xff] %vm19_vm1, %v255_v47 }
  0x99   :  { %260 = vst.msk [vmem:[%s508_s3 + $0x8] sm:$0xff] %vm19_vm1, %v244_v50  ;;  %v228_v54 = vld [vmem:[#allocation2 + $0x28] sm:$0xff] }
  0x9a   :  { %v248_v55 = vadd.f32 %v409_v20, %v228_v54  ;;  %206 = vst.msk [vmem:[#allocation2 + $0x10] sm:$0xff] %vm19_vm1, %v189_v49  ;;  %v172_v56 = vpop.f32.mrf.mxu2  ;;  %v182_v57 = vpop.f32.mrf.mxu3 }
  0x9b   :  { %210 = vst.msk [vmem:[#allocation2 + $0x30] sm:$0xff] %vm19_vm1, %v193_v51  ;;  %v197_v59 = vadd.f32 %v172_v56, %v46_v52  ;;  %v201_v60 = vadd.f32 %v182_v57, %v50_v53  ;;  %v154_v61 = vpop.f32.mrf.mxu0  ;;  %v164_v63 = vpop.f32.mrf.mxu1 }
  0x9c   :  { %264 = vst.msk [vmem:[%s508_s3 + $0x28] sm:$0xff] %vm19_vm1, %v248_v55  ;;  %v232_v0 = vld [vmem:[#allocation2 + $0x48] sm:$0xff]  ;;  %v190_v3 = vadd.f32 %v154_v61, %v39_v58  ;;  %v194_v5 = vadd.f32 %v164_v63, %v43_v62 }
  0x9d   :  { %v252_v1 = vadd.f32 %v409_v20, %v232_v0  ;;  %v236_v2 = vld [vmem:[#allocation2 + $0x68] sm:$0xff]  ;;  %214 = vst.msk [vmem:[#allocation2 + $0x50] sm:$0xff] %vm19_vm1, %v197_v59 }
  0x9e   :  { %v256_v4 = vadd.f32 %v409_v20, %v236_v2  ;;  %218 = vst.msk [vmem:[#allocation2 + $0x70] sm:$0xff] %vm19_vm1, %v201_v60 }
  0x9f   :  { %268 = vst.msk [vmem:[%s508_s3 + $0x48] sm:$0xff] %vm19_vm1, %v252_v1 }
  0xa0   :  { %272 = vst.msk [vmem:[%s508_s3 + $0x68] sm:$0xff] %vm19_vm1, %v256_v4 }
  0xa1   :  { %v225_v7 = vld [vmem:[#allocation2 + $0x10] sm:$0xff]  ;;  %207 = vst.msk [vmem:[#allocation2 + $0x18] sm:$0xff] %vm19_vm1, %v190_v3 }
  0xa2   :  { %v245_v8 = vadd.f32 %v409_v20, %v225_v7  ;;  %v229_v9 = vld [vmem:[#allocation2 + $0x30] sm:$0xff]  ;;  %211 = vst.msk [vmem:[#allocation2 + $0x38] sm:$0xff] %vm19_vm1, %v194_v5  ;;  %v174_v10 = vpop.f32.mrf.mxu2  ;;  %v184_v12 = vpop.f32.mrf.mxu3 }
  0xa3   :  { %v249_v13 = vadd.f32 %v409_v20, %v229_v9  ;;  %v198_v14 = vadd.f32 %v174_v10, %v47_v6  ;;  %v202_v18 = vadd.f32 %v184_v12, %v51_v11 }
  0xa4   :  { %261 = vst.msk [vmem:[%s508_s3 + $0x10] sm:$0xff] %vm19_vm1, %v245_v8  ;;  %v233_v15 = vld [vmem:[#allocation2 + $0x50] sm:$0xff] }
  0xa5   :  { %265 = vst.msk [vmem:[%s508_s3 + $0x30] sm:$0xff] %vm19_vm1, %v249_v13  ;;  %v253_v16 = vadd.f32 %v409_v20, %v233_v15  ;;  %v237_v17 = vld [vmem:[#allocation2 + $0x70] sm:$0xff] }
  0xa6   :  { %v257_v19 = vadd.f32 %v409_v20, %v237_v17  ;;  %215 = vst.msk [vmem:[#allocation2 + $0x58] sm:$0xff] %vm19_vm1, %v198_v14 }
  0xa7   :  { %269 = vst.msk [vmem:[%s508_s3 + $0x50] sm:$0xff] %vm19_vm1, %v253_v16 }
  0xa8   :  { %273 = vst.msk [vmem:[%s508_s3 + $0x70] sm:$0xff] %vm19_vm1, %v257_v19  ;;  %v226_v21 = vld [vmem:[#allocation2 + $0x18] sm:$0xff] }
  0xa9   :  { %v246_v22 = vadd.f32 %v409_v20, %v226_v21  ;;  %v230_v23 = vld [vmem:[#allocation2 + $0x38] sm:$0xff]  ;;  %219 = vst.msk [vmem:[#allocation2 + $0x78] sm:$0xff] %vm19_vm1, %v202_v18 }
  0xaa   :  { %v250_v24 = vadd.f32 %v409_v20, %v230_v23 }
  0xab   :  { %262 = vst.msk [vmem:[%s508_s3 + $0x18] sm:$0xff] %vm19_vm1, %v246_v22 }
  0xac   :  { %266 = vst.msk [vmem:[%s508_s3 + $0x38] sm:$0xff] %vm19_vm1, %v250_v24 }
  0xad   :  { %v234_v25 = vld [vmem:[#allocation2 + $0x58] sm:$0xff] }
  0xae   :  { %v254_v26 = vadd.f32 %v409_v20, %v234_v25 }
  0xb0   :  { %270 = vst.msk [vmem:[%s508_s3 + $0x58] sm:$0xff] %vm19_vm1, %v254_v26  ;;  %v238_v27 = vld [vmem:[#allocation2 + $0x78] sm:$0xff] }
  0xb1   :  { %v258_v28 = vadd.f32 %v409_v20, %v238_v27 }
  0xb3   :  { %274 = vst.msk [vmem:[%s508_s3 + $0x78] sm:$0xff] %vm19_vm1, %v258_v28 }

// kernel: _lambda_.13
= control target key start
LH: loop header
LB: loop body
LE: loop exit
PB: predicated region body
PF: predicated region fallthrough
CT: control target
= control target key end

     0   :  { %s1670_s12 = smov 0   ;;  %s2119_s0 = inlined_call_operand.vmem [shape: bf16[2,10,10,8], index: 0, kind: input, shape index: {}]   ;;  %s2120_s1 = inlined_call_operand.vmem [shape: bf16[9,8,8], index: 1, kind: input, shape index: {}]   ;;  %s2121_s2 = inlined_call_operand.vmem [shape: f32[1,8], index: 2, kind: input, shape index: {}]   ;;  %s2122_s3 = inlined_call_operand.vmem [shape: f32[2,8,8,8], index: 3, kind: output, shape index: {}]  }
   0x1 LB: > { %s1426_s13 = sadd.s32 4294967295, %s1648_s12   ;;  %p1430_p0 = scmp.ge.s32.totalorder %s1648_s12, 1  ;;  %s1648_s12 = sphi %s1670_s12, %s13_s12  }
   0x2   : > { %p137_p1 = scmp.lt.s32.totalorder %s1648_s12, 3 }
   0x4   : > { %p138_p2 = pnand %p1430_p0, %p137_p1 }
   0x5   : > { %p161_p3 = scmp.lt.s32.totalorder (!%p138_p2), %s1426_s13, 1 }
   0x6   : > { %141 = sbr.rel (%p138_p2) target bundleno = 315 (0x13b), region = 32 }
   0xb   : > { %v1434_v0 = vld [vmem:[%s2120_s1 + $0x4] sm:$0xf]  ;;  %vm331_vm0 = vcmask 1043456   ;;  %v1467_v2 = vld [vmem:[%s2120_s1 + $0x8] sm:$0xf]  ;;  %s2128_s13 = smov (!%p161_p3, %s1426_s13), 1 }
   0xc   : > { %v333_v1 = vsel %vm331_vm0, %v1434_v0, 0  ;;  %v514_v3 = vsel %vm331_vm0, %v1467_v2, 0  ;;  %s1632_s18 = smul.u32 80, %s2128_s13  ;;  %v1480_v4 = vld [vmem:[%s2120_s1 + $0xc] sm:$0xf]  ;;  %vm318_vm3 = vcmask 64512  }
   0xd   : > { %1629 = vmatpush.bf16.msra.mxu1 %v333_v1  ;;  %1630 = vmatpush.bf16.msra.mxu2 %v333_v1  ;;  %v180_v5 = vld [vmem:[%s2120_s1] sm:$0xf]  ;;  %v597_v6 = vsel %vm331_vm0, %v1480_v4, 0  ;;  %v1517_v8 = vld [vmem:[%s2120_s1 + $0x10] sm:$0xf]  ;;  %vm452_vm5 = vcmask 1042432  }
   0xe   : > { %1631 = vmatpush.bf16.msra.mxu3 %v333_v1  ;;  %342 = vmatpush.bf16.msra.mxu0 %v333_v1  ;;  %v397_v7 = vsel %vm331_vm0, %v180_v5, 0  ;;  %s1703_s27 = scalar_lea.vmem %s2119_s0, %s1632_s18  ;;  %vm189_vm1 = vsmask.f32 3328  ;;  %vm190_vm2 = vsmask.f32 7440  ;;  %v791_v9 = vsel %vm331_vm0, %v1517_v8, 0 }
   0xf   : > { %v174_v10 = vld [vmem:[%s1703_s27 + $0x10] sm:$0xf]  ;;  %v175_v11 = vld [vmem:[%s1703_s27 + $0x18] sm:$0xf]  ;;  %v1709_v12 = vld [vmem:[%s1703_s27 + $0x14] sm:$0x1] }
  0x10   : > { %v1712_v13 = vld [vmem:[%s1703_s27 + $0x1c] sm:$0x1]  ;;  %v221_v14 = vshrl.u32 %v174_v10, 16  ;;  %v224_v15 = vshll.u32 %v174_v10, 16  ;;  %v230_v16 = vshll.u32 %v1709_v12, 16  ;;  %v235_v17 = vshrl.u32 %v175_v11, 16  ;;  %vm1728_vm4 = vmor %vm189_vm1, %vm190_vm2 }
  0x11   : > { %523 = vmatpush.bf16.msrb.mxu2 %v514_v3  ;;  %406 = vmatpush.bf16.msrb.mxu1 %v397_v7  ;;  %v238_v18 = vshll.u32 %v175_v11, 16  ;;  %v244_v19 = vshll.u32 %v1712_v13, 16  ;;  %v176_v20 = vld [vmem:[%s1703_s27 + $0x20] sm:$0xf]  ;;  %v177_v21 = vld [vmem:[%s1703_s27 + $0x28] sm:$0xf] }
  0x12   : > { %606 = vmatpush.bf16.msrb.mxu3 %v597_v6  ;;  %800 = vmatpush.bf16.msrb.mxu0 %v791_v9  ;;  %v223_v22 = vrot.slane %v221_v14, 4  ;;  %v226_v23 = vrot.slane %v224_v15, 5  ;;  %v232_v24 = vrot.slane %v230_v16, 5  ;;  %v237_v25 = vrot.slane %v235_v17, 4  ;;  %v1719_v26 = vld [vmem:[%s1703_s27 + $0x24] sm:$0x1] }
  0x13   : > { %v240_v27 = vrot.slane %v238_v18, 5  ;;  %v246_v28 = vrot.slane %v244_v19, 5  ;;  %v1722_v29 = vld [vmem:[%s1703_s27 + $0x2c] sm:$0x1]  ;;  %v249_v30 = vshrl.u32 %v176_v20, 16  ;;  %v252_v31 = vshll.u32 %v176_v20, 16 }
  0x14   : > { %v227_v32 = vor.u32 %v226_v23, %v223_v22  ;;  %v258_v33 = vshll.u32 %v1719_v26, 16  ;;  %v263_v34 = vshrl.u32 %v177_v21, 16  ;;  %v266_v35 = vshll.u32 %v177_v21, 16  ;;  %v178_v36 = vld [vmem:[%s1703_s27 + $0x30] sm:$0xf]  ;;  %s1616_s9 = sshll.u32 %s2128_s13, 6 }
  0x15   : > { %v241_v38 = vor.u32 %v240_v27, %v237_v25  ;;  %v251_v39 = vrot.slane %v249_v30, 4  ;;  %v254_v40 = vrot.slane %v252_v31, 5  ;;  %v272_v41 = vshll.u32 %v1722_v29, 16  ;;  %v1734_v46 = vld [vmem:[%s1703_s27 + $0x34] sm:$0x1]  ;;  %s2070_s16 = scalar_lea.vmem %s2122_s3, %s1616_s9 }
  0x16   : > { %v228_v42 = vrot.slane %v227_v32, 4  ;;  %v260_v43 = vrot.slane %v258_v33, 5  ;;  %v265_v44 = vrot.slane %v263_v34, 4  ;;  %v268_v45 = vrot.slane %v266_v35, 5  ;;  %v179_v53 = vld [vmem:[%s1703_s27 + $0x38] sm:$0xf] }
  0x17   : > { %v242_v47 = vrot.slane %v241_v38, 4  ;;  %v255_v48 = vor.u32 %v254_v40, %v251_v39  ;;  %v274_v49 = vrot.slane %v272_v41, 5  ;;  %v277_v50 = vshrl.u32 %v178_v36, 16  ;;  %v1740_v54 = vld [vmem:[%s1703_s27 + $0x3c] sm:$0x1] }
  0x18   : > { %vm453_vm6 = vcmask 1046532   ;;  %v233_v51 = vsel %vm1728_vm4, %v228_v42, %v232_v24  ;;  %v269_v52 = vor.u32 %v268_v45, %v265_v44  ;;  %v280_v55 = vshll.u32 %v178_v36, 16  ;;  %v172_v1 = vld [vmem:[%s1703_s27] sm:$0xf]  ;;  %v181_v6 = vld [vmem:[%s1703_s27 + $0x4] sm:$0x1] }
  0x19   : > { %v286_v56 = vshll.u32 %v1734_v46, 16  ;;  %v247_v57 = vsel %vm1728_vm4, %v242_v47, %v246_v28  ;;  %v308_v58 = vunpack.c.l.b16 %v233_v51  ;;  %v256_v59 = vrot.slane %v255_v48, 4  ;;  %v173_v11 = vld [vmem:[%s1703_s27 + $0x8] sm:$0xf]  ;;  %v182_v24 = vld [vmem:[%s1703_s27 + $0xc] sm:$0x1]  ;;  %vm1762_vm7 = vmor %vm452_vm5, %vm453_vm6 }
  0x1a   : > { %v279_v60 = vrot.slane %v277_v50, 4  ;;  %v309_v61 = vunpack.c.l.b16 %v247_v57  ;;  %v270_v62 = vrot.slane %v269_v52, 4  ;;  %v282_v63 = vrot.slane %v280_v55, 5  ;;  %v428_v33 = vld [vmem:[%s1703_s27] sm:$0xe] }
  0x1b   : > { %v288_v0 = vrot.slane %v286_v56, 5  ;;  %v261_v2 = vsel %vm1728_vm4, %v256_v59, %v260_v43  ;;  %v291_v3 = vshrl.u32 %v179_v53, 16  ;;  %v294_v4 = vshll.u32 %v179_v53, 16  ;;  %v429_v39 = vld [vmem:[%s1703_s27 + $0x8] sm:$0xe] }
  0x1c   : > { %v300_v5 = vshll.u32 %v1740_v54, 16  ;;  %v315_v7 = vpack.c.b16 %v309_v61, %v308_v58  ;;  %v275_v8 = vsel %vm1728_vm4, %v270_v62, %v274_v49  ;;  %v310_v9 = vunpack.c.l.b16 %v261_v2  ;;  %v1551_v45 = vld [vmem:[%s2120_s1 + $0x18] sm:$0xf]  ;;  %v1501_v55 = vld [vmem:[%s1703_s27 + $0x8] sm:$0xf] }
  0x1d   : > { %v283_v10 = vor.u32 %v282_v63, %v279_v60  ;;  %v311_v14 = vunpack.c.l.b16 %v275_v8  ;;  %v293_v15 = vrot.slane %v291_v3, 4  ;;  %v296_v16 = vrot.slane %v294_v4, 5  ;;  %v1503_v59 = vld [vmem:[%s1703_s27 + $0x10] sm:$0xf]  ;;  %v1781_v63 = vld [vmem:[%s1703_s27 + $0xc] sm:$0x1] }
  0x1e   : > { %v302_v17 = vrot.slane %v300_v5, 5  ;;  %1436 = vmatmul.msk.bf16.vlgmr.msra.gmra.mxu1 %vm318_vm3, %v315_v7  ;;  %v193_v19 = vshrl.u32 %v172_v1, 16  ;;  %v196_v20 = vshll.u32 %v172_v1, 16  ;;  %v202_v21 = vshll.u32 %v181_v6, 16  ;;  %v1441_v3 = vld [vmem:[%s1703_s27] sm:$0xf] }
  0x1f   : > { %v284_v18 = vrot.slane %v283_v10, 4  ;;  %v316_v22 = vpack.c.b16 %v311_v14, %v310_v9  ;;  %v297_v23 = vor.u32 %v296_v16, %v293_v15  ;;  %v207_v25 = vshrl.u32 %v173_v11, 16  ;;  %v1617_v4 = vld [vmem:[%s1703_s27 + $0x4] sm:$0xf0]  ;;  %v1538_v14 = vld [vmem:[%s2120_s1 + $0x14] sm:$0xf] }
  0x20   : > { %v210_v27 = vshll.u32 %v173_v11, 16  ;;  %v195_v30 = vrot.slane %v193_v19, 4  ;;  %v198_v31 = vrot.slane %v196_v20, 5  ;;  %v204_v32 = vrot.slane %v202_v21, 5  ;;  %v1588_v11 = vld [vmem:[%s2120_s1 + $0x1c] sm:$0xf] }
  0x21   : > { %v289_v28 = vsel %vm1728_vm4, %v284_v18, %v288_v0  ;;  %1437 = vmatmul.msk.bf16.vlgmr.msra.gmra.mxu2 %vm318_vm3, %v316_v22  ;;  %v298_v34 = vrot.slane %v297_v23, 4  ;;  %v209_v36 = vrot.slane %v207_v25, 4  ;;  %v216_v41 = vshll.u32 %v182_v24, 16  ;;  %v1784_v0 = vld [vmem:[%s1703_s27 + $0x14] sm:$0x1] }
  0x22   : > { %v312_v35 = vunpack.c.l.b16 %v289_v28  ;;  %v212_v38 = vrot.slane %v210_v27, 5  ;;  %v199_v40 = vor.u32 %v198_v31, %v195_v30  ;;  %v457_v42 = vrot.slane %v181_v6, 5  ;;  %v1609_v19 = vld [vmem:[%s2120_s1 + $0x20] sm:$0xf] }
  0x23   : > { %v461_v43 = vrot.slane %v182_v24, 5  ;;  %v303_v47 = vsel %vm1728_vm4, %v298_v34, %v302_v17  ;;  %v1459_v49 = vrot.slane %v428_v33, 9  ;;  %v218_v52 = vrot.slane %v216_v41, 5  ;;  %v1507_v41 = vld [vmem:[%s1703_s27 + $0x20] sm:$0xf] }
  0x24   : > { %v213_v48 = vor.u32 %v212_v38, %v209_v36  ;;  %v313_v50 = vunpack.c.l.b16 %v303_v47  ;;  %v200_v51 = vrot.slane %v199_v40, 4  ;;  %v1460_v53 = vrot.slane %v429_v39, 9  ;;  %v1505_v38 = vld [vmem:[%s1703_s27 + $0x18] sm:$0xf]  ;;  %v1621_v47 = vld [vmem:[%s1703_s27 + $0xc] sm:$0xf0] }
  0x25   : > { %v458_v57 = vsel %vm1762_vm7, %v1459_v49, %v457_v42  ;;  %v996_v58 = vsel %vm331_vm0, %v1551_v45, 0  ;;  %v653_v6 = vshrl.u32 %v1501_v55, 16  ;;  %v656_v9 = vshll.u32 %v1501_v55, 16  ;;  %v431_v40 = vld [vmem:[%s1703_s27 + $0x18] sm:$0xe] }
  0x26   : > { %v214_v56 = vrot.slane %v213_v48, 4  ;;  %v317_v60 = vpack.c.b16 %v313_v50, %v312_v35  ;;  %v205_v61 = vsel %vm1728_vm4, %v200_v51, %v204_v32  ;;  %v462_v62 = vsel %vm1762_vm7, %v1460_v53, %v461_v43  ;;  %1005 = vmatpush.bf16.msra.mxu2 %v996_v58  ;;  %v430_v35 = vld [vmem:[%s1703_s27 + $0x10] sm:$0xe]  ;;  %v1483_v45 = vld [vmem:[%s1703_s27 + $0x8] sm:$0xf] }
  0x27   : > { %v306_v2 = vunpack.c.l.b16 %v205_v61  ;;  %v489_v5 = vunpack.c.l.b16 %v458_v57  ;;  %v490_v8 = vunpack.c.l.b16 %v462_v62  ;;  %v667_v10 = vshrl.u32 %v1503_v59, 16 }
  0x28   : > { %v219_v1 = vsel %vm1728_vm4, %v214_v56, %v218_v52  ;;  %1438 = vmatmul.msk.bf16.vlgmr.msra.gmra.mxu3 %vm318_vm3, %v317_v60  ;;  %v655_v15 = vrot.slane %v653_v6, 4  ;;  %v662_v16 = vshll.u32 %v1781_v63, 16  ;;  %v670_v17 = vshll.u32 %v1503_v59, 16  ;;  %v1823_v60 = vld [vmem:[%s1703_s27 + $0x1c] sm:$0x1] }
  0x29   : > { %v307_v7 = vunpack.c.l.b16 %v219_v1  ;;  %v676_v18 = vshll.u32 %v1784_v0, 16  ;;  %v1442_v21 = vor.u32 %v1617_v4, %v1441_v3  ;;  %v658_v22 = vrot.slane %v656_v9, 5  ;;  %v1828_v4 = vld [vmem:[%s1703_s27 + $0x24] sm:$0x1] }
  0x2a   : > { %v669_v23 = vrot.slane %v667_v10, 4  ;;  %v672_v24 = vrot.slane %v670_v17, 5  ;;  %v1190_v27 = vsel %vm331_vm0, %v1588_v11, 0  ;;  %v913_v28 = vsel %vm331_vm0, %v1538_v14, 0  ;;  %v1509_v17 = vld [vmem:[%s1703_s27 + $0x28] sm:$0xf] }
  0x2b   : > { %v314_v20 = vpack.c.b16 %v307_v7, %v306_v2  ;;  %v659_v25 = vor.u32 %v658_v22, %v655_v15  ;;  %v1312_v30 = vsel %vm331_vm0, %v1609_v19, 0  ;;  %v497_v31 = vpack.c.b16 %v490_v8, %v489_v5  ;;  %1199 = vmatpush.bf16.msra.mxu3 %v1190_v27  ;;  %922 = vmatpush.bf16.msra.mxu1 %v913_v28  ;;  %v1618_v5 = vld [vmem:[%s1703_s27 + $0x14] sm:$0xf0]  ;;  %v1511_v22 = vld [vmem:[%s1703_s27 + $0x30] sm:$0xf] }
  0x2c   : > { %v664_v32 = vrot.slane %v662_v16, 5  ;;  %v673_v33 = vor.u32 %v672_v24, %v669_v23  ;;  %v678_v34 = vrot.slane %v676_v18, 5  ;;  %v1461_v42 = vrot.slane %v430_v35, 9  ;;  %v432_v23 = vld [vmem:[%s1703_s27 + $0x20] sm:$0xe] }
  0x2d   : > { %1435 = vmatmul.msk.bf16.vlgmr.msra.gmra.mxu0 %vm318_vm3, %v314_v20  ;;  %v660_v36 = vrot.slane %v659_v25, 4  ;;  %v465_v43 = vrot.slane %v1709_v12, 5  ;;  %v681_v50 = vshrl.u32 %v1505_v38, 16  ;;  %v684_v51 = vshll.u32 %v1505_v38, 16  ;;  %v433_v24 = vld [vmem:[%s1703_s27 + $0x28] sm:$0xe] }
  0x2e   : > { %1455 = vmatmul.msk.bf16.vlgmr.msrb.gmra.mxu1 %vm318_vm3, %v1442_v21  ;;  %1321 = vmatpush.bf16.msra.mxu0 %v1312_v30  ;;  %v674_v39 = vrot.slane %v673_v33, 4  ;;  %v1462_v52 = vrot.slane %v431_v40, 9  ;;  %v469_v53 = vrot.slane %v1712_v13, 5  ;;  %v695_v12 = vshrl.u32 %v1507_v41, 16  ;;  %v1445_v13 = vld [vmem:[%s1703_s27 + $0x10] sm:$0xf] }
  0x2f   : > { %v665_v48 = vsel %vm1728_vm4, %v660_v36, %v664_v32  ;;  %v698_v55 = vshll.u32 %v1507_v41, 16  ;;  %v1484_v56 = vor.u32 %v1621_v47, %v1483_v45  ;;  %v466_v59 = vsel %vm1762_vm7, %v1461_v42, %v465_v43  ;;  %v1487_v28 = vld [vmem:[%s1703_s27 + $0x18] sm:$0xf]  ;;  %v1622_v30 = vld [vmem:[%s1703_s27 + $0x1c] sm:$0xf0] }
  0x30   : > { %v679_v49 = vsel %vm1728_vm4, %v674_v39, %v678_v34  ;;  %v766_v57 = vunpack.c.l.b16 %v665_v48  ;;  %v683_v61 = vrot.slane %v681_v50, 4  ;;  %v686_v62 = vrot.slane %v684_v51, 5  ;;  %v1851_v47 = vld [vmem:[%s1703_s27 + $0x2c] sm:$0x1] }
  0x31   : > { %1468 = vmatmul.msk.bf16.vlgmr.msrb.gmra.mxu2 %vm318_vm3, %v497_v31  ;;  %v767_v58 = vunpack.c.l.b16 %v679_v49  ;;  %v697_v1 = vrot.slane %v695_v12, 4  ;;  %v700_v2 = vrot.slane %v698_v55, 5  ;;  %v470_v3 = vsel %vm1762_vm7, %v1462_v52, %v469_v53  ;;  %v1449_v52 = vld [vmem:[%s1703_s27 + $0x20] sm:$0xf] }
  0x32   : > { %v491_v7 = vunpack.c.l.b16 %v466_v59  ;;  %v690_v8 = vshll.u32 %v1823_v60, 16  ;;  %v492_v9 = vunpack.c.l.b16 %v470_v3  ;;  %v687_v10 = vor.u32 %v686_v62, %v683_v61 }
  0x33   : > { %v774_v6 = vpack.c.b16 %v767_v58, %v766_v57  ;;  %v701_v11 = vor.u32 %v700_v2, %v697_v1  ;;  %v704_v14 = vshll.u32 %v1828_v4, 16  ;;  %v1446_v15 = vor.u32 %v1618_v5, %v1445_v13  ;;  %v434_v2 = vld [vmem:[%s1703_s27 + $0x30] sm:$0xe] }
  0x34   : > { %v692_v16 = vrot.slane %v690_v8, 5  ;;  %v498_v18 = vpack.c.b16 %v492_v9, %v491_v7  ;;  %v688_v19 = vrot.slane %v687_v10, 4  ;;  %v709_v25 = vshrl.u32 %v1509_v17, 16  ;;  %v1513_v7 = vld [vmem:[%s1703_s27 + $0x38] sm:$0xf] }
  0x35   : > { %v702_v20 = vrot.slane %v701_v11, 4  ;;  %v706_v21 = vrot.slane %v704_v14, 5  ;;  %v712_v27 = vshll.u32 %v1509_v17, 16  ;;  %v723_v33 = vshrl.u32 %v1511_v22, 16  ;;  %v1515_v8 = vld [vmem:[%s1703_s27 + $0x40] sm:$0xf] }
  0x36   : > { %v693_v31 = vsel %vm1728_vm4, %v688_v19, %v692_v16  ;;  %v726_v34 = vshll.u32 %v1511_v22, 16  ;;  %v1463_v35 = vrot.slane %v432_v23, 9  ;;  %v473_v36 = vrot.slane %v1719_v26, 5  ;;  %v1858_v26 = vld [vmem:[%s1703_s27 + $0x34] sm:$0x1] }
  0x37   : > { %v707_v32 = vsel %vm1728_vm4, %v702_v20, %v706_v21  ;;  %v1464_v38 = vrot.slane %v433_v24, 9  ;;  %v477_v39 = vrot.slane %v1722_v29, 5  ;;  %v711_v40 = vrot.slane %v709_v25, 4  ;;  %v1619_v29 = vld [vmem:[%s1703_s27 + $0x24] sm:$0xf0] }
  0x38   : > { %1497 = vmatmul.msk.bf16.vlgmr.msrb.gmra.mxu3 %vm318_vm3, %v1484_v56  ;;  %v714_v41 = vrot.slane %v712_v27, 5  ;;  %v1488_v42 = vor.u32 %v1622_v30, %v1487_v28  ;;  %v768_v43 = vunpack.c.l.b16 %v693_v31  ;;  %v769_v45 = vunpack.c.l.b16 %v707_v32  ;;  %v1491_v9 = vld [vmem:[%s1703_s27 + $0x28] sm:$0xf]  ;;  %v1623_v14 = vld [vmem:[%s1703_s27 + $0x2c] sm:$0xf0] }
  0x39   : > { %v725_v48 = vrot.slane %v723_v33, 4  ;;  %v728_v49 = vrot.slane %v726_v34, 5  ;;  %v474_v50 = vsel %vm1762_vm7, %v1463_v35, %v473_v36  ;;  %v478_v51 = vsel %vm1762_vm7, %v1464_v38, %v477_v39  ;;  %v1885_v27 = vld [vmem:[%s1703_s27 + $0x3c] sm:$0x1]  ;;  %v1888_v28 = vld [vmem:[%s1703_s27 + $0x44] sm:$0x1] }
  0x3a   : > { %v715_v53 = vor.u32 %v714_v41, %v711_v40  ;;  %v718_v12 = vshll.u32 %v1851_v47, 16  ;;  %v775_v55 = vpack.c.b16 %v769_v45, %v768_v43  ;;  %v493_v56 = vunpack.c.l.b16 %v474_v50  ;;  %v1453_v34 = vld [vmem:[%s1703_s27 + $0x30] sm:$0xf]  ;;  %v1620_v35 = vld [vmem:[%s1703_s27 + $0x34] sm:$0xf0] }
  0x3b   : > { %v494_v57 = vunpack.c.l.b16 %v478_v51  ;;  %v729_v58 = vor.u32 %v728_v49, %v725_v48  ;;  %v732_v59 = vshll.u32 %v1858_v26, 16  ;;  %v1450_v61 = vor.u32 %v1619_v29, %v1449_v52  ;;  %v1574_v49 = vld [vmem:[%s1703_s27 + $0x18] sm:$0xf] }
  0x3c   : > { %v716_v62 = vrot.slane %v715_v53, 4  ;;  %v720_v1 = vrot.slane %v718_v12, 5  ;;  %v481_v11 = vrot.slane %v1734_v46, 5  ;;  %v485_v17 = vrot.slane %v1740_v54, 5  ;;  %v1522_v12 = vld [vmem:[%s1703_s27 + $0x8] sm:$0xe] }
  0x3d   : > { %1518 = vmatmul.msk.bf16.vlgmr.msrb.gmra.mxu0 %vm318_vm3, %v774_v6  ;;  %v499_v3 = vpack.c.b16 %v494_v57, %v493_v56  ;;  %v730_v13 = vrot.slane %v729_v58, 4  ;;  %v734_v5 = vrot.slane %v732_v59, 5  ;;  %v435_v6 = vld [vmem:[%s1703_s27 + $0x38] sm:$0xe]  ;;  %v740_v20 = vshll.u32 %v1513_v7, 16 }
  0x3e   : > { %1456 = vmatmul.msk.bf16.gmra.mxu1 %vm318_vm3, %v1446_v15  ;;  %v721_v10 = vsel %vm1728_vm4, %v716_v62, %v720_v1  ;;  %v1465_v15 = vrot.slane %v434_v2, 9  ;;  %v1466_v16 = vrot.slane %v435_v6, 9  ;;  %v751_v21 = vshrl.u32 %v1515_v8, 16  ;;  %v1495_v6 = vld [vmem:[%s1703_s27 + $0x38] sm:$0xf] }
  0x3f   : > { %v735_v19 = vsel %vm1728_vm4, %v730_v13, %v734_v5  ;;  %v754_v22 = vshll.u32 %v1515_v8, 16  ;;  %v1492_v23 = vor.u32 %v1623_v14, %v1491_v9  ;;  %v770_v46 = vunpack.c.l.b16 %v721_v10  ;;  %v1573_v5 = vld [vmem:[%s1703_s27 + $0x14] sm:$0x1] }
  0x40   : > { %v771_v24 = vunpack.c.l.b16 %v735_v19  ;;  %v482_v25 = vsel %vm1762_vm7, %v1465_v15, %v481_v11  ;;  %v486_v54 = vsel %vm1762_vm7, %v1466_v16, %v485_v17  ;;  %v742_v31 = vrot.slane %v740_v20, 5 }
  0x41   : > { %1469 = vmatmul.msk.bf16.gmra.mxu2 %vm318_vm3, %v498_v18  ;;  %v737_v18 = vshrl.u32 %v1513_v7, 16  ;;  %v753_v32 = vrot.slane %v751_v21, 4  ;;  %v756_v33 = vrot.slane %v754_v22, 5  ;;  %v495_v36 = vunpack.c.l.b16 %v482_v25  ;;  %v1624_v7 = vld [vmem:[%s1703_s27 + $0x3c] sm:$0xf0] }
  0x42   : > { %v776_v38 = vpack.c.b16 %v771_v24, %v770_v46  ;;  %v496_v39 = vunpack.c.l.b16 %v486_v54  ;;  %v746_v40 = vshll.u32 %v1885_v27, 16  ;;  %v760_v41 = vshll.u32 %v1888_v28, 16  ;;  %v1554_v54 = vld [vmem:[%s1703_s27 + $0x10] sm:$0xf] }
  0x43   : > { %v739_v30 = vrot.slane %v737_v18, 4  ;;  %v757_v45 = vor.u32 %v756_v33, %v753_v32  ;;  %v1454_v48 = vor.u32 %v1620_v35, %v1453_v34  ;;  %v1066_v58 = vshrl.u32 %v1574_v49, 16  ;;  %v1625_v32 = vld [vmem:[%s1703_s27 + $0x14] sm:$0xf0]  ;;  %v1576_v35 = vld [vmem:[%s1703_s27 + $0x20] sm:$0xf] }
  0x44   : > { %v500_v52 = vpack.c.b16 %v496_v39, %v495_v36  ;;  %v748_v29 = vrot.slane %v746_v40, 5  ;;  %v762_v53 = vrot.slane %v760_v41, 5  ;;  %v1069_v59 = vshll.u32 %v1574_v49, 16 }
  0x45   : > { %v743_v43 = vor.u32 %v742_v31, %v739_v30  ;;  %v758_v57 = vrot.slane %v757_v45, 4  ;;  %v860_v62 = vrot.slane %v1784_v0, 5  ;;  %v1530_v1 = vrot.slane %v1522_v12, 9  ;;  %v1575_v0 = vld [vmem:[%s1703_s27 + $0x1c] sm:$0x1] }
  0x46   : > { %v1071_v10 = vrot.slane %v1069_v59, 5  ;;  %v1061_v16 = vshll.u32 %v1573_v5, 16  ;;  %v1496_v17 = vor.u32 %v1624_v7, %v1495_v6  ;;  %v1075_v21 = vshll.u32 %v1575_v0, 16  ;;  %v1593_v30 = vld [vmem:[%s1703_s27 + $0x10] sm:$0xe] }
  0x47   : > { %v744_v56 = vrot.slane %v743_v43, 4  ;;  %v763_v9 = vsel %vm1728_vm4, %v758_v57, %v762_v53  ;;  %v1594_v31 = vld [vmem:[%s1703_s27 + $0x18] sm:$0xe]  ;;  %v1601_v40 = vrot.slane %v1593_v30, 9  ;;  %v1255_v41 = vrot.slane %v1573_v5, 5 }
  0x48   : > { %1498 = vmatmul.msk.bf16.gmra.mxu3 %vm318_vm3, %v1488_v42  ;;  %v1572_v42 = vld [vmem:[%s1703_s27 + $0x10] sm:$0xf]  ;;  %v773_v19 = vunpack.c.l.b16 %v763_v9  ;;  %v1063_v24 = vrot.slane %v1061_v16, 5  ;;  %v1077_v34 = vrot.slane %v1075_v21, 5  ;;  %v1555_v43 = vor.u32 %v1625_v32, %v1554_v54  ;;  %v1524_v45 = vld [vmem:[%s1703_s27 + $0x18] sm:$0xe] }
  0x49   : > { %v1052_v50 = vshrl.u32 %v1572_v42, 16  ;;  %v1055_v51 = vshll.u32 %v1572_v42, 16  ;;  %v749_v8 = vsel %vm1728_vm4, %v744_v56, %v748_v29  ;;  %v1602_v42 = vrot.slane %v1594_v31, 9  ;;  %v1579_v6 = vld [vmem:[%s1703_s27 + $0x2c] sm:$0x1] }
  0x4a   : > { %v772_v18 = vunpack.c.l.b16 %v749_v8  ;;  %v1080_v49 = vshrl.u32 %v1576_v35, 16  ;;  %v864_v56 = vrot.slane %v1823_v60, 5  ;;  %v1558_v16 = vld [vmem:[%s1703_s27 + $0x20] sm:$0xf]  ;;  %v1580_v21 = vld [vmem:[%s1703_s27 + $0x30] sm:$0xf] }
  0x4b   : > { %v1057_v13 = vrot.slane %v1055_v51, 5  ;;  %v1582_v54 = vld [vmem:[%s1703_s27 + $0x38] sm:$0xf]  ;;  %v1108_v31 = vshrl.u32 %v1580_v21, 16  ;;  %v1111_v32 = vshll.u32 %v1580_v21, 16 }
  0x4c   : > { %v777_v25 = vpack.c.b16 %v773_v19, %v772_v18 }
  0x4d   : > { %1519 = vmatmul.msk.bf16.gmra.mxu0 %vm318_vm3, %v775_v55  ;;  %v1523_v55 = vld [vmem:[%s1703_s27 + $0x10] sm:$0xe] }
  0x4e   : > { %1457 = vmatmul.msk.bf16.gmra.mxu1 %vm318_vm3, %v1450_v61  ;;  %v856_v61 = vrot.slane %v1781_v63, 5  ;;  %v1531_v2 = vrot.slane %v1523_v55, 9  ;;  %v1068_v63 = vrot.slane %v1066_v58, 4  ;;  %v1532_v55 = vrot.slane %v1524_v45, 9 }
  0x4f   : > { %v868_v58 = vrot.slane %v1828_v4, 5  ;;  %v872_v45 = vrot.slane %v1851_v47, 5  ;;  %v1583_v47 = vld [vmem:[%s1703_s27 + $0x3c] sm:$0x1] }
  0x50   : > { %v857_v11 = vsel %vm1762_vm7, %v1530_v1, %v856_v61  ;;  %v861_v14 = vsel %vm1762_vm7, %v1531_v2, %v860_v62  ;;  %v1072_v20 = vor.u32 %v1071_v10, %v1068_v63  ;;  %v1256_v61 = vsel %vm1762_vm7, %v1601_v40, %v1255_v41 }
  0x51   : > { %1470 = vmatmul.msk.bf16.gmra.mxu2 %vm318_vm3, %v499_v3  ;;  %v1054_v3 = vrot.slane %v1052_v50, 4  ;;  %v888_v22 = vunpack.c.l.b16 %v857_v11  ;;  %v1083_v50 = vshll.u32 %v1576_v35, 16  ;;  %v1082_v62 = vrot.slane %v1080_v49, 4 }
  0x52   : > { %v1073_v33 = vrot.slane %v1072_v20, 4  ;;  %v1287_v60 = vunpack.c.l.b16 %v1256_v61  ;;  %v865_v4 = vsel %vm1762_vm7, %v1532_v55, %v864_v56  ;;  %v1103_v11 = vshll.u32 %v1579_v6, 16  ;;  %v1595_v20 = vld [vmem:[%s1703_s27 + $0x20] sm:$0xe] }
  0x53   : > { %v1058_v15 = vor.u32 %v1057_v13, %v1054_v3  ;;  %v1085_v1 = vrot.slane %v1083_v50, 5  ;;  %v1577_v3 = vld [vmem:[%s1703_s27 + $0x24] sm:$0x1]  ;;  %v1603_v30 = vrot.slane %v1595_v20, 9  ;;  %v1267_v41 = vrot.slane %v1579_v6, 5 }
  0x54   : > { %v1078_v51 = vsel %vm1728_vm4, %v1073_v33, %v1077_v34  ;;  %v1089_v10 = vshll.u32 %v1577_v3, 16  ;;  %v1263_v35 = vrot.slane %v1577_v3, 5 }
  0x55   : > { %v1059_v46 = vrot.slane %v1058_v15, 4  ;;  %v1166_v59 = vunpack.c.l.b16 %v1078_v51  ;;  %v1086_v63 = vor.u32 %v1085_v1, %v1082_v62  ;;  %v1110_v51 = vrot.slane %v1108_v31, 4 }
  0x56   : > { %v1091_v19 = vrot.slane %v1089_v10, 5  ;;  %v1264_v55 = vsel %vm1762_vm7, %v1603_v30, %v1263_v35  ;;  %v1598_v10 = vld [vmem:[%s1703_s27 + $0x38] sm:$0xe]  ;;  %v1275_v30 = vrot.slane %v1583_v47, 5  ;;  %v880_v35 = vrot.slane %v1885_v27, 5 }
  0x57   : > { %v1064_v39 = vsel %vm1728_vm4, %v1059_v46, %v1063_v24  ;;  %v1087_v18 = vrot.slane %v1086_v63, 4  ;;  %v1105_v46 = vrot.slane %v1103_v11, 5  ;;  %v1596_v24 = vld [vmem:[%s1703_s27 + $0x28] sm:$0xe]  ;;  %v1597_v63 = vld [vmem:[%s1703_s27 + $0x30] sm:$0xe] }
  0x58   : > { %1499 = vmatmul.msk.bf16.gmra.mxu3 %vm318_vm3, %v1492_v23  ;;  %v889_v23 = vunpack.c.l.b16 %v861_v14  ;;  %v1165_v12 = vunpack.c.l.b16 %v1064_v39  ;;  %v890_v14 = vunpack.c.l.b16 %v865_v4  ;;  %v1527_v39 = vld [vmem:[%s1703_s27 + $0x30] sm:$0xe]  ;;  %v1606_v21 = vrot.slane %v1598_v10, 9 }
  0x59   : > { %v1092_v34 = vsel %vm1728_vm4, %v1087_v18, %v1091_v19  ;;  %v1535_v50 = vrot.slane %v1527_v39, 9  ;;  %v1605_v19 = vrot.slane %v1597_v63, 9 }
  0x5a   : > { %v896_v36 = vpack.c.b16 %v889_v23, %v888_v22  ;;  %v1173_v8 = vpack.c.b16 %v1166_v59, %v1165_v12  ;;  %v1626_v22 = vld [vmem:[%s1703_s27 + $0x24] sm:$0xf0]  ;;  %v1581_v12 = vld [vmem:[%s1703_s27 + $0x34] sm:$0x1] }
  0x5b   : > { %v1559_v33 = vor.u32 %v1626_v22, %v1558_v16  ;;  %v1117_v62 = vshll.u32 %v1581_v12, 16  ;;  %v1271_v20 = vrot.slane %v1581_v12, 5 }
  0x5d   : > { %1520 = vmatmul.msk.bf16.gmra.mxu0 %vm318_vm3, %v776_v38  ;;  %v1578_v38 = vld [vmem:[%s1703_s27 + $0x28] sm:$0xf] }
  0x5e   : > { %1458 = vmatmul.msk.bf16.gmra.mxu1 %vm318_vm3, %v1454_v48  ;;  %v1525_v48 = vld [vmem:[%s1703_s27 + $0x20] sm:$0xe]  ;;  %v1094_v29 = vshrl.u32 %v1578_v38, 16  ;;  %v1097_v53 = vshll.u32 %v1578_v38, 16  ;;  %v1526_v38 = vld [vmem:[%s1703_s27 + $0x28] sm:$0xe] }
  0x5f   : > { %v1533_v57 = vrot.slane %v1525_v48, 9  ;;  %v876_v48 = vrot.slane %v1858_v26, 5  ;;  %v1534_v49 = vrot.slane %v1526_v38, 9  ;;  %v884_v38 = vrot.slane %v1888_v28, 5 }
  0x60   : > { %v1096_v13 = vrot.slane %v1094_v29, 4  ;;  %v1099_v5 = vrot.slane %v1097_v53, 5  ;;  %v1167_v29 = vunpack.c.l.b16 %v1092_v34 }
  0x61   : > { %1471 = vmatmul.msk.bf16.gmra.mxu2 %vm318_vm3, %v500_v52  ;;  %v1259_v52 = vrot.slane %v1575_v0, 5  ;;  %v869_v7 = vsel %vm1762_vm7, %v1533_v57, %v868_v58  ;;  %v873_v26 = vsel %vm1762_vm7, %v1534_v49, %v872_v45  ;;  %v877_v59 = vsel %vm1762_vm7, %v1535_v50, %v876_v48  ;;  %v1585_v45 = vld [vmem:[%s1703_s27 + $0x44] sm:$0x1]  ;;  %v1587_v50 = vld [vmem:[%s1703_s27 + $0x4c] sm:$0x1] }
  0x62   : > { %v1100_v0 = vor.u32 %v1099_v5, %v1096_v13  ;;  %v891_v15 = vunpack.c.l.b16 %v869_v7  ;;  %v1131_v5 = vshll.u32 %v1583_v47, 16  ;;  %v892_v6 = vunpack.c.l.b16 %v873_v26 }
  0x63   : > { %v1260_v2 = vsel %vm1762_vm7, %v1602_v42, %v1259_v52  ;;  %v1122_v42 = vshrl.u32 %v1582_v54, 16  ;;  %v1113_v52 = vrot.slane %v1111_v32, 5  ;;  %v1119_v7 = vrot.slane %v1117_v62, 5 }
  0x64   : > { %v1288_v9 = vunpack.c.l.b16 %v1260_v2  ;;  %v1101_v23 = vrot.slane %v1100_v0, 4  ;;  %v1289_v2 = vunpack.c.l.b16 %v1264_v55  ;;  %v1627_v0 = vld [vmem:[%s1703_s27 + $0x34] sm:$0xf0]  ;;  %v1145_v12 = vshll.u32 %v1585_v45, 16 }
  0x65   : > { %v1124_v57 = vrot.slane %v1122_v42, 4  ;;  %v1114_v61 = vor.u32 %v1113_v52, %v1110_v51  ;;  %v1283_v10 = vrot.slane %v1587_v50, 5 }
  0x66   : > { %v1106_v40 = vsel %vm1728_vm4, %v1101_v23, %v1105_v46  ;;  %v1528_v23 = vld [vmem:[%s1703_s27 + $0x38] sm:$0xe]  ;;  %v1529_v46 = vld [vmem:[%s1703_s27 + $0x40] sm:$0xe] }
  0x67   : > { %v1168_v53 = vunpack.c.l.b16 %v1106_v40  ;;  %v1115_v4 = vrot.slane %v1114_v61, 4  ;;  %v1536_v34 = vrot.slane %v1528_v23, 9  ;;  %v1272_v40 = vsel %vm1762_vm7, %v1605_v19, %v1271_v20 }
  0x68   : > { %1500 = vmatmul.msk.bf16.gmra.mxu3 %vm318_vm3, %v1496_v17  ;;  %v1295_v17 = vpack.c.b16 %v1288_v9, %v1287_v60  ;;  %v893_v60 = vunpack.c.l.b16 %v877_v59  ;;  %v1562_v9 = vld [vmem:[%s1703_s27 + $0x30] sm:$0xf]  ;;  %v1291_v51 = vunpack.c.l.b16 %v1272_v40  ;;  %v1147_v59 = vrot.slane %v1145_v12, 5 }
  0x69   : > { %v1174_v1 = vpack.c.b16 %v1168_v53, %v1167_v29  ;;  %v1120_v18 = vsel %vm1728_vm4, %v1115_v4, %v1119_v7  ;;  %v1563_v22 = vor.u32 %v1627_v0, %v1562_v9  ;;  %v881_v27 = vsel %vm1762_vm7, %v1536_v34, %v880_v35 }
  0x6a   : > { %v898_v16 = vpack.c.b16 %v893_v60, %v892_v6  ;;  %v1279_v7 = vrot.slane %v1585_v45, 5 }
  0x6d   : > { %1521 = vmatmul.msk.bf16.gmra.mxu0 %vm318_vm3, %v777_v25  ;;  %v897_v25 = vpack.c.b16 %v891_v15, %v890_v14  ;;  %v1133_v14 = vrot.slane %v1131_v5, 5  ;;  %v1584_v15 = vld [vmem:[%s1703_s27 + $0x40] sm:$0xf]  ;;  %v1600_v5 = vld [vmem:[%s1703_s27 + $0x48] sm:$0xe] }
  0x6e   : > { %1539 = vmatmul.msk.bf16.vlgmr.msra.gmra.mxu1 %vm318_vm3, %v896_v36  ;;  %v1604_v36 = vrot.slane %v1596_v24, 9  ;;  %v1136_v24 = vshrl.u32 %v1584_v15, 16  ;;  %v1608_v63 = vrot.slane %v1600_v5, 9 }
  0x70   : > { %v1268_v56 = vsel %vm1762_vm7, %v1604_v36, %v1267_v41  ;;  %v1537_v36 = vrot.slane %v1529_v46, 9  ;;  %v1138_v41 = vrot.slane %v1136_v24, 4 }
  0x71   : > { %1568 = vmatmul.msk.bf16.vlgmr.msra.gmra.mxu2 %vm318_vm3, %v1555_v43  ;;  %v1125_v43 = vshll.u32 %v1582_v54, 16  ;;  %v1290_v3 = vunpack.c.l.b16 %v1268_v56  ;;  %v1159_v56 = vshll.u32 %v1587_v50, 16 }
  0x72   : > { %v885_v28 = vsel %vm1762_vm7, %v1537_v36, %v884_v38 }
  0x73   : > { %v1127_v58 = vrot.slane %v1125_v43, 5  ;;  %v1276_v43 = vsel %vm1762_vm7, %v1606_v21, %v1275_v30  ;;  %v1161_v62 = vrot.slane %v1159_v56, 5 }
  0x74   : > { %v1292_v29 = vunpack.c.l.b16 %v1276_v43 }
  0x75   : > { %v1128_v13 = vor.u32 %v1127_v58, %v1124_v57  ;;  %v894_v57 = vunpack.c.l.b16 %v881_v27  ;;  %v895_v58 = vunpack.c.l.b16 %v885_v28 }
  0x76   : > { %v1297_v47 = vpack.c.b16 %v1292_v29, %v1291_v51 }
  0x77   : > { %v1129_v11 = vrot.slane %v1128_v13, 4  ;;  %v1628_v13 = vld [vmem:[%s1703_s27 + $0x44] sm:$0xf0] }
  0x78   : > { %1589 = vmatmul.msk.bf16.vlgmr.msra.gmra.mxu3 %vm318_vm3, %v1173_v8  ;;  %v1296_v8 = vpack.c.b16 %v1290_v3, %v1289_v2  ;;  %v899_v2 = vpack.c.b16 %v895_v58, %v894_v57  ;;  %v1566_v3 = vld [vmem:[%s1703_s27 + $0x40] sm:$0xf] }
  0x79   : > { %v1134_v54 = vsel %vm1728_vm4, %v1129_v11, %v1133_v14 }
  0x7a   : > { %v1170_v39 = vunpack.c.l.b16 %v1134_v54 }
  0x7d   : > { %1610 = vmatmul.msk.bf16.vlgmr.msra.gmra.mxu0 %vm318_vm3, %v1295_v17  ;;  %v1586_v17 = vld [vmem:[%s1703_s27 + $0x48] sm:$0xf] }
  0x7e   : > { %1540 = vmatmul.msk.bf16.gmra.mxu1 %vm318_vm3, %v897_v25  ;;  %v1139_v25 = vshll.u32 %v1584_v15, 16  ;;  %v1150_v31 = vshrl.u32 %v1586_v17, 16  ;;  %v1153_v32 = vshll.u32 %v1586_v17, 16  ;;  %v1284_v15 = vsel %vm1762_vm7, %v1608_v63, %v1283_v10 }
  0x7f   : > { %v1294_v37 = vunpack.c.l.b16 %v1284_v15 }
  0x80   : > { %v1141_v42 = vrot.slane %v1139_v25, 5  ;;  %v1152_v48 = vrot.slane %v1150_v31, 4  ;;  %v1155_v49 = vrot.slane %v1153_v32, 5 }
  0x81   : > { %1569 = vmatmul.msk.bf16.gmra.mxu2 %vm318_vm3, %v1559_v33  ;;  %v1169_v33 = vunpack.c.l.b16 %v1120_v18 }
  0x82   : > { %v1142_v53 = vor.u32 %v1141_v42, %v1138_v41  ;;  %v1156_v55 = vor.u32 %v1155_v49, %v1152_v48 }
  0x83   : > { %v1175_v52 = vpack.c.b16 %v1170_v39, %v1169_v33 }
  0x84   : > { %v1143_v26 = vrot.slane %v1142_v53, 4  ;;  %v1157_v61 = vrot.slane %v1156_v55, 4 }
  0x86   : > { %v1148_v60 = vsel %vm1728_vm4, %v1143_v26, %v1147_v59  ;;  %v1162_v9 = vsel %vm1728_vm4, %v1157_v61, %v1161_v62 }
  0x87   : > { %v1171_v0 = vunpack.c.l.b16 %v1148_v60  ;;  %v1172_v11 = vunpack.c.l.b16 %v1162_v9 }
  0x88   : > { %1590 = vmatmul.msk.bf16.gmra.mxu3 %vm318_vm3, %v1174_v1  ;;  %v1599_v1 = vld [vmem:[%s1703_s27 + $0x40] sm:$0xe] }
  0x89   : > { %v1607_v4 = vrot.slane %v1599_v1, 9  ;;  %v1176_v17 = vpack.c.b16 %v1172_v11, %v1171_v0 }
  0x8b   : > { %v1280_v14 = vsel %vm1762_vm7, %v1607_v4, %v1279_v7 }
  0x8c   : > { %v1293_v18 = vunpack.c.l.b16 %v1280_v14  ;;  %v2065_v14 = vld [vmem:[%s2121_s2] ss:$0 sm:$0xff] }
  0x8d   : > { %1611 = vmatmul.msk.bf16.gmra.mxu0 %vm318_vm3, %v1296_v8  ;;  %v1567_v8 = vor.u32 %v1628_v13, %v1566_v3 }
  0x8e   : > { %1541 = vmatmul.msk.bf16.gmra.mxu1 %vm318_vm3, %v898_v16  ;;  %v1298_v20 = vpack.c.b16 %v1294_v37, %v1293_v18 }
  0x91   : > { %1570 = vmatmul.msk.bf16.gmra.mxu2 %vm318_vm3, %v1563_v22 }
  0x98   : > { %1591 = vmatmul.msk.bf16.gmra.mxu3 %vm318_vm3, %v1175_v52 }
  0x9b   : > { %v2005_v6 = vpop.f32.mrf.mxu1 }
  0x9d   : > { %1612 = vmatmul.msk.bf16.gmra.mxu0 %vm318_vm3, %v1297_v47 }
  0x9e   : > { %1542 = vmatmul.msk.bf16.gmra.mxu1 %vm318_vm3, %v899_v2 }
  0xa1   : > { %1571 = vmatmul.msk.bf16.gmra.mxu2 %vm318_vm3, %v1567_v8 }
  0xa3   : > { %v2018_v16 = vpop.f32.mrf.mxu1 }
  0xa4   : > { %v2020_v19 = vpop.f32.mrf.mxu2 }
  0xa8   : > { %1592 = vmatmul.msk.bf16.gmra.mxu3 %vm318_vm3, %v1176_v17 }
  0xaa   : > { %v344_v21 = vpop.f32.mrf.mxu0 }
  0xab   : > { %v2023_v22 = vpop.f32.mrf.mxu3  ;;  %v408_v23 = vpop.f32.mrf.mxu1 }
  0xac   : > { %v2026_v46 = vpop.f32.mrf.mxu2  ;;  %v409_v56 = vadd.f32 %v408_v23, %v344_v21 }
  0xad   : > { %1613 = vmatmul.msk.bf16.gmra.mxu0 %vm318_vm3, %v1298_v20 }
  0xb2   : > { %v346_v44 = vpop.f32.mrf.mxu0 }
  0xb3   : > { %v2028_v24 = vpop.f32.mrf.mxu3  ;;  %v410_v25 = vpop.f32.mrf.mxu1 }
  0xb4   : > { %v525_v54 = vpop.f32.mrf.mxu2  ;;  %v411_v62 = vadd.f32 %v410_v25, %v346_v44 }
  0xb5   : > { %v545_v47 = vadd.f32 %v525_v54, %v409_v56 }
  0xba   : > { %v802_v30 = vpop.f32.mrf.mxu0 }
  0xbb   : > { %v608_v31 = vpop.f32.mrf.mxu3  ;;  %v413_v32 = vpop.f32.mrf.mxu1 }
  0xbc   : > { %v527_v33 = vpop.f32.mrf.mxu2  ;;  %v628_v59 = vadd.f32 %v608_v31, %v545_v47  ;;  %v414_v9 = vadd.f32 %v413_v32, %v2005_v6 }
  0xbd   : > { %v546_v3 = vadd.f32 %v527_v33, %v411_v62 }
  0xbe   : > { %v822_v13 = vadd.f32 %v802_v30, %v628_v59 }
  0xc2   : > { %v804_v34 = vpop.f32.mrf.mxu0 }
  0xc3   : > { %v610_v35 = vpop.f32.mrf.mxu3  ;;  %v415_v36 = vpop.f32.mrf.mxu1 }
  0xc4   : > { %v530_v38 = vpop.f32.mrf.mxu2  ;;  %v629_v4 = vadd.f32 %v610_v35, %v546_v3  ;;  %v416_v44 = vadd.f32 %v415_v36, %v2018_v16 }
  0xc5   : > { %v547_v0 = vadd.f32 %v530_v38, %v414_v9 }
  0xc6   : > { %v823_v15 = vadd.f32 %v804_v34, %v629_v4 }
  0xca   : > { %v807_v39 = vpop.f32.mrf.mxu0 }
  0xcb   : > { %v613_v40 = vpop.f32.mrf.mxu3  ;;  %v418_v41 = vpop.f32.mrf.mxu1 }
  0xcc   : > { %v532_v42 = vpop.f32.mrf.mxu2  ;;  %v630_v6 = vadd.f32 %v613_v40, %v547_v0  ;;  %v419_v47 = vadd.f32 %v418_v41, %v2020_v19 }
  0xcd   : > { %v548_v30 = vadd.f32 %v532_v42, %v416_v44 }
  0xce   : > { %v824_v32 = vadd.f32 %v807_v39, %v630_v6 }
  0xd2   : > { %v2030_v43 = vpop.f32.mrf.mxu0 }
  0xd3   : > { %v615_v45 = vpop.f32.mrf.mxu3  ;;  %v2032_v48 = vpop.f32.mrf.mxu1 }
  0xd4   : > { %v535_v49 = vpop.f32.mrf.mxu2  ;;  %v631_v38 = vadd.f32 %v615_v45, %v548_v30  ;;  %v421_v19 = vadd.f32 %v2032_v48, %v2026_v46 }
  0xd5   : > { %v549_v36 = vadd.f32 %v535_v49, %v419_v47 }
  0xd6   : > { %v825_v42 = vadd.f32 %v2030_v43, %v631_v38 }
  0xda   : > { %v2034_v50 = vpop.f32.mrf.mxu0 }
  0xdb   : > { %v2036_v51 = vpop.f32.mrf.mxu3  ;;  %v2038_v27 = vpop.f32.mrf.mxu1 }
  0xdc   : > { %v2040_v28 = vpop.f32.mrf.mxu2  ;;  %v632_v45 = vadd.f32 %v2036_v51, %v549_v36  ;;  %v424_v46 = vadd.f32 %v2038_v27, %v2023_v22 }
  0xdd   : > { %v550_v49 = vadd.f32 %v2040_v28, %v421_v19 }
  0xde   : > { %v826_v4 = vadd.f32 %v2034_v50, %v632_v45 }
  0xe2   : > { %v2042_v52 = vpop.f32.mrf.mxu0 }
  0xe3   : > { %v2044_v29 = vpop.f32.mrf.mxu3  ;;  %v2046_v53 = vpop.f32.mrf.mxu1 }
  0xe4   : > { %v2048_v12 = vpop.f32.mrf.mxu2  ;;  %v426_v22 = vadd.f32 %v2046_v53, %v2028_v24 }
  0xe5   : > { %v551_v28 = vadd.f32 %v2048_v12, %v424_v46 }
  0xea   : > { %v2050_v55 = vpop.f32.mrf.mxu0 }
  0xeb   : > { %v2052_v57 = vpop.f32.mrf.mxu3  ;;  %v924_v58 = vpop.f32.mrf.mxu1 }
  0xec   : > { %v2054_v26 = vpop.f32.mrf.mxu2  ;;  %v944_v60 = vadd.f32 %v924_v58, %v822_v13 }
  0xed   : > { %v552_v12 = vadd.f32 %v2054_v26, %v426_v22 }
  0xf2   : > { %v2056_v61 = vpop.f32.mrf.mxu0 }
  0xf3   : > { %v2058_v1 = vpop.f32.mrf.mxu3  ;;  %v926_v2 = vpop.f32.mrf.mxu1 }
  0xf4   : > { %v1007_v5 = vpop.f32.mrf.mxu2  ;;  %v945_v37 = vadd.f32 %v926_v2, %v823_v15  ;;  %v635_v30 = vadd.f32 %v2058_v1, %v552_v12 }
  0xf5   : > { %v1027_v7 = vadd.f32 %v1007_v5, %v944_v60 }
  0xf6   : > { %v829_v26 = vadd.f32 %v2056_v61, %v635_v30 }
  0xfa   : > { %v1323_v8 = vpop.f32.mrf.mxu0 }
  0xfb   : > { %v1201_v63 = vpop.f32.mrf.mxu3  ;;  %v929_v10 = vpop.f32.mrf.mxu1 }
  0xfc   : > { %v1221_v11 = vadd.f32 %v1201_v63, %v1027_v7  ;;  %v1009_v17 = vpop.f32.mrf.mxu2  ;;  %v946_v35 = vadd.f32 %v929_v10, %v824_v32  ;;  %v633_v63 = vadd.f32 %v2044_v29, %v550_v49  ;;  %v634_v29 = vadd.f32 %v2052_v57, %v551_v28 }
  0xfd   : > { %v1028_v21 = vadd.f32 %v1009_v17, %v945_v37 }
  0xfe   : > { %v1343_v18 = vadd.f32 %v1323_v8, %v1221_v11  ;;  %v827_v15 = vadd.f32 %v2042_v52, %v633_v63  ;;  %v828_v44 = vadd.f32 %v2050_v55, %v634_v29 }
 0x100   : > { %v1355_v20 = vadd.f32 %v2065_v14, %v1343_v18 }
 0x102   : > { %v1325_v23 = vpop.f32.mrf.mxu0  ;;  %1363 = vst.msk [vmem:[%s2070_s16] sm:$0xff] %vm318_vm3, %v1355_v20 }
 0x103   : > { %v1203_v25 = vpop.f32.mrf.mxu3  ;;  %v931_v54 = vpop.f32.mrf.mxu1 }
 0x104   : > { %v1222_v31 = vadd.f32 %v1203_v25, %v1028_v21  ;;  %v1012_v33 = vpop.f32.mrf.mxu2  ;;  %v947_v3 = vadd.f32 %v931_v54, %v825_v42 }
 0x105   : > { %v1029_v56 = vadd.f32 %v1012_v33, %v946_v35 }
 0x106   : > { %v1344_v34 = vadd.f32 %v1325_v23, %v1222_v31 }
 0x108   : > { %v1356_v40 = vadd.f32 %v2065_v14, %v1344_v34 }
 0x10a   : > { %v1328_v58 = vpop.f32.mrf.mxu0  ;;  %1364 = vst.msk [vmem:[%s2070_s16 + $0x8] sm:$0xff] %vm318_vm3, %v1356_v40 }
 0x10b   : > { %v1206_v16 = vpop.f32.mrf.mxu3  ;;  %v934_v39 = vpop.f32.mrf.mxu1 }
 0x10c   : > { %v1223_v59 = vadd.f32 %v1206_v16, %v1029_v56  ;;  %v1014_v62 = vpop.f32.mrf.mxu2  ;;  %v948_v9 = vadd.f32 %v934_v39, %v826_v4 }
 0x10d   : > { %v1030_v5 = vadd.f32 %v1014_v62, %v947_v3 }
 0x10e   : > { %v1345_v2 = vadd.f32 %v1328_v58, %v1223_v59 }
 0x110   : > { %v1357_v13 = vadd.f32 %v2065_v14, %v1345_v2 }
 0x112   : > { %v1330_v60 = vpop.f32.mrf.mxu0  ;;  %1365 = vst.msk [vmem:[%s2070_s16 + $0x10] sm:$0xff] %vm318_vm3, %v1357_v13 }
 0x113   : > { %v1208_v41 = vpop.f32.mrf.mxu3  ;;  %v936_v51 = vpop.f32.mrf.mxu1 }
 0x114   : > { %v1224_v43 = vadd.f32 %v1208_v41, %v1030_v5  ;;  %v1017_v7 = vpop.f32.mrf.mxu2  ;;  %v949_v37 = vadd.f32 %v936_v51, %v827_v15 }
 0x115   : > { %v1031_v0 = vadd.f32 %v1017_v7, %v948_v9 }
 0x116   : > { %v1346_v8 = vadd.f32 %v1330_v60, %v1224_v43 }
 0x118   : > { %v1358_v10 = vadd.f32 %v2065_v14, %v1346_v8 }
 0x11a   : > { %v1333_v11 = vpop.f32.mrf.mxu0  ;;  %1366 = vst.msk [vmem:[%s2070_s16 + $0x18] sm:$0xff] %vm318_vm3, %v1358_v10 }
 0x11b   : > { %v1211_v48 = vpop.f32.mrf.mxu3  ;;  %v939_v21 = vpop.f32.mrf.mxu1 }
 0x11c   : > { %v1225_v50 = vadd.f32 %v1211_v48, %v1031_v0  ;;  %v1019_v17 = vpop.f32.mrf.mxu2  ;;  %v950_v57 = vadd.f32 %v939_v21, %v828_v44 }
 0x11d   : > { %v1032_v20 = vadd.f32 %v1019_v17, %v949_v37 }
 0x11e   : > { %v1347_v18 = vadd.f32 %v1333_v11, %v1225_v50 }
 0x120   : > { %v1359_v6 = vadd.f32 %v2065_v14, %v1347_v18 }
 0x122   : > { %v1335_v23 = vpop.f32.mrf.mxu0  ;;  %1367 = vst.msk [vmem:[%s2070_s16 + $0x20] sm:$0xff] %vm318_vm3, %v1359_v6 }
 0x123   : > { %v1213_v27 = vpop.f32.mrf.mxu3  ;;  %v941_v24 = vpop.f32.mrf.mxu1 }
 0x124   : > { %v1226_v52 = vadd.f32 %v1213_v27, %v1032_v20  ;;  %v1022_v25 = vpop.f32.mrf.mxu2  ;;  %v951_v38 = vadd.f32 %v941_v24, %v829_v26 }
 0x125   : > { %v1033_v32 = vadd.f32 %v1022_v25, %v950_v57 }
 0x126   : > { %v1348_v54 = vadd.f32 %v1335_v23, %v1226_v52 }
 0x128   : > { %v1360_v31 = vadd.f32 %v2065_v14, %v1348_v54 }
 0x12a   : > { %1368 = vst.msk [vmem:[%s2070_s16 + $0x28] sm:$0xff] %vm318_vm3, %v1360_v31  ;;  %v1338_v53 = vpop.f32.mrf.mxu0 }
 0x12b   : > { %v1216_v33 = vpop.f32.mrf.mxu3 }
 0x12c   : > { %v1227_v34 = vadd.f32 %v1216_v33, %v1033_v32  ;;  %v1024_v35 = vpop.f32.mrf.mxu2 }
 0x12d   : > { %v1034_v56 = vadd.f32 %v1024_v35, %v951_v38 }
 0x12e   : > { %v1349_v55 = vadd.f32 %v1338_v53, %v1227_v34 }
 0x130   : > { %v1361_v40 = vadd.f32 %v2065_v14, %v1349_v55 }
 0x132   : > { %1369 = vst.msk [vmem:[%s2070_s16 + $0x30] sm:$0xff] %vm318_vm3, %v1361_v40  ;;  %v1340_v47 = vpop.f32.mrf.mxu0 }
 0x133   : > { %v1218_v1 = vpop.f32.mrf.mxu3 }
 0x134   : > { %v1228_v58 = vadd.f32 %v1218_v1, %v1034_v56 }
 0x136   : > { %v1350_v16 = vadd.f32 %v1340_v47, %v1228_v58 }
 0x138   : > { %v1362_v36 = vadd.f32 %v2065_v14, %v1350_v16 }
 0x13a   : > { %1370 = vst.msk [vmem:[%s2070_s16 + $0x38] sm:$0xff] %vm318_vm3, %v1362_v36 }
 0x13b PF: > { %s13_s12 = sadd.s32 1, %s1648_s12  }
 0x13c   : > { %p10_p4 = scmp.ge.s32.totalorder %s13_s12, 4  }
 0x13e   :  { %12 = sbr.rel (!%p10_p4) target bundleno = 1 (0x1), region = 72 }

// kernel: _lambda_.19
= control target key start
LH: loop header
LB: loop body
LE: loop exit
PB: predicated region body
PF: predicated region fallthrough
CT: control target
= control target key end

     0   :  { %s390_s0 = inlined_call_operand.vmem [shape: f32[128,16], index: 0, kind: input, shape index: {}]   ;;  %s391_s1 = inlined_call_operand.vmem [shape: f32[128,16], index: 1, kind: input, shape index: {}]   ;;  %s392_s2 = inlined_call_operand.vmem [shape: f32[2,16], index: 2, kind: input, shape index: {}]   ;;  %s393_s3 = inlined_call_operand.vmem [shape: f32[1,16], index: 3, kind: input, shape index: {}]   ;;  %s394_s4 = inlined_call_operand.vmem [shape: f32[1,16], index: 4, kind: input, shape index: {}]   ;;  %s395_s5 = inlined_call_operand.hbm [shape: f32[128,16], index: 5, kind: output, shape index: {}]  }
   0x1   :  { %v69_v0 = vld [vmem:[%s392_s2] sm:$0x1]  ;;  %v71_v2 = vld [vmem:[%s392_s2 + $0x1] sm:$0x1] }
   0x2   :  { %v70_v1 = vmul.f32 0.0078125, %v69_v0  ;;  %v72_v3 = vmul.f32 0.0078125, %v71_v2 }
   0x4   :  { %v73_v4 = vmul.f32 %v70_v1, %v70_v1 }
   0x6   :  { %v74_v5 = vsub.f32 %v72_v3, %v73_v4 }
   0x7   :  { %10 = vsyncpa [#allocation3], 0  ;;  %v21_v12 = vld [vmem:[%s390_s0] sm:$0xff]  ;;  %v22_v16 = vld [vmem:[%s390_s0 + $0x8] sm:$0xff]  ;;  %vm146_vm3 = vcmask 130048   ;;  %s169_s11 = sshll.u32 %s395_s5, 4  ;;  %s170_s11 = int_to_ptr.hbm [resolvable:$true] %s169_s11 }
   0x8   :  { %v75_v6 = vmax.f32 %v74_v5, 0.0  ;;  %v37_v13 = vld [vmem:[%s391_s1] sm:$0xff]  ;;  %v38_v17 = vld [vmem:[%s391_s1 + $0x8] sm:$0xff]  ;;  %v23_v18 = vld [vmem:[%s390_s0 + $0x10] sm:$0xff]  ;;  %s214_s12 = smov 8  }
   0x9   :  { %v87_v15 = vld [vmem:[%s393_s3] sm:$0x1]  ;;  %v39_v19 = vld [vmem:[%s391_s1 + $0x10] sm:$0xff]  ;;  %v24_v20 = vld [vmem:[%s390_s0 + $0x18] sm:$0xff]  ;;  %v53_v33 = vadd.f32 %v37_v13, %v21_v12  ;;  %v54_v35 = vadd.f32 %v38_v17, %v22_v16  ;;  %s213_s3 = smov 128  }
   0xa   :  { %v76_v7 = vadd.f32 1e-05, %v75_v6  ;;  %v40_v21 = vld [vmem:[%s391_s1 + $0x18] sm:$0xff]  ;;  %v25_v23 = vld [vmem:[%s390_s0 + $0x20] sm:$0xff]  ;;  %v26_v25 = vld [vmem:[%s390_s0 + $0x28] sm:$0xff]  ;;  %v55_v36 = vadd.f32 %v39_v19, %v23_v18 }
   0xb   :  { %v41_v24 = vld [vmem:[%s391_s1 + $0x20] sm:$0xff]  ;;  %v42_v26 = vld [vmem:[%s391_s1 + $0x28] sm:$0xff]  ;;  %v27_v27 = vld [vmem:[%s390_s0 + $0x30] sm:$0xff]  ;;  %v56_v41 = vadd.f32 %v40_v21, %v24_v20 }
   0xc   :  { %184 = vrsqrt.f32 %v76_v7  ;;  %vm83_vm0 = vweird.f32 %v76_v7  ;;  %v43_v28 = vld [vmem:[%s391_s1 + $0x30] sm:$0xff]  ;;  %v28_v30 = vld [vmem:[%s390_s0 + $0x38] sm:$0xff]  ;;  %v29_v32 = vld [vmem:[%s390_s0 + $0x40] sm:$0xff]  ;;  %v57_v42 = vadd.f32 %v41_v24, %v25_v23  ;;  %v58_v43 = vadd.f32 %v42_v26, %v26_v25 }
   0xd   :  { %v44_v31 = vld [vmem:[%s391_s1 + $0x38] sm:$0xff]  ;;  %v45_v37 = vld [vmem:[%s391_s1 + $0x40] sm:$0xff]  ;;  %v30_v38 = vld [vmem:[%s390_s0 + $0x48] sm:$0xff]  ;;  %v59_v47 = vadd.f32 %v43_v28, %v27_v27 }
   0xe   :  { %v46_v39 = vld [vmem:[%s391_s1 + $0x48] sm:$0xff]  ;;  %v89_v40 = vld [vmem:[%s394_s4] sm:$0x1]  ;;  %v31_v44 = vld [vmem:[%s390_s0 + $0x50] sm:$0xff]  ;;  %v60_v51 = vadd.f32 %v44_v31, %v28_v30  ;;  %v61_v52 = vadd.f32 %v45_v37, %v29_v32 }
   0xf   :  { %v47_v48 = vld [vmem:[%s391_s1 + $0x50] sm:$0xff]  ;;  %v32_v49 = vld [vmem:[%s390_s0 + $0x58] sm:$0xff]  ;;  %v62_v53 = vadd.f32 %v46_v39, %v30_v38  ;;  %v33_v54 = vld [vmem:[%s390_s0 + $0x60] sm:$0xff] }
  0x10   :  { %v48_v50 = vld [vmem:[%s391_s1 + $0x58] sm:$0xff]  ;;  %v49_v55 = vld [vmem:[%s391_s1 + $0x60] sm:$0xff]  ;;  %v34_v56 = vld [vmem:[%s390_s0 + $0x68] sm:$0xff]  ;;  %v63_v3 = vadd.f32 %v47_v48, %v31_v44 }
  0x11   :  { %v50_v61 = vld [vmem:[%s391_s1 + $0x68] sm:$0xff]  ;;  %v35_v62 = vld [vmem:[%s390_s0 + $0x70] sm:$0xff]  ;;  %v64_v6 = vadd.f32 %v48_v50, %v32_v49  ;;  %v36_v16 = vld [vmem:[%s390_s0 + $0x78] sm:$0xff]  ;;  %s212_s0 = smov [#allocation2]  }
  0x12   :  { %v185_v8 = vpop.eup %184  ;;  %v51_v63 = vld [vmem:[%s391_s1 + $0x70] sm:$0xff]  ;;  %v52_v17 = vld [vmem:[%s391_s1 + $0x78] sm:$0xff]  ;;  %s167_s1 = sshll.u32 %s212_s0, 4  ;;  %s168_s1 = int_to_ptr.vmem [resolvable:$true] %s167_s1 }
  0x13   :  { %v78_v9 = vmul.f32 %v185_v8, %v76_v7  ;;  %vm84_vm1 = vweird.f32 %v185_v8  ;;  %v65_v7 = vadd.f32 %v49_v55, %v33_v54 }
  0x14   :  { %vm85_vm2 = vmor %vm83_vm0, %vm84_vm1 }
  0x15   :  { %v79_v10 = vmul.f32 %v185_v8, %v78_v9 }
  0x17   :  { %v80_v11 = vmul.f32 0.5, %v79_v10  ;;  %v66_v10 = vadd.f32 %v50_v61, %v34_v56 }
  0x19   :  { %v81_v14 = vsub.f32 1.5, %v80_v11  ;;  %v67_v11 = vadd.f32 %v51_v63, %v35_v62 }
  0x1b   :  { %v82_v22 = vmul.f32 %v185_v8, %v81_v14 }
  0x1d   :  { %v86_v29 = vsel %vm85_vm2, %v185_v8, %v82_v22 }
  0x1e   :  { %v88_v34 = vmul.f32 %v87_v15, %v86_v29  ;;  %v68_v29 = vadd.f32 %v52_v17, %v36_v16 }
  0x20   :  { %v90_v45 = vmul.f32 %v88_v34, %v70_v1  ;;  %v320_v46 = vperm.slane %v88_v34, 0 }
  0x22   :  { %v91_v57 = vsub.f32 %v89_v40, %v90_v45  ;;  %v95_v58 = vmul.f32 %v320_v46, %v53_v33  ;;  %v96_v59 = vmul.f32 %v320_v46, %v54_v35  ;;  %v97_v60 = vmul.f32 %v320_v46, %v55_v36 }
  0x23   :  { %v98_v0 = vmul.f32 %v320_v46, %v56_v41  ;;  %v99_v1 = vmul.f32 %v320_v46, %v57_v42  ;;  %v100_v2 = vmul.f32 %v320_v46, %v58_v43  ;;  %v101_v5 = vmul.f32 %v320_v46, %v59_v47 }
  0x24   :  { %v112_v4 = vperm.slane %v91_v57, 0  ;;  %v102_v8 = vmul.f32 %v320_v46, %v60_v51  ;;  %v103_v9 = vmul.f32 %v320_v46, %v61_v52  ;;  %v104_v20 = vmul.f32 %v320_v46, %v62_v53 }
  0x25   :  { %v105_v21 = vmul.f32 %v320_v46, %v63_v3  ;;  %v106_v28 = vmul.f32 %v320_v46, %v64_v6  ;;  %v107_v32 = vmul.f32 %v320_v46, %v65_v7  ;;  %v108_v35 = vmul.f32 %v320_v46, %v66_v10 }
  0x26   :  { %v114_v12 = vadd.f32 %v112_v4, %v95_v58  ;;  %v115_v13 = vadd.f32 %v112_v4, %v96_v59  ;;  %v116_v14 = vadd.f32 %v112_v4, %v97_v60  ;;  %v117_v15 = vadd.f32 %v112_v4, %v98_v0 }
  0x27   :  { %v118_v18 = vadd.f32 %v112_v4, %v99_v1  ;;  %v119_v19 = vadd.f32 %v112_v4, %v100_v2  ;;  %v120_v25 = vadd.f32 %v112_v4, %v101_v5  ;;  %v121_v27 = vadd.f32 %v112_v4, %v102_v8 }
  0x28   :  { %v130_v22 = vmax.f32 %v114_v12, 0.0  ;;  %v131_v23 = vmax.f32 %v115_v13, 0.0  ;;  %v132_v24 = vmax.f32 %v116_v14, 0.0  ;;  %v133_v26 = vmax.f32 %v117_v15, 0.0 }
  0x29   :  { %v134_v30 = vmax.f32 %v118_v18, 0.0  ;;  %v122_v31 = vadd.f32 %v112_v4, %v103_v9  ;;  %v135_v33 = vmax.f32 %v119_v19, 0.0  ;;  %v123_v34 = vadd.f32 %v112_v4, %v104_v20 }
  0x2a   :  { %147 = vst.msk [vmem:[#allocation2] sm:$0xff] %vm146_vm3, %v130_v22  ;;  %v136_v36 = vmax.f32 %v120_v25, 0.0  ;;  %v124_v37 = vadd.f32 %v112_v4, %v105_v21  ;;  %v109_v38 = vmul.f32 %v320_v46, %v67_v11  ;;  %v137_v39 = vmax.f32 %v121_v27, 0.0 }
  0x2b   :  { %148 = vst.msk [vmem:[#allocation2 + $0x8] sm:$0xff] %vm146_vm3, %v131_v23  ;;  %v125_v40 = vadd.f32 %v112_v4, %v106_v28  ;;  %v110_v41 = vmul.f32 %v320_v46, %v68_v29  ;;  %v138_v42 = vmax.f32 %v122_v31, 0.0  ;;  %v126_v43 = vadd.f32 %v112_v4, %v107_v32 }
  0x2c   :  { %149 = vst.msk [vmem:[#allocation2 + $0x10] sm:$0xff] %vm146_vm3, %v132_v24  ;;  %v139_v44 = vmax.f32 %v123_v34, 0.0  ;;  %v127_v45 = vadd.f32 %v112_v4, %v108_v35  ;;  %v140_v47 = vmax.f32 %v124_v37, 0.0  ;;  %v128_v48 = vadd.f32 %v112_v4, %v109_v38 }
  0x2d   :  { %150 = vst.msk [vmem:[#allocation2 + $0x18] sm:$0xff] %vm146_vm3, %v133_v26  ;;  %v141_v49 = vmax.f32 %v125_v40, 0.0  ;;  %v129_v50 = vadd.f32 %v112_v4, %v110_v41  ;;  %v142_v51 = vmax.f32 %v126_v43, 0.0 }
  0x2e   :  { %151 = vst.msk [vmem:[#allocation2 + $0x20] sm:$0xff] %vm146_vm3, %v134_v30  ;;  %v143_v46 = vmax.f32 %v127_v45, 0.0  ;;  %v144_v52 = vmax.f32 %v128_v48, 0.0 }
  0x2f   :  { %152 = vst.msk [vmem:[#allocation2 + $0x28] sm:$0xff] %vm146_vm3, %v135_v33  ;;  %v145_v53 = vmax.f32 %v129_v50, 0.0 }
  0x30   :  { %153 = vst.msk [vmem:[#allocation2 + $0x30] sm:$0xff] %vm146_vm3, %v136_v36 }
  0x31   :  { %154 = vst.msk [vmem:[#allocation2 + $0x38] sm:$0xff] %vm146_vm3, %v137_v39 }
  0x32   :  { %155 = vst.msk [vmem:[#allocation2 + $0x40] sm:$0xff] %vm146_vm3, %v138_v42 }
  0x33   :  { %156 = vst.msk [vmem:[#allocation2 + $0x48] sm:$0xff] %vm146_vm3, %v139_v44 }
  0x34   :  { %157 = vst.msk [vmem:[#allocation2 + $0x50] sm:$0xff] %vm146_vm3, %v140_v47 }
  0x35   :  { %158 = vst.msk [vmem:[#allocation2 + $0x58] sm:$0xff] %vm146_vm3, %v141_v49 }
  0x36   :  { %159 = vst.msk [vmem:[#allocation2 + $0x60] sm:$0xff] %vm146_vm3, %v142_v51 }
  0x37   :  { %160 = vst.msk [vmem:[#allocation2 + $0x68] sm:$0xff] %vm146_vm3, %v143_v46 }
  0x38   :  { %161 = vst.msk [vmem:[#allocation2 + $0x70] sm:$0xff] %vm146_vm3, %v144_v52 }
  0x39   :  { %162 = vst.msk [vmem:[#allocation2 + $0x78] sm:$0xff] %vm146_vm3, %v145_v53 }
  0x3a   :  { %175 = dma.vmem_to_hbm [thread:$0]  %s168_s1, 2048, %s170_s11, [#allocation3], %s213_s3, %s213_s3, %s214_s12  }
  0x3b   :  { %210 = dma.done.wait [#allocation3], 2048  }
  0x3c   :  { %211 = vsyncadd [#allocation3], 4294965248 }
  0x3d   :  { %180 = vsyncpa [#allocation3], 1 }

</bundles_post_ra>
